<compile_context>
chip_gen: v7x
topology: tpu7x:2x2x1
jax: 0.10.0
libtpu: 0.0.40
codegen_flags: <defaults>
</compile_context>

<pallas_src>
import functools

import jax
import jax.numpy as jnp
from jax.experimental import pallas as pl
from jax.experimental.pallas import tpu as pltpu


def _resblock_kernel(x_ref, mask_ref, w1_ref, w2_ref, out_ref, mid_ref, patch_ref, *,
                     wp, g, npad, chunk_starts, tile_m):
    """Fused ResBlock forward for one zero-padded image.

    x_ref    : (Npad, Cin)      flattened padded input slab (compute dtype)
    mask_ref : (Nc, 1)  f32     1.0 at interior pixels of the computed range, 0.0 on pad ring
    w1_ref   : (9*Cin, Cmid)    conv1 weights, row index = (kh*3+kw)*Cin + cin
    w2_ref   : (9*Cmid, Cmid)   conv2 weights
    out_ref  : (Npad, Cmid)     output in the same padded layout (compute dtype)
    mid_ref  : (Npad, Cmid)     compute-dtype VMEM scratch: ReLU(conv1(x)) with zero pad ring
    patch_ref: (tile_m, 9*Cmid) compute-dtype VMEM scratch: im2col patch (reused per conv/chunk)
    """
    offs = tuple(di * wp + dj for di in (-1, 0, 1) for dj in (-1, 0, 1))
    cin = x_ref.shape[-1]
    cmid = out_ref.shape[-1]

    def conv3x3(src_ref, base, w_ref, csrc):
        # im2col built in place: 9 statically-offset row windows stored at static lane
        # offsets of the persistent patch, then ONE MXU matmul of contraction depth 9*csrc
        # (no 9-way lane concatenation, no per-tap shallow matmuls).
        for k, o in enumerate(offs):
            patch_ref[:, pl.ds(k * csrc, csrc)] = src_ref[pl.ds(base + o, tile_m), :]
        return jnp.dot(patch_ref[...], w_ref[...], preferred_element_type=jnp.float32)

    # Zero only the 2*g guard rows (the [g, npad-g) range is fully rewritten below),
    # instead of a full-slab zero-init.  Grid steps stay independent, so the batch axis
    # remains megacore-"parallel", and no stale VMEM is ever DMA'd back for out_ref.
    zg = jnp.zeros((g, cmid), mid_ref.dtype)
    mid_ref[pl.ds(0, g), :] = zg
    mid_ref[pl.ds(npad - g, g), :] = zg
    out_ref[pl.ds(0, g), :] = zg.astype(out_ref.dtype)
    out_ref[pl.ds(npad - g, g), :] = zg.astype(out_ref.dtype)

    # Pass 1: conv1 -> ReLU -> interior mask, stored to the compute-dtype mid slab so
    # conv2's taps are already MXU dtype (exact zero pad ring comes from the mask + guards).
    for s in chunk_starts:
        h1 = conv3x3(x_ref, g + s, w1_ref, cin)
        h1 = jnp.maximum(h1, 0.0) * mask_ref[pl.ds(s, tile_m), :]
        mid_ref[pl.ds(g + s, tile_m), :] = h1.astype(mid_ref.dtype)

    # Pass 2: conv2 + identity residual -> ReLU; f32 accumulate / elementwise, single
    # cast at the final store.
    for s in chunk_starts:
        h2 = conv3x3(mid_ref, g + s, w2_ref, cmid)
        res = x_ref[pl.ds(g + s, tile_m), :].astype(jnp.float32)
        out_ref[pl.ds(g + s, tile_m), :] = jnp.maximum(h2 + res, 0.0).astype(out_ref.dtype)


def resblock_forward(x_nchw, w1_oihw, w2_oihw, *, compute_dtype=jnp.bfloat16, tile_m=512):
    """ResBlock forward (NCHW in / NCHW out), matching the bias-free PyTorch module."""
    b, cin, h, w = x_nchw.shape
    cmid = w1_oihw.shape[0]
    assert w1_oihw.shape == (cmid, cin, 3, 3)
    assert w2_oihw.shape == (cmid, cmid, 3, 3)
    # TODO(synk): downsample branch (stride > 1 or inplanes != planes) not implemented;
    # this module instance uses stride=1 with inplanes == planes (identity residual).
    assert cin == cmid, "identity residual path requires inplanes == planes"

    hp, wp = h + 2, w + 2
    npad = hp * wp             # rows of the flattened padded image
    g = wp + 1                 # max |row offset| of a 3x3 tap in the flattened layout
    nc = npad - 2 * g          # computed row range [g, npad-g): covers every interior pixel

    # M (row) tiling: bounds the materialized im2col patch (9x the activation slab) so it
    # never dominates VMEM (matters most on v7x's 64 MiB).  Chunk starts are static Python
    # ints; the trailing chunk is clamped (idempotent overlap recompute).
    n_chunks = max(1, (nc + tile_m - 1) // tile_m)
    tm_raw = (nc + n_chunks - 1) // n_chunks
    tm = min(nc, 8 * ((tm_raw + 7) // 8))
    chunk_starts = tuple(sorted({min(t * tm, nc - tm) for t in range(n_chunks)}))

    # NCHW -> NHWC -> zero-pad H/W by 1 -> (B, Npad, C), cast to MXU compute dtype once.
    # TODO(synk): in a full network keep activations in this padded NHWC layout between
    # blocks (and keep C lane-dense, >=128) instead of transposing/padding every block.
    x_nhwc = jnp.transpose(x_nchw, (0, 2, 3, 1))
    xflat = jnp.pad(x_nhwc, ((0, 0), (1, 1), (1, 1), (0, 0))
                    ).reshape(b, npad, cin).astype(compute_dtype)

    # Interior mask over the computed range (tiny, VMEM-resident): zeroes conv1 outputs on
    # the pad ring so the mid slab provides exact zero padding for conv2.
    mask = jnp.pad(jnp.ones((h, w, 1), jnp.float32),
                   ((1, 1), (1, 1), (0, 0))).reshape(npad, 1)[g:npad - g]

    # PyTorch OIHW -> (kh, kw, Cin, Cout) -> (9*Cin, Cout): one matmul per conv.
    w1f = jnp.transpose(w1_oihw, (2, 3, 1, 0)).reshape(9 * cin, cmid).astype(compute_dtype)
    w2f = jnp.transpose(w2_oihw, (2, 3, 1, 0)).reshape(9 * cmid, cmid).astype(compute_dtype)

    # VMEM budget derived from the actual buffers (double-buffered in/out slabs, resident
    # weights/mask, mid + patch scratch), with headroom, capped to the device's capacity.
    cb = jnp.dtype(compute_dtype).itemsize
    need = (2 * npad * cin * cb + 2 * npad * cmid * cb      # pipelined in/out slabs
            + 2 * nc * 4                                    # interior mask
            + 2 * 9 * cmid * (cin + cmid) * cb              # resident weights
            + npad * cmid * cb + tm * 9 * cmid * cb)        # mid + im2col patch scratch
    try:
        cap = int(getattr(pltpu.get_tpu_info(), "vmem_capacity_bytes", 128 << 20))
    except Exception:
        cap = 128 << 20
    vmem_limit = max(32 << 20, min(int(1.5 * need) + (4 << 20), int(0.85 * cap)))

    cost = pl.CostEstimate(
        flops=int(2 * b * nc * 9 * (cin * cmid + cmid * cmid)),
        transcendentals=0,
        bytes_accessed=int(b * npad * (cin + cmid) * cb + nc * 4
                           + 9 * cmid * (cin + cmid) * cb),
    )

    kernel = functools.partial(_resblock_kernel, wp=wp, g=g, npad=npad,
                               chunk_starts=chunk_starts, tile_m=tm)

    out_flat = pl.pallas_call(
        kernel,
        out_shape=jax.ShapeDtypeStruct((b, npad, cmid), compute_dtype),
        grid=(b,),                                                  # one padded image/step
        in_specs=[
            pl.BlockSpec((None, npad, cin), lambda i: (i, 0, 0)),   # pipelined input slab
            pl.BlockSpec((nc, 1), lambda i: (0, 0)),                # VMEM-resident mask
            pl.BlockSpec((9 * cin, cmid), lambda i: (0, 0)),        # VMEM-resident weights
            pl.BlockSpec((9 * cmid, cmid), lambda i: (0, 0)),       # VMEM-resident weights
        ],
        out_specs=pl.BlockSpec((None, npad, cmid), lambda i: (i, 0, 0)),
        scratch_shapes=[pltpu.VMEM((npad, cmid), compute_dtype),    # ReLU(conv1) slab
                        pltpu.VMEM((tm, 9 * cmid), compute_dtype)], # im2col patch
        compiler_params=pltpu.CompilerParams(
            dimension_semantics=("parallel",),                      # megacore-shard batch
            vmem_limit_bytes=vmem_limit,
        ),
        cost_estimate=cost,
    )(xflat, mask, w1f, w2f)

    # TODO(synk): for B==1 (or odd B on v7x's 2 TensorCores) add a second "parallel"
    # row-tile grid axis with a (wp+1)-row halo; unnecessary at these sizes.
    # TODO(synk): in a full network, emit/consume the padded-NHWC slab directly (skip the
    # pad-ring slice and NCHW transpose below, which are extra HBM passes).
    out = out_flat.reshape(b, hp, wp, cmid)[:, 1:-1, 1:-1, :]
    return jnp.transpose(out, (0, 3, 1, 2))


def resblock_reference(x, w1, w2):
    """Pure-JAX reference with the PyTorch module's semantics (NCHW, bias-free, no BN)."""
    dn = ('NCHW', 'OIHW', 'NCHW')

    def conv(a, wgt):
        return jax.lax.conv_general_dilated(
            a, wgt, window_strides=(1, 1), padding=((1, 1), (1, 1)),
            dimension_numbers=dn)

    out = jnp.maximum(conv(x, w1), 0.0)
    out = conv(out, w2) + x
    return jnp.maximum(out, 0.0)


if __name__ == "__main__":
    key = jax.random.PRNGKey(0)
    k1, k2, k3 = jax.random.split(key, 3)

    B, C, H, W = 2, 4, 16, 16
    x = jax.random.normal(k1, (B, C, H, W), jnp.float32)
    scale = 1.0 / (C * 9) ** 0.5
    w1 = jax.random.normal(k2, (C, C, 3, 3), jnp.float32) * scale
    w2 = jax.random.normal(k3, (C, C, 3, 3), jnp.float32) * scale

    # 1) exactness check: f32 end-to-end vs the f32 XLA reference.
    out_f32 = jax.block_until_ready(
        resblock_forward(x, w1, w2, compute_dtype=jnp.float32))
    ref_f32 = resblock_reference(x, w1, w2)
    assert out_f32.shape == ref_f32.shape == (B, C, H, W)
    err_f32 = float(jnp.max(jnp.abs(out_f32 - ref_f32)))
    assert err_f32 < 1e-3, f"f32 max abs err {err_f32}"

    # 2) default path (bf16 MXU operands + bf16 mid/output, f32 accumulation) vs a
    #    bf16-cast reference.
    out_bf16 = jax.block_until_ready(resblock_forward(x, w1, w2))
    to_bf = lambda a: a.astype(jnp.bfloat16).astype(jnp.float32)
    ref_bf16 = resblock_reference(to_bf(x), to_bf(w1), to_bf(w2))
    err_bf16 = float(jnp.max(jnp.abs(out_bf16.astype(jnp.float32) - ref_bf16)))
    assert err_bf16 < 3e-2, f"bf16 max abs err {err_bf16}"

    print("KERNEL_OK")
</pallas_src>

<mosaic_0001>
module attributes {stable_mosaic.version = 11 : i64} {
  func.func @_resblock_kernel(%arg0: i32, %arg1: memref<1x324x4xf32, #tpu.memory_space<vmem>>, %arg2: memref<286x1xf32, #tpu.memory_space<vmem>>, %arg3: memref<36x4xf32, #tpu.memory_space<vmem>>, %arg4: memref<36x4xf32, #tpu.memory_space<vmem>>, %arg5: memref<1x324x4xf32, #tpu.memory_space<vmem>>, %arg6: memref<324x4xf32, #tpu.memory_space<vmem>>, %arg7: memref<286x36xf32, #tpu.memory_space<vmem>>) attributes {dimension_semantics = [#tpu.dimension_semantics<parallel>], iteration_bounds = array<i64: 2>, scalar_prefetch = 0 : i64, scratch_operands = 2 : i64, tpu.core_type = #tpu.core_type<tc>, window_params = [{transform_indices = @transform_0, window_bounds = array<i64: 1, 324, 4>}, {pipeline_mode = #tpu.pipeline_mode<synchronous>, transform_indices = @transform_1, window_bounds = array<i64: 286, 1>}, {pipeline_mode = #tpu.pipeline_mode<synchronous>, transform_indices = @transform_2, window_bounds = array<i64: 36, 4>}, {pipeline_mode = #tpu.pipeline_mode<synchronous>, transform_indices = @transform_3, window_bounds = array<i64: 36, 4>}, {transform_indices = @transform_4, window_bounds = array<i64: 1, 324, 4>}]} {
    %cst = arith.constant 0.000000e+00 : f32
    %0 = vector.broadcast %cst : f32 to vector<19x4xf32>
    %c0 = arith.constant 0 : index
    %c0_0 = arith.constant 0 : index
    %1 = vector.load %arg6[%c0, %c0_0] : memref<324x4xf32, #tpu.memory_space<vmem>>, vector<19x4xf32>
    tpu.vector_store %arg6[%c0, %c0_0], %0 {strides = array<i32>} : memref<324x4xf32, #tpu.memory_space<vmem>>, vector<19x4xf32>,
    %c305 = arith.constant 305 : index
    %c0_1 = arith.constant 0 : index
    %2 = vector.load %arg6[%c305, %c0_1] : memref<324x4xf32, #tpu.memory_space<vmem>>, vector<19x4xf32>
    tpu.vector_store %arg6[%c305, %c0_1], %0 {strides = array<i32>} : memref<324x4xf32, #tpu.memory_space<vmem>>, vector<19x4xf32>,
    %c0_2 = arith.constant 0 : index
    %c0_3 = arith.constant 0 : index
    %c0_4 = arith.constant 0 : index
    %3 = vector.load %arg5[%c0_2, %c0_3, %c0_4] : memref<1x324x4xf32, #tpu.memory_space<vmem>>, vector<1x19x4xf32>
    %4 = vector.shape_cast %3 : vector<1x19x4xf32> to vector<19x4xf32>
    %5 = vector.shape_cast %0 : vector<19x4xf32> to vector<1x19x4xf32>
    tpu.vector_store %arg5[%c0_2, %c0_3, %c0_4], %5 {strides = array<i32>} : memref<1x324x4xf32, #tpu.memory_space<vmem>>, vector<1x19x4xf32>,
    %c0_5 = arith.constant 0 : index
    %c305_6 = arith.constant 305 : index
    %c0_7 = arith.constant 0 : index
    %6 = vector.load %arg5[%c0_5, %c305_6, %c0_7] : memref<1x324x4xf32, #tpu.memory_space<vmem>>, vector<1x19x4xf32>
    %7 = vector.shape_cast %6 : vector<1x19x4xf32> to vector<19x4xf32>
    %8 = vector.shape_cast %0 : vector<19x4xf32> to vector<1x19x4xf32>
    tpu.vector_store %arg5[%c0_5, %c305_6, %c0_7], %8 {strides = array<i32>} : memref<1x324x4xf32, #tpu.memory_space<vmem>>, vector<1x19x4xf32>,
    %c0_8 = arith.constant 0 : index
    %c0_9 = arith.constant 0 : index
    %c0_10 = arith.constant 0 : index
    %9 = vector.load %arg1[%c0_8, %c0_9, %c0_10] : memref<1x324x4xf32, #tpu.memory_space<vmem>>, vector<1x286x4xf32>
    %10 = vector.shape_cast %9 : vector<1x286x4xf32> to vector<286x4xf32>
    %c0_11 = arith.constant 0 : index
    %c0_12 = arith.constant 0 : index
    %11 = vector.load %arg7[%c0_11, %c0_12] : memref<286x36xf32, #tpu.memory_space<vmem>>, vector<286x4xf32>
    tpu.vector_store %arg7[%c0_11, %c0_12], %10 {strides = array<i32>} : memref<286x36xf32, #tpu.memory_space<vmem>>, vector<286x4xf32>,
    %c0_13 = arith.constant 0 : index
    %c1 = arith.constant 1 : index
    %c0_14 = arith.constant 0 : index
    %12 = vector.load %arg1[%c0_13, %c1, %c0_14] : memref<1x324x4xf32, #tpu.memory_space<vmem>>, vector<1x286x4xf32>
    %13 = vector.shape_cast %12 : vector<1x286x4xf32> to vector<286x4xf32>
    %c0_15 = arith.constant 0 : index
    %c4 = arith.constant 4 : index
    %14 = vector.load %arg7[%c0_15, %c4] : memref<286x36xf32, #tpu.memory_space<vmem>>, vector<286x4xf32>
    tpu.vector_store %arg7[%c0_15, %c4], %13 {strides = array<i32>} : memref<286x36xf32, #tpu.memory_space<vmem>>, vector<286x4xf32>,
    %c0_16 = arith.constant 0 : index
    %c2 = arith.constant 2 : index
    %c0_17 = arith.constant 0 : index
    %15 = vector.load %arg1[%c0_16, %c2, %c0_17] : memref<1x324x4xf32, #tpu.memory_space<vmem>>, vector<1x286x4xf32>
    %16 = vector.shape_cast %15 : vector<1x286x4xf32> to vector<286x4xf32>
    %c0_18 = arith.constant 0 : index
    %c8 = arith.constant 8 : index
    %17 = vector.load %arg7[%c0_18, %c8] : memref<286x36xf32, #tpu.memory_space<vmem>>, vector<286x4xf32>
    tpu.vector_store %arg7[%c0_18, %c8], %16 {strides = array<i32>} : memref<286x36xf32, #tpu.memory_space<vmem>>, vector<286x4xf32>,
    %c0_19 = arith.constant 0 : index
    %c18 = arith.constant 18 : index
    %c0_20 = arith.constant 0 : index
    %18 = vector.load %arg1[%c0_19, %c18, %c0_20] : memref<1x324x4xf32, #tpu.memory_space<vmem>>, vector<1x286x4xf32>
    %19 = vector.shape_cast %18 : vector<1x286x4xf32> to vector<286x4xf32>
    %c0_21 = arith.constant 0 : index
    %c12 = arith.constant 12 : index
    %20 = vector.load %arg7[%c0_21, %c12] : memref<286x36xf32, #tpu.memory_space<vmem>>, vector<286x4xf32>
    tpu.vector_store %arg7[%c0_21, %c12], %19 {strides = array<i32>} : memref<286x36xf32, #tpu.memory_space<vmem>>, vector<286x4xf32>,
    %c0_22 = arith.constant 0 : index
    %c19 = arith.constant 19 : index
    %c0_23 = arith.constant 0 : index
    %21 = vector.load %arg1[%c0_22, %c19, %c0_23] : memref<1x324x4xf32, #tpu.memory_space<vmem>>, vector<1x286x4xf32>
    %22 = vector.shape_cast %21 : vector<1x286x4xf32> to vector<286x4xf32>
    %c0_24 = arith.constant 0 : index
    %c16 = arith.constant 16 : index
    %23 = vector.load %arg7[%c0_24, %c16] : memref<286x36xf32, #tpu.memory_space<vmem>>, vector<286x4xf32>
    tpu.vector_store %arg7[%c0_24, %c16], %22 {strides = array<i32>} : memref<286x36xf32, #tpu.memory_space<vmem>>, vector<286x4xf32>,
    %c0_25 = arith.constant 0 : index
    %c20 = arith.constant 20 : index
    %c0_26 = arith.constant 0 : index
    %24 = vector.load %arg1[%c0_25, %c20, %c0_26] : memref<1x324x4xf32, #tpu.memory_space<vmem>>, vector<1x286x4xf32>
    %25 = vector.shape_cast %24 : vector<1x286x4xf32> to vector<286x4xf32>
    %c0_27 = arith.constant 0 : index
    %c20_28 = arith.constant 20 : index
    %26 = vector.load %arg7[%c0_27, %c20_28] : memref<286x36xf32, #tpu.memory_space<vmem>>, vector<286x4xf32>
    tpu.vector_store %arg7[%c0_27, %c20_28], %25 {strides = array<i32>} : memref<286x36xf32, #tpu.memory_space<vmem>>, vector<286x4xf32>,
    %c0_29 = arith.constant 0 : index
    %c36 = arith.constant 36 : index
    %c0_30 = arith.constant 0 : index
    %27 = vector.load %arg1[%c0_29, %c36, %c0_30] : memref<1x324x4xf32, #tpu.memory_space<vmem>>, vector<1x286x4xf32>
    %28 = vector.shape_cast %27 : vector<1x286x4xf32> to vector<286x4xf32>
    %c0_31 = arith.constant 0 : index
    %c24 = arith.constant 24 : index
    %29 = vector.load %arg7[%c0_31, %c24] : memref<286x36xf32, #tpu.memory_space<vmem>>, vector<286x4xf32>
    tpu.vector_store %arg7[%c0_31, %c24], %28 {strides = array<i32>} : memref<286x36xf32, #tpu.memory_space<vmem>>, vector<286x4xf32>,
    %c0_32 = arith.constant 0 : index
    %c37 = arith.constant 37 : index
    %c0_33 = arith.constant 0 : index
    %30 = vector.load %arg1[%c0_32, %c37, %c0_33] : memref<1x324x4xf32, #tpu.memory_space<vmem>>, vector<1x286x4xf32>
    %31 = vector.shape_cast %30 : vector<1x286x4xf32> to vector<286x4xf32>
    %c0_34 = arith.constant 0 : index
    %c28 = arith.constant 28 : index
    %32 = vector.load %arg7[%c0_34, %c28] : memref<286x36xf32, #tpu.memory_space<vmem>>, vector<286x4xf32>
    tpu.vector_store %arg7[%c0_34, %c28], %31 {strides = array<i32>} : memref<286x36xf32, #tpu.memory_space<vmem>>, vector<286x4xf32>,
    %c0_35 = arith.constant 0 : index
    %c38 = arith.constant 38 : index
    %c0_36 = arith.constant 0 : index
    %33 = vector.load %arg1[%c0_35, %c38, %c0_36] : memref<1x324x4xf32, #tpu.memory_space<vmem>>, vector<1x286x4xf32>
    %34 = vector.shape_cast %33 : vector<1x286x4xf32> to vector<286x4xf32>
    %c0_37 = arith.constant 0 : index
    %c32 = arith.constant 32 : index
    %35 = vector.load %arg7[%c0_37, %c32] : memref<286x36xf32, #tpu.memory_space<vmem>>, vector<286x4xf32>
    tpu.vector_store %arg7[%c0_37, %c32], %34 {strides = array<i32>} : memref<286x36xf32, #tpu.memory_space<vmem>>, vector<286x4xf32>,
    %c0_38 = arith.constant 0 : index
    %c0_39 = arith.constant 0 : index
    %36 = vector.load %arg7[%c0_38, %c0_39] : memref<286x36xf32, #tpu.memory_space<vmem>>, vector<286x36xf32>
    %c0_40 = arith.constant 0 : index
    %c0_41 = arith.constant 0 : index
    %37 = vector.load %arg3[%c0_40, %c0_41] : memref<36x4xf32, #tpu.memory_space<vmem>>, vector<36x4xf32>
    %cst_42 = arith.constant dense<0.000000e+00> : vector<286x4xf32>
    %38 = tpu.matmul %36, %37, %cst_42 {dimension_numbers = #tpu.dot_dimension_numbers<[1], [0], [0], [1], [0, 0, 1, 1], [], []>} : vector<286x36xf32>, vector<36x4xf32>, vector<286x4xf32> -> vector<286x4xf32>
    %cst_43 = arith.constant 0.000000e+00 : f32
    %39 = vector.broadcast %cst_43 : f32 to vector<286x4xf32>
    %40 = arith.maximumf %38, %39 : vector<286x4xf32>
    %c0_44 = arith.constant 0 : index
    %c0_45 = arith.constant 0 : index
    %41 = vector.load %arg2[%c0_44, %c0_45] : memref<286x1xf32, #tpu.memory_space<vmem>>, vector<286x1xf32>
    %42 = vector.broadcast %41 : vector<286x1xf32> to vector<286x4xf32>
    %43 = arith.mulf %40, %42 : vector<286x4xf32>
    %c19_46 = arith.constant 19 : index
    %c0_47 = arith.constant 0 : index
    %44 = vector.load %arg6[%c19_46, %c0_47] : memref<324x4xf32, #tpu.memory_space<vmem>>, vector<286x4xf32>
    tpu.vector_store %arg6[%c19_46, %c0_47], %43 {strides = array<i32>} : memref<324x4xf32, #tpu.memory_space<vmem>>, vector<286x4xf32>,
    %c0_48 = arith.constant 0 : index
    %c0_49 = arith.constant 0 : index
    %45 = vector.load %arg6[%c0_48, %c0_49] : memref<324x4xf32, #tpu.memory_space<vmem>>, vector<286x4xf32>
    %c0_50 = arith.constant 0 : index
    %c0_51 = arith.constant 0 : index
    %46 = vector.load %arg7[%c0_50, %c0_51] : memref<286x36xf32, #tpu.memory_space<vmem>>, vector<286x4xf32>
    tpu.vector_store %arg7[%c0_50, %c0_51], %45 {strides = array<i32>} : memref<286x36xf32, #tpu.memory_space<vmem>>, vector<286x4xf32>,
    %c1_52 = arith.constant 1 : index
    %c0_53 = arith.constant 0 : index
    %47 = vector.load %arg6[%c1_52, %c0_53] : memref<324x4xf32, #tpu.memory_space<vmem>>, vector<286x4xf32>
    %c0_54 = arith.constant 0 : index
    %c4_55 = arith.constant 4 : index
    %48 = vector.load %arg7[%c0_54, %c4_55] : memref<286x36xf32, #tpu.memory_space<vmem>>, vector<286x4xf32>
    tpu.vector_store %arg7[%c0_54, %c4_55], %47 {strides = array<i32>} : memref<286x36xf32, #tpu.memory_space<vmem>>, vector<286x4xf32>,
    %c2_56 = arith.constant 2 : index
    %c0_57 = arith.constant 0 : index
    %49 = vector.load %arg6[%c2_56, %c0_57] : memref<324x4xf32, #tpu.memory_space<vmem>>, vector<286x4xf32>
    %c0_58 = arith.constant 0 : index
    %c8_59 = arith.constant 8 : index
    %50 = vector.load %arg7[%c0_58, %c8_59] : memref<286x36xf32, #tpu.memory_space<vmem>>, vector<286x4xf32>
    tpu.vector_store %arg7[%c0_58, %c8_59], %49 {strides = array<i32>} : memref<286x36xf32, #tpu.memory_space<vmem>>, vector<286x4xf32>,
    %c18_60 = arith.constant 18 : index
    %c0_61 = arith.constant 0 : index
    %51 = vector.load %arg6[%c18_60, %c0_61] : memref<324x4xf32, #tpu.memory_space<vmem>>, vector<286x4xf32>
    %c0_62 = arith.constant 0 : index
    %c12_63 = arith.constant 12 : index
    %52 = vector.load %arg7[%c0_62, %c12_63] : memref<286x36xf32, #tpu.memory_space<vmem>>, vector<286x4xf32>
    tpu.vector_store %arg7[%c0_62, %c12_63], %51 {strides = array<i32>} : memref<286x36xf32, #tpu.memory_space<vmem>>, vector<286x4xf32>,
    %c19_64 = arith.constant 19 : index
    %c0_65 = arith.constant 0 : index
    %53 = vector.load %arg6[%c19_64, %c0_65] : memref<324x4xf32, #tpu.memory_space<vmem>>, vector<286x4xf32>
    %c0_66 = arith.constant 0 : index
    %c16_67 = arith.constant 16 : index
    %54 = vector.load %arg7[%c0_66, %c16_67] : memref<286x36xf32, #tpu.memory_space<vmem>>, vector<286x4xf32>
    tpu.vector_store %arg7[%c0_66, %c16_67], %53 {strides = array<i32>} : memref<286x36xf32, #tpu.memory_space<vmem>>, vector<286x4xf32>,
    %c20_68 = arith.constant 20 : index
    %c0_69 = arith.constant 0 : index
    %55 = vector.load %arg6[%c20_68, %c0_69] : memref<324x4xf32, #tpu.memory_space<vmem>>, vector<286x4xf32>
    %c0_70 = arith.constant 0 : index
    %c20_71 = arith.constant 20 : index
    %56 = vector.load %arg7[%c0_70, %c20_71] : memref<286x36xf32, #tpu.memory_space<vmem>>, vector<286x4xf32>
    tpu.vector_store %arg7[%c0_70, %c20_71], %55 {strides = array<i32>} : memref<286x36xf32, #tpu.memory_space<vmem>>, vector<286x4xf32>,
    %c36_72 = arith.constant 36 : index
    %c0_73 = arith.constant 0 : index
    %57 = vector.load %arg6[%c36_72, %c0_73] : memref<324x4xf32, #tpu.memory_space<vmem>>, vector<286x4xf32>
    %c0_74 = arith.constant 0 : index
    %c24_75 = arith.constant 24 : index
    %58 = vector.load %arg7[%c0_74, %c24_75] : memref<286x36xf32, #tpu.memory_space<vmem>>, vector<286x4xf32>
    tpu.vector_store %arg7[%c0_74, %c24_75], %57 {strides = array<i32>} : memref<286x36xf32, #tpu.memory_space<vmem>>, vector<286x4xf32>,
    %c37_76 = arith.constant 37 : index
    %c0_77 = arith.constant 0 : index
    %59 = vector.load %arg6[%c37_76, %c0_77] : memref<324x4xf32, #tpu.memory_space<vmem>>, vector<286x4xf32>
    %c0_78 = arith.constant 0 : index
    %c28_79 = arith.constant 28 : index
    %60 = vector.load %arg7[%c0_78, %c28_79] : memref<286x36xf32, #tpu.memory_space<vmem>>, vector<286x4xf32>
    tpu.vector_store %arg7[%c0_78, %c28_79], %59 {strides = array<i32>} : memref<286x36xf32, #tpu.memory_space<vmem>>, vector<286x4xf32>,
    %c38_80 = arith.constant 38 : index
    %c0_81 = arith.constant 0 : index
    %61 = vector.load %arg6[%c38_80, %c0_81] : memref<324x4xf32, #tpu.memory_space<vmem>>, vector<286x4xf32>
    %c0_82 = arith.constant 0 : index
    %c32_83 = arith.constant 32 : index
    %62 = vector.load %arg7[%c0_82, %c32_83] : memref<286x36xf32, #tpu.memory_space<vmem>>, vector<286x4xf32>
    tpu.vector_store %arg7[%c0_82, %c32_83], %61 {strides = array<i32>} : memref<286x36xf32, #tpu.memory_space<vmem>>, vector<286x4xf32>,
    %c0_84 = arith.constant 0 : index
    %c0_85 = arith.constant 0 : index
    %63 = vector.load %arg7[%c0_84, %c0_85] : memref<286x36xf32, #tpu.memory_space<vmem>>, vector<286x36xf32>
    %c0_86 = arith.constant 0 : index
    %c0_87 = arith.constant 0 : index
    %64 = vector.load %arg4[%c0_86, %c0_87] : memref<36x4xf32, #tpu.memory_space<vmem>>, vector<36x4xf32>
    %cst_88 = arith.constant dense<0.000000e+00> : vector<286x4xf32>
    %65 = tpu.matmul %63, %64, %cst_88 {dimension_numbers = #tpu.dot_dimension_numbers<[1], [0], [0], [1], [0, 0, 1, 1], [], []>} : vector<286x36xf32>, vector<36x4xf32>, vector<286x4xf32> -> vector<286x4xf32>
    %c0_89 = arith.constant 0 : index
    %c19_90 = arith.constant 19 : index
    %c0_91 = arith.constant 0 : index
    %66 = vector.load %arg1[%c0_89, %c19_90, %c0_91] : memref<1x324x4xf32, #tpu.memory_space<vmem>>, vector<1x286x4xf32>
    %67 = vector.shape_cast %66 : vector<1x286x4xf32> to vector<286x4xf32>
    %68 = arith.addf %65, %67 : vector<286x4xf32>
    %cst_92 = arith.constant 0.000000e+00 : f32
    %69 = vector.broadcast %cst_92 : f32 to vector<286x4xf32>
    %70 = arith.maximumf %68, %69 : vector<286x4xf32>
    %c0_93 = arith.constant 0 : index
    %c19_94 = arith.constant 19 : index
    %c0_95 = arith.constant 0 : index
    %71 = vector.load %arg5[%c0_93, %c19_94, %c0_95] : memref<1x324x4xf32, #tpu.memory_space<vmem>>, vector<1x286x4xf32>
    %72 = vector.shape_cast %71 : vector<1x286x4xf32> to vector<286x4xf32>
    %73 = vector.shape_cast %70 : vector<286x4xf32> to vector<1x286x4xf32>
    tpu.vector_store %arg5[%c0_93, %c19_94, %c0_95], %73 {strides = array<i32>} : memref<1x324x4xf32, #tpu.memory_space<vmem>>, vector<1x286x4xf32>,
    return
  }
  func.func @transform_0(%arg0: i32) -> (i32, i32, i32) {
    %c0_i32 = arith.constant 0 : i32
    %c0_i32_0 = arith.constant 0 : i32
    %c0_i32_1 = arith.constant 0 : i32
    return %arg0, %c0_i32, %c0_i32_0 : i32, i32, i32
  }
  func.func @transform_1(%arg0: i32) -> (i32, i32) {
    %c0_i32 = arith.constant 0 : i32
    %c0_i32_0 = arith.constant 0 : i32
    %c0_i32_1 = arith.constant 0 : i32
    return %c0_i32, %c0_i32_0 : i32, i32
  }
  func.func @transform_2(%arg0: i32) -> (i32, i32) {
    %c0_i32 = arith.constant 0 : i32
    %c0_i32_0 = arith.constant 0 : i32
    %c0_i32_1 = arith.constant 0 : i32
    return %c0_i32, %c0_i32_0 : i32, i32
  }
  func.func @transform_3(%arg0: i32) -> (i32, i32) {
    %c0_i32 = arith.constant 0 : i32
    %c0_i32_0 = arith.constant 0 : i32
    %c0_i32_1 = arith.constant 0 : i32
    return %c0_i32, %c0_i32_0 : i32, i32
  }
  func.func @transform_4(%arg0: i32) -> (i32, i32, i32) {
    %c0_i32 = arith.constant 0 : i32
    %c0_i32_0 = arith.constant 0 : i32
    %c0_i32_1 = arith.constant 0 : i32
    return %arg0, %c0_i32, %c0_i32_0 : i32, i32, i32
  }
}

</mosaic_0001>

<bundles_post_ra>
// kernel: tpu_custom_call.1
= control target key start
LH: loop header
LB: loop body
LE: loop exit
PB: predicated region body
PF: predicated region fallthrough
CT: control target
= control target key end

     0   :  { %s5485_s15 = smov 0   ;;  %s7857_s0 = inlined_call_operand.vmem [shape: f32[2,324,4], index: 0, kind: input, shape index: {}]   ;;  %s7858_s1 = inlined_call_operand.vmem [shape: f32[286,1], index: 1, kind: input, shape index: {}]   ;;  %s7859_s2 = inlined_call_operand.vmem [shape: f32[36,4], index: 2, kind: input, shape index: {}]   ;;  %s7860_s3 = inlined_call_operand.vmem [shape: f32[36,4], index: 3, kind: input, shape index: {}]   ;;  %s7861_s4 = inlined_call_operand.vmem [shape: f32[2,324,4], index: 4, kind: output, shape index: {}]  }
   0x1 LB: > { %s5112_s16 = sadd.s32 4294967295, %s5448_s15   ;;  %p5116_p0 = scmp.ge.s32.totalorder %s5448_s15, 1  ;;  %s5448_s15 = sphi %s5485_s15, %s14_s15  }
   0x2   : > { %p162_p1 = scmp.lt.s32.totalorder %s5448_s15, 3 }
   0x4   : > { %p163_p2 = pnand %p5116_p0, %p162_p1 }
   0x5   : > { %p188_p3 = scmp.lt.s32.totalorder (!%p163_p2), %s5112_s16, 1  ;;  %s5450_s21 = smov (!%p163_p2), 4   ;;  %vm198_vm0 = vcmask (!%p163_p2), 31744   ;;  %vm283_vm1 = vcmask (!%p163_p2), 29696   ;;  %vm465_vm2 = vcmask (!%p163_p2), 64544   ;;  %vm501_vm3 = vcmask (!%p163_p2), 62496  }
   0x6   : > { %166 = sbr.rel (%p163_p2) target bundleno = 1782 (0x6f6), region = 36  ;;  %s5451_s22 = smov (!%p163_p2), 8   ;;  %vm683_vm4 = vcmask (!%p163_p2), 97344   ;;  %vm719_vm5 = vcmask (!%p163_p2), 95296   ;;  %vm901_vm6 = vcmask (!%p163_p2), 130144   ;;  %vm937_vm7 = vcmask (!%p163_p2), 128096  }
   0x7   : > { %s5452_s23 = smov (!%p163_p2), 12   ;;  %s5453_s24 = smov (!%p163_p2), 16   ;;  %vm1119_vm8 = vcmask (!%p163_p2), 162944   ;;  %vm7865_vm9 = vcmask (!%p163_p2), 160896   ;;  %vm1337_vm10 = vcmask (!%p163_p2), 195744   ;;  %vm7863_vm11 = vcmask (!%p163_p2), 193696  }
   0x8   : > { %s5454_s25 = smov (!%p163_p2), 20   ;;  %s5455_s26 = smov (!%p163_p2), 24   ;;  %vm1555_vm12 = vcmask (!%p163_p2), 228544   ;;  %vm2179_vm13 = vcmask (!%p163_p2), 1043456   ;;  %vm7862_vm14 = vcmask (!%p163_p2), 226496   ;;  %vm1773_vm15 = vcmask (!%p163_p2), 261344  }
   0x9   : > { %s5456_s27 = smov (!%p163_p2), 28   ;;  %s5457_s12 = smov (!%p163_p2), 32  }
   0xd   : > { %s7903_s16 = smov (!%p188_p3, %s5112_s16), 1 }
   0xe   : > { %s5421_s17 = smul.u32 328, %s7903_s16 }
  0x10   : > { %s5501_s20 = scalar_lea.vmem %s7857_s0, %s5421_s17  ;;  %s6811_s28 = scalar_lea.vmem %s7861_s4, %s5421_s17 }
  0x11   : > { %v285_v0 = vld [vmem:[%s5501_s20 + $0x1] sm:$0xff]  ;;  %v287_v1 = vld [vmem:[%s5501_s20 + $0x11] sm:$0xff]  ;;  %v286_v2 = vld [vmem:[%s5501_s20 + $0x9] sm:$0xff] }
  0x12   : > { %357 = vrot.lane.b32.xlu0 %v285_v0, %s5450_s21  ;;  %361 = vrot.lane.b32.xlu1 %v287_v1, %s5450_s21  ;;  %v288_v3 = vld [vmem:[%s5501_s20 + $0x19] sm:$0xff]  ;;  %v289_v4 = vld [vmem:[%s5501_s20 + $0x21] sm:$0xff] }
  0x13   : > { %v290_v5 = vld [vmem:[%s5501_s20 + $0x29] sm:$0xff]  ;;  %v291_v6 = vld [vmem:[%s5501_s20 + $0x31] sm:$0xff]  ;;  %v292_v7 = vld [vmem:[%s5501_s20 + $0x39] sm:$0xff] }
  0x14   : > { %v293_v8 = vld [vmem:[%s5501_s20 + $0x41] sm:$0xff]  ;;  %v294_v9 = vld [vmem:[%s5501_s20 + $0x49] sm:$0xff]  ;;  %v295_v10 = vld [vmem:[%s5501_s20 + $0x51] sm:$0xff] }
  0x15   : > { %v296_v11 = vld [vmem:[%s5501_s20 + $0x59] sm:$0xff]  ;;  %v214_v13 = vld [vmem:[%s5501_s20 + $0x10] sm:$0xff]  ;;  %v297_v14 = vld [vmem:[%s5501_s20 + $0x61] sm:$0xff] }
  0x16   : > { %359 = vrot.lane.b32.xlu0 %v286_v2, %s5450_s21  ;;  %363 = vrot.lane.b32.xlu1 %v288_v3, %s5450_s21  ;;  %v212_v12 = vld [vmem:[%s5501_s20] sm:$0xff]  ;;  %v298_v15 = vld [vmem:[%s5501_s20 + $0x69] sm:$0xff]  ;;  %250 = vst.msk [vmem:[#allocation3 + $0x10] sm:$0xff] %vm198_vm0, %v214_v13 }
  0x17   : > { %248 = vst.msk [vmem:[#allocation3] sm:$0xff] %vm198_vm0, %v212_v12  ;;  %v213_v16 = vld [vmem:[%s5501_s20 + $0x8] sm:$0xff]  ;;  %v215_v17 = vld [vmem:[%s5501_s20 + $0x18] sm:$0xff]  ;;  %v216_v18 = vld [vmem:[%s5501_s20 + $0x20] sm:$0xff] }
  0x18   : > { %249 = vst.msk [vmem:[#allocation3 + $0x8] sm:$0xff] %vm198_vm0, %v213_v16  ;;  %251 = vst.msk [vmem:[#allocation3 + $0x18] sm:$0xff] %vm198_vm0, %v215_v17  ;;  %v217_v19 = vld [vmem:[%s5501_s20 + $0x28] sm:$0xff]  ;;  %v218_v20 = vld [vmem:[%s5501_s20 + $0x30] sm:$0xff] }
  0x19   : > { %252 = vst.msk [vmem:[#allocation3 + $0x20] sm:$0xff] %vm198_vm0, %v216_v18  ;;  %253 = vst.msk [vmem:[#allocation3 + $0x28] sm:$0xff] %vm198_vm0, %v217_v19  ;;  %v299_v21 = vld [vmem:[%s5501_s20 + $0x71] sm:$0xff]  ;;  %v300_v22 = vld [vmem:[%s5501_s20 + $0x79] sm:$0xff] }
  0x1a   : > { %365 = vrot.lane.b32.xlu0 %v289_v4, %s5450_s21  ;;  %367 = vrot.lane.b32.xlu1 %v290_v5, %s5450_s21  ;;  %254 = vst.msk [vmem:[#allocation3 + $0x30] sm:$0xff] %vm198_vm0, %v218_v20  ;;  %v219_v23 = vld [vmem:[%s5501_s20 + $0x38] sm:$0xff]  ;;  %v220_v24 = vld [vmem:[%s5501_s20 + $0x40] sm:$0xff] }
  0x1b   : > { %255 = vst.msk [vmem:[#allocation3 + $0x38] sm:$0xff] %vm198_vm0, %v219_v23  ;;  %v221_v25 = vld [vmem:[%s5501_s20 + $0x48] sm:$0xff]  ;;  %256 = vst.msk [vmem:[#allocation3 + $0x40] sm:$0xff] %vm198_vm0, %v220_v24  ;;  %v222_v26 = vld [vmem:[%s5501_s20 + $0x50] sm:$0xff] }
  0x1c   : > { %257 = vst.msk [vmem:[#allocation3 + $0x48] sm:$0xff] %vm198_vm0, %v221_v25  ;;  %v223_v27 = vld [vmem:[%s5501_s20 + $0x58] sm:$0xff]  ;;  %v301_v28 = vld [vmem:[%s5501_s20 + $0x81] sm:$0xff]  ;;  %258 = vst.msk [vmem:[#allocation3 + $0x50] sm:$0xff] %vm198_vm0, %v222_v26 }
  0x1d   : > { %259 = vst.msk [vmem:[#allocation3 + $0x58] sm:$0xff] %vm198_vm0, %v223_v27  ;;  %v302_v29 = vld [vmem:[%s5501_s20 + $0x89] sm:$0xff]  ;;  %v224_v30 = vld [vmem:[%s5501_s20 + $0x60] sm:$0xff]  ;;  %v227_v33 = vld [vmem:[%s5501_s20 + $0x78] sm:$0xff] }
  0x1e   : > { %369 = vrot.lane.b32.xlu0 %v291_v6, %s5450_s21  ;;  %371 = vrot.lane.b32.xlu1 %v292_v7, %s5450_s21  ;;  %v225_v31 = vld [vmem:[%s5501_s20 + $0x68] sm:$0xff]  ;;  %260 = vst.msk [vmem:[#allocation3 + $0x60] sm:$0xff] %vm198_vm0, %v224_v30  ;;  %v226_v32 = vld [vmem:[%s5501_s20 + $0x70] sm:$0xff]  ;;  %263 = vst.msk [vmem:[#allocation3 + $0x78] sm:$0xff] %vm198_vm0, %v227_v33 }
  0x1f   : > { %261 = vst.msk [vmem:[#allocation3 + $0x68] sm:$0xff] %vm198_vm0, %v225_v31  ;;  %v303_v34 = vld [vmem:[%s5501_s20 + $0x91] sm:$0xff]  ;;  %v304_v35 = vld [vmem:[%s5501_s20 + $0x99] sm:$0xff]  ;;  %262 = vst.msk [vmem:[#allocation3 + $0x70] sm:$0xff] %vm198_vm0, %v226_v32 }
  0x20   : > { %v228_v36 = vld [vmem:[%s5501_s20 + $0x80] sm:$0xff]  ;;  %v229_v37 = vld [vmem:[%s5501_s20 + $0x88] sm:$0xff]  ;;  %v230_v38 = vld [vmem:[%s5501_s20 + $0x90] sm:$0xff] }
  0x21   : > { %264 = vst.msk [vmem:[#allocation3 + $0x80] sm:$0xff] %vm198_vm0, %v228_v36  ;;  %265 = vst.msk [vmem:[#allocation3 + $0x88] sm:$0xff] %vm198_vm0, %v229_v37  ;;  %v231_v39 = vld [vmem:[%s5501_s20 + $0x98] sm:$0xff]  ;;  %v232_v40 = vld [vmem:[%s5501_s20 + $0xa0] sm:$0xff] }
  0x22   : > { %373 = vrot.lane.b32.xlu0 %v293_v8, %s5450_s21  ;;  %375 = vrot.lane.b32.xlu1 %v294_v9, %s5450_s21  ;;  %266 = vst.msk [vmem:[#allocation3 + $0x90] sm:$0xff] %vm198_vm0, %v230_v38  ;;  %267 = vst.msk [vmem:[#allocation3 + $0x98] sm:$0xff] %vm198_vm0, %v231_v39  ;;  %v233_v41 = vld [vmem:[%s5501_s20 + $0xa8] sm:$0xff]  ;;  %v234_v42 = vld [vmem:[%s5501_s20 + $0xb0] sm:$0xff] }
  0x23   : > { %268 = vst.msk [vmem:[#allocation3 + $0xa0] sm:$0xff] %vm198_vm0, %v232_v40  ;;  %v235_v43 = vld [vmem:[%s5501_s20 + $0xb8] sm:$0xff]  ;;  %269 = vst.msk [vmem:[#allocation3 + $0xa8] sm:$0xff] %vm198_vm0, %v233_v41  ;;  %v236_v44 = vld [vmem:[%s5501_s20 + $0xc0] sm:$0xff] }
  0x24   : > { %270 = vst.msk [vmem:[#allocation3 + $0xb0] sm:$0xff] %vm198_vm0, %v234_v42  ;;  %271 = vst.msk [vmem:[#allocation3 + $0xb8] sm:$0xff] %vm198_vm0, %v235_v43  ;;  %v237_v45 = vld [vmem:[%s5501_s20 + $0xc8] sm:$0xff]  ;;  %v238_v48 = vld [vmem:[%s5501_s20 + $0xd0] sm:$0xff] }
  0x25   : > { %272 = vst.msk [vmem:[#allocation3 + $0xc0] sm:$0xff] %vm198_vm0, %v236_v44  ;;  %273 = vst.msk [vmem:[#allocation3 + $0xc8] sm:$0xff] %vm198_vm0, %v237_v45  ;;  %v305_v46 = vld [vmem:[%s5501_s20 + $0xa1] sm:$0xff]  ;;  %v306_v47 = vld [vmem:[%s5501_s20 + $0xa9] sm:$0xff] }
  0x26   : > { %377 = vrot.lane.b32.xlu0 %v295_v10, %s5450_s21  ;;  %379 = vrot.lane.b32.xlu1 %v296_v11, %s5450_s21  ;;  %274 = vst.msk [vmem:[#allocation3 + $0xd0] sm:$0xff] %vm198_vm0, %v238_v48  ;;  %v239_v49 = vld [vmem:[%s5501_s20 + $0xd8] sm:$0xff]  ;;  %v240_v52 = vld [vmem:[%s5501_s20 + $0xe0] sm:$0xff] }
  0x27   : > { %275 = vst.msk [vmem:[#allocation3 + $0xd8] sm:$0xff] %vm198_vm0, %v239_v49  ;;  %v307_v50 = vld [vmem:[%s5501_s20 + $0xb1] sm:$0xff]  ;;  %v308_v51 = vld [vmem:[%s5501_s20 + $0xb9] sm:$0xff]  ;;  %276 = vst.msk [vmem:[#allocation3 + $0xe0] sm:$0xff] %vm198_vm0, %v240_v52 }
  0x28   : > { %v241_v53 = vld [vmem:[%s5501_s20 + $0xe8] sm:$0xff]  ;;  %v242_v56 = vld [vmem:[%s5501_s20 + $0xf0] sm:$0xff]  ;;  %v243_v57 = vld [vmem:[%s5501_s20 + $0xf8] sm:$0xff] }
  0x29   : > { %277 = vst.msk [vmem:[#allocation3 + $0xe8] sm:$0xff] %vm198_vm0, %v241_v53  ;;  %v309_v54 = vld [vmem:[%s5501_s20 + $0xc1] sm:$0xff]  ;;  %v310_v55 = vld [vmem:[%s5501_s20 + $0xc9] sm:$0xff]  ;;  %278 = vst.msk [vmem:[#allocation3 + $0xf0] sm:$0xff] %vm198_vm0, %v242_v56 }
  0x2a   : > { %381 = vrot.lane.b32.xlu0 %v297_v14, %s5450_s21  ;;  %383 = vrot.lane.b32.xlu1 %v298_v15, %s5450_s21  ;;  %279 = vst.msk [vmem:[#allocation3 + $0xf8] sm:$0xff] %vm198_vm0, %v243_v57  ;;  %v311_v58 = vld [vmem:[%s5501_s20 + $0xd1] sm:$0xff]  ;;  %v312_v59 = vld [vmem:[%s5501_s20 + $0xd9] sm:$0xff] }
  0x2b   : > { %v244_v60 = vld [vmem:[%s5501_s20 + $0x100] sm:$0xff]  ;;  %v245_v61 = vld [vmem:[%s5501_s20 + $0x108] sm:$0xff]  ;;  %v246_v0 = vld [vmem:[%s5501_s20 + $0x110] sm:$0xff] }
  0x2c   : > { %280 = vst.msk [vmem:[#allocation3 + $0x100] sm:$0xff] %vm198_vm0, %v244_v60  ;;  %281 = vst.msk [vmem:[#allocation3 + $0x108] sm:$0xff] %vm198_vm0, %v245_v61  ;;  %v313_v62 = vld [vmem:[%s5501_s20 + $0xe1] sm:$0xff]  ;;  %v314_v63 = vld [vmem:[%s5501_s20 + $0xe9] sm:$0xff] }
  0x2d   : > { %282 = vst.msk [vmem:[#allocation3 + $0x110] sm:$0xff] %vm198_vm0, %v246_v0  ;;  %v247_v1 = vld [vmem:[%s5501_s20 + $0x118] sm:$0x3f]  ;;  %v317_v4 = vld [vmem:[%s5501_s20 + $0x101] sm:$0xff]  ;;  %v318_v5 = vld [vmem:[%s5501_s20 + $0x109] sm:$0xff] }
  0x2e   : > { %385 = vrot.lane.b32.xlu0 %v299_v21, %s5450_s21  ;;  %387 = vrot.lane.b32.xlu1 %v300_v22, %s5450_s21  ;;  %284 = vst.msk [vmem:[#allocation3 + $0x118] sm:$0x3f] %vm283_vm1, %v247_v1  ;;  %v315_v2 = vld [vmem:[%s5501_s20 + $0xf1] sm:$0xff]  ;;  %v316_v3 = vld [vmem:[%s5501_s20 + $0xf9] sm:$0xff] }
  0x2f   : > { %v319_v6 = vld [vmem:[%s5501_s20 + $0x111] sm:$0xff]  ;;  %v320_v7 = vld [vmem:[%s5501_s20 + $0x119] sm:$0x3f]  ;;  %v503_v8 = vld [vmem:[%s5501_s20 + $0x2] sm:$0xff] }
  0x30   : > { %v504_v9 = vld [vmem:[%s5501_s20 + $0xa] sm:$0xff]  ;;  %v5652_v10 = vld [vmem:[%s5501_s20 + $0x12] sm:$0xff]  ;;  %v5655_v11 = vld [vmem:[%s5501_s20 + $0x1a] sm:$0xff] }
  0x31   : > { %v5662_v12 = vld [vmem:[%s5501_s20 + $0x22] sm:$0xff]  ;;  %v5665_v13 = vld [vmem:[%s5501_s20 + $0x2a] sm:$0xff]  ;;  %v5672_v14 = vld [vmem:[%s5501_s20 + $0x32] sm:$0xff] }
  0x32   : > { %389 = vrot.lane.b32.xlu0 %v301_v28, %s5450_s21  ;;  %391 = vrot.lane.b32.xlu1 %v302_v29, %s5450_s21  ;;  %v5675_v15 = vld [vmem:[%s5501_s20 + $0x3a] sm:$0xff]  ;;  %v5682_v16 = vld [vmem:[%s5501_s20 + $0x42] sm:$0xff] }
  0x33   : > { %v5685_v17 = vld [vmem:[%s5501_s20 + $0x4a] sm:$0xff]  ;;  %v5692_v18 = vld [vmem:[%s5501_s20 + $0x52] sm:$0xff]  ;;  %v5695_v19 = vld [vmem:[%s5501_s20 + $0x5a] sm:$0xff] }
  0x34   : > { %v5702_v20 = vld [vmem:[%s5501_s20 + $0x62] sm:$0xff]  ;;  %v5705_v21 = vld [vmem:[%s5501_s20 + $0x6a] sm:$0xff]  ;;  %v5712_v22 = vld [vmem:[%s5501_s20 + $0x72] sm:$0xff] }
  0x35   : > { %v5715_v23 = vld [vmem:[%s5501_s20 + $0x7a] sm:$0xff]  ;;  %v5722_v24 = vld [vmem:[%s5501_s20 + $0x82] sm:$0xff]  ;;  %v5725_v25 = vld [vmem:[%s5501_s20 + $0x8a] sm:$0xff] }
  0x36   : > { %393 = vrot.lane.b32.xlu0 %v303_v34, %s5450_s21  ;;  %395 = vrot.lane.b32.xlu1 %v304_v35, %s5450_s21  ;;  %v5732_v26 = vld [vmem:[%s5501_s20 + $0x92] sm:$0xff]  ;;  %v5735_v27 = vld [vmem:[%s5501_s20 + $0x9a] sm:$0xff] }
  0x37   : > { %v5742_v28 = vld [vmem:[%s5501_s20 + $0xa2] sm:$0xff]  ;;  %v5745_v29 = vld [vmem:[%s5501_s20 + $0xaa] sm:$0xff]  ;;  %v5752_v30 = vld [vmem:[%s5501_s20 + $0xb2] sm:$0xff] }
  0x38   : > { %v5755_v31 = vld [vmem:[%s5501_s20 + $0xba] sm:$0xff]  ;;  %v5764_v34 = vld [vmem:[%s5501_s20 + $0xc2] sm:$0xff]  ;;  %v5767_v35 = vld [vmem:[%s5501_s20 + $0xca] sm:$0xff] }
  0x39   : > { %v5776_v38 = vld [vmem:[%s5501_s20 + $0xd2] sm:$0xff]  ;;  %v5779_v39 = vld [vmem:[%s5501_s20 + $0xda] sm:$0xff]  ;;  %v5788_v42 = vld [vmem:[%s5501_s20 + $0xe2] sm:$0xff] }
  0x3a   : > { %397 = vrot.lane.b32.xlu0 %v305_v46, %s5450_s21  ;;  %399 = vrot.lane.b32.xlu1 %v306_v47, %s5450_s21  ;;  %v5791_v43 = vld [vmem:[%s5501_s20 + $0xea] sm:$0xff]  ;;  %v5800_v46 = vld [vmem:[%s5501_s20 + $0xf2] sm:$0xff] }
  0x3b   : > { %v5803_v47 = vld [vmem:[%s5501_s20 + $0xfa] sm:$0xff] }
  0x3e   : > { %401 = vrot.lane.b32.xlu0 %v307_v50, %s5450_s21  ;;  %403 = vrot.lane.b32.xlu1 %v308_v51, %s5450_s21  ;;  %v5812_v50 = vld [vmem:[%s5501_s20 + $0x102] sm:$0xff]  ;;  %v5815_v51 = vld [vmem:[%s5501_s20 + $0x10a] sm:$0xff] }
  0x42   : > { %405 = vrot.lane.b32.xlu0 %v309_v54, %s5450_s21  ;;  %407 = vrot.lane.b32.xlu1 %v310_v55, %s5450_s21  ;;  %v5824_v54 = vld [vmem:[%s5501_s20 + $0x112] sm:$0xff]  ;;  %v538_v55 = vld [vmem:[%s5501_s20 + $0x11a] sm:$0x3f] }
  0x46   : > { %409 = vrot.lane.b32.xlu0 %v311_v58, %s5450_s21  ;;  %411 = vrot.lane.b32.xlu1 %v312_v59, %s5450_s21 }
  0x4a   : > { %413 = vrot.lane.b32.xlu0 %v313_v62, %s5450_s21  ;;  %415 = vrot.lane.b32.xlu1 %v314_v63, %s5450_s21 }
  0x4e   : > { %417 = vrot.lane.b32.xlu0 %v315_v2, %s5450_s21  ;;  %419 = vrot.lane.b32.xlu1 %v316_v3, %s5450_s21 }
  0x52   : > { %421 = vrot.lane.b32.xlu0 %v317_v4, %s5450_s21  ;;  %423 = vrot.lane.b32.xlu1 %v318_v5, %s5450_s21 }
  0x56   : > { %425 = vrot.lane.b32.xlu0 %v319_v6, %s5450_s21  ;;  %427 = vrot.lane.b32.xlu1 %v320_v7, %s5450_s21 }
  0x5a   : > { %575 = vrot.lane.b32.xlu0 %v503_v8, %s5451_s22  ;;  %577 = vrot.lane.b32.xlu1 %v504_v9, %s5451_s22 }
  0x5e   : > { %579 = vrot.lane.b32.xlu0 %v5652_v10, %s5451_s22  ;;  %581 = vrot.lane.b32.xlu1 %v5655_v11, %s5451_s22 }
  0x62   : > { %583 = vrot.lane.b32.xlu0 %v5662_v12, %s5451_s22  ;;  %585 = vrot.lane.b32.xlu1 %v5665_v13, %s5451_s22 }
  0x66   : > { %587 = vrot.lane.b32.xlu0 %v5672_v14, %s5451_s22  ;;  %589 = vrot.lane.b32.xlu1 %v5675_v15, %s5451_s22 }
  0x6a   : > { %591 = vrot.lane.b32.xlu0 %v5682_v16, %s5451_s22  ;;  %593 = vrot.lane.b32.xlu1 %v5685_v17, %s5451_s22 }
  0x6e   : > { %595 = vrot.lane.b32.xlu0 %v5692_v18, %s5451_s22  ;;  %597 = vrot.lane.b32.xlu1 %v5695_v19, %s5451_s22 }
  0x72   : > { %599 = vrot.lane.b32.xlu0 %v5702_v20, %s5451_s22  ;;  %601 = vrot.lane.b32.xlu1 %v5705_v21, %s5451_s22 }
  0x76   : > { %603 = vrot.lane.b32.xlu0 %v5712_v22, %s5451_s22  ;;  %605 = vrot.lane.b32.xlu1 %v5715_v23, %s5451_s22 }
  0x7a   : > { %607 = vrot.lane.b32.xlu0 %v5722_v24, %s5451_s22  ;;  %609 = vrot.lane.b32.xlu1 %v5725_v25, %s5451_s22 }
  0x7e   : > { %611 = vrot.lane.b32.xlu0 %v5732_v26, %s5451_s22  ;;  %613 = vrot.lane.b32.xlu1 %v5735_v27, %s5451_s22 }
  0x82   : > { %615 = vrot.lane.b32.xlu0 %v5742_v28, %s5451_s22  ;;  %617 = vrot.lane.b32.xlu1 %v5745_v29, %s5451_s22 }
  0x84   : > { %v358_v32 = vpop.permute.xlu0 %357  ;;  %v362_v33 = vpop.permute.xlu1 %361 }
  0x85   : > { %466 = vst.msk [vmem:[#allocation3] sm:$0xff] %vm465_vm2, %v358_v32  ;;  %468 = vst.msk [vmem:[#allocation3 + $0x10] sm:$0xff] %vm465_vm2, %v362_v33  ;;  %v939_v33 = vld [vmem:[%s5501_s20 + $0x13] sm:$0xff] }
  0x86   : > { %619 = vrot.lane.b32.xlu0 %v5752_v30, %s5451_s22  ;;  %621 = vrot.lane.b32.xlu1 %v5755_v31, %s5451_s22 }
  0x88   : > { %v360_v36 = vpop.permute.xlu0 %359  ;;  %v364_v37 = vpop.permute.xlu1 %363 }
  0x89   : > { %467 = vst.msk [vmem:[#allocation3 + $0x8] sm:$0xff] %vm465_vm2, %v360_v36  ;;  %469 = vst.msk [vmem:[#allocation3 + $0x18] sm:$0xff] %vm465_vm2, %v364_v37  ;;  %v941_v37 = vld [vmem:[%s5501_s20 + $0x23] sm:$0xff] }
  0x8a   : > { %623 = vrot.lane.b32.xlu0 %v5764_v34, %s5451_s22  ;;  %625 = vrot.lane.b32.xlu1 %v5767_v35, %s5451_s22 }
  0x8c   : > { %v366_v40 = vpop.permute.xlu0 %365  ;;  %v368_v41 = vpop.permute.xlu1 %367 }
  0x8d   : > { %470 = vst.msk [vmem:[#allocation3 + $0x20] sm:$0xff] %vm465_vm2, %v366_v40  ;;  %471 = vst.msk [vmem:[#allocation3 + $0x28] sm:$0xff] %vm465_vm2, %v368_v41  ;;  %v943_v41 = vld [vmem:[%s5501_s20 + $0x33] sm:$0xff] }
  0x8e   : > { %627 = vrot.lane.b32.xlu0 %v5776_v38, %s5451_s22  ;;  %629 = vrot.lane.b32.xlu1 %v5779_v39, %s5451_s22 }
  0x90   : > { %v370_v44 = vpop.permute.xlu0 %369  ;;  %v372_v45 = vpop.permute.xlu1 %371 }
  0x91   : > { %472 = vst.msk [vmem:[#allocation3 + $0x30] sm:$0xff] %vm465_vm2, %v370_v44  ;;  %473 = vst.msk [vmem:[#allocation3 + $0x38] sm:$0xff] %vm465_vm2, %v372_v45  ;;  %v945_v45 = vld [vmem:[%s5501_s20 + $0x43] sm:$0xff] }
  0x92   : > { %631 = vrot.lane.b32.xlu0 %v5788_v42, %s5451_s22  ;;  %633 = vrot.lane.b32.xlu1 %v5791_v43, %s5451_s22 }
  0x94   : > { %v374_v48 = vpop.permute.xlu0 %373  ;;  %v376_v49 = vpop.permute.xlu1 %375 }
  0x95   : > { %474 = vst.msk [vmem:[#allocation3 + $0x40] sm:$0xff] %vm465_vm2, %v374_v48  ;;  %475 = vst.msk [vmem:[#allocation3 + $0x48] sm:$0xff] %vm465_vm2, %v376_v49  ;;  %v947_v49 = vld [vmem:[%s5501_s20 + $0x53] sm:$0xff] }
  0x96   : > { %635 = vrot.lane.b32.xlu0 %v5800_v46, %s5451_s22  ;;  %637 = vrot.lane.b32.xlu1 %v5803_v47, %s5451_s22 }
  0x98   : > { %v378_v52 = vpop.permute.xlu0 %377  ;;  %v380_v53 = vpop.permute.xlu1 %379 }
  0x99   : > { %476 = vst.msk [vmem:[#allocation3 + $0x50] sm:$0xff] %vm465_vm2, %v378_v52  ;;  %477 = vst.msk [vmem:[#allocation3 + $0x58] sm:$0xff] %vm465_vm2, %v380_v53  ;;  %v949_v53 = vld [vmem:[%s5501_s20 + $0x63] sm:$0xff] }
  0x9a   : > { %639 = vrot.lane.b32.xlu0 %v5812_v50, %s5451_s22  ;;  %641 = vrot.lane.b32.xlu1 %v5815_v51, %s5451_s22 }
  0x9c   : > { %v382_v56 = vpop.permute.xlu0 %381  ;;  %v384_v57 = vpop.permute.xlu1 %383 }
  0x9d   : > { %478 = vst.msk [vmem:[#allocation3 + $0x60] sm:$0xff] %vm465_vm2, %v382_v56  ;;  %479 = vst.msk [vmem:[#allocation3 + $0x68] sm:$0xff] %vm465_vm2, %v384_v57  ;;  %v951_v57 = vld [vmem:[%s5501_s20 + $0x73] sm:$0xff] }
  0x9e   : > { %643 = vrot.lane.b32.xlu0 %v5824_v54, %s5451_s22  ;;  %645 = vrot.lane.b32.xlu1 %v538_v55, %s5451_s22 }
  0xa0   : > { %v386_v58 = vpop.permute.xlu0 %385  ;;  %v388_v59 = vpop.permute.xlu1 %387 }
  0xa1   : > { %480 = vst.msk [vmem:[#allocation3 + $0x70] sm:$0xff] %vm465_vm2, %v386_v58  ;;  %481 = vst.msk [vmem:[#allocation3 + $0x78] sm:$0xff] %vm465_vm2, %v388_v59  ;;  %v952_v58 = vld [vmem:[%s5501_s20 + $0x7b] sm:$0xff] }
  0xa2   : > { %793 = vrot.lane.b32.xlu0 %v5652_v10, %s5452_s23  ;;  %795 = vrot.lane.b32.xlu1 %v5655_v11, %s5452_s23 }
  0xa4   : > { %v390_v60 = vpop.permute.xlu0 %389  ;;  %v392_v61 = vpop.permute.xlu1 %391 }
  0xa5   : > { %482 = vst.msk [vmem:[#allocation3 + $0x80] sm:$0xff] %vm465_vm2, %v390_v60  ;;  %483 = vst.msk [vmem:[#allocation3 + $0x88] sm:$0xff] %vm465_vm2, %v392_v61  ;;  %v953_v61 = vld [vmem:[%s5501_s20 + $0x83] sm:$0xff] }
  0xa6   : > { %797 = vrot.lane.b32.xlu0 %v5662_v12, %s5452_s23  ;;  %799 = vrot.lane.b32.xlu1 %v5665_v13, %s5452_s23 }
  0xa8   : > { %v394_v62 = vpop.permute.xlu0 %393  ;;  %v396_v63 = vpop.permute.xlu1 %395 }
  0xa9   : > { %484 = vst.msk [vmem:[#allocation3 + $0x90] sm:$0xff] %vm465_vm2, %v394_v62  ;;  %485 = vst.msk [vmem:[#allocation3 + $0x98] sm:$0xff] %vm465_vm2, %v396_v63  ;;  %v954_v62 = vld [vmem:[%s5501_s20 + $0x8b] sm:$0xff] }
  0xaa   : > { %801 = vrot.lane.b32.xlu0 %v5672_v14, %s5452_s23  ;;  %803 = vrot.lane.b32.xlu1 %v5675_v15, %s5452_s23 }
  0xac   : > { %v398_v0 = vpop.permute.xlu0 %397  ;;  %v400_v1 = vpop.permute.xlu1 %399 }
  0xad   : > { %486 = vst.msk [vmem:[#allocation3 + $0xa0] sm:$0xff] %vm465_vm2, %v398_v0  ;;  %487 = vst.msk [vmem:[#allocation3 + $0xa8] sm:$0xff] %vm465_vm2, %v400_v1  ;;  %v955_v1 = vld [vmem:[%s5501_s20 + $0x93] sm:$0xff] }
  0xae   : > { %805 = vrot.lane.b32.xlu0 %v5682_v16, %s5452_s23  ;;  %807 = vrot.lane.b32.xlu1 %v5685_v17, %s5452_s23 }
  0xb0   : > { %v402_v2 = vpop.permute.xlu0 %401  ;;  %v404_v3 = vpop.permute.xlu1 %403 }
  0xb1   : > { %488 = vst.msk [vmem:[#allocation3 + $0xb0] sm:$0xff] %vm465_vm2, %v402_v2  ;;  %489 = vst.msk [vmem:[#allocation3 + $0xb8] sm:$0xff] %vm465_vm2, %v404_v3  ;;  %v956_v2 = vld [vmem:[%s5501_s20 + $0x9b] sm:$0xff] }
  0xb2   : > { %809 = vrot.lane.b32.xlu0 %v5692_v18, %s5452_s23  ;;  %811 = vrot.lane.b32.xlu1 %v5695_v19, %s5452_s23 }
  0xb4   : > { %v406_v4 = vpop.permute.xlu0 %405  ;;  %v408_v5 = vpop.permute.xlu1 %407 }
  0xb5   : > { %490 = vst.msk [vmem:[#allocation3 + $0xc0] sm:$0xff] %vm465_vm2, %v406_v4  ;;  %491 = vst.msk [vmem:[#allocation3 + $0xc8] sm:$0xff] %vm465_vm2, %v408_v5  ;;  %v957_v5 = vld [vmem:[%s5501_s20 + $0xa3] sm:$0xff] }
  0xb6   : > { %813 = vrot.lane.b32.xlu0 %v5702_v20, %s5452_s23  ;;  %815 = vrot.lane.b32.xlu1 %v5705_v21, %s5452_s23 }
  0xb8   : > { %v410_v6 = vpop.permute.xlu0 %409  ;;  %v412_v7 = vpop.permute.xlu1 %411 }
  0xb9   : > { %492 = vst.msk [vmem:[#allocation3 + $0xd0] sm:$0xff] %vm465_vm2, %v410_v6  ;;  %493 = vst.msk [vmem:[#allocation3 + $0xd8] sm:$0xff] %vm465_vm2, %v412_v7  ;;  %v958_v6 = vld [vmem:[%s5501_s20 + $0xab] sm:$0xff] }
  0xba   : > { %817 = vrot.lane.b32.xlu0 %v5712_v22, %s5452_s23  ;;  %819 = vrot.lane.b32.xlu1 %v5715_v23, %s5452_s23 }
  0xbc   : > { %v414_v8 = vpop.permute.xlu0 %413  ;;  %v416_v9 = vpop.permute.xlu1 %415 }
  0xbd   : > { %494 = vst.msk [vmem:[#allocation3 + $0xe0] sm:$0xff] %vm465_vm2, %v414_v8  ;;  %495 = vst.msk [vmem:[#allocation3 + $0xe8] sm:$0xff] %vm465_vm2, %v416_v9  ;;  %v959_v9 = vld [vmem:[%s5501_s20 + $0xb3] sm:$0xff] }
  0xbe   : > { %821 = vrot.lane.b32.xlu0 %v5722_v24, %s5452_s23  ;;  %823 = vrot.lane.b32.xlu1 %v5725_v25, %s5452_s23 }
  0xc0   : > { %v418_v10 = vpop.permute.xlu0 %417  ;;  %v420_v11 = vpop.permute.xlu1 %419 }
  0xc1   : > { %496 = vst.msk [vmem:[#allocation3 + $0xf0] sm:$0xff] %vm465_vm2, %v418_v10  ;;  %497 = vst.msk [vmem:[#allocation3 + $0xf8] sm:$0xff] %vm465_vm2, %v420_v11  ;;  %v960_v10 = vld [vmem:[%s5501_s20 + $0xbb] sm:$0xff] }
  0xc2   : > { %825 = vrot.lane.b32.xlu0 %v5732_v26, %s5452_s23  ;;  %827 = vrot.lane.b32.xlu1 %v5735_v27, %s5452_s23  ;;  %v754_v26 = vld [vmem:[%s5501_s20 + $0x11a] sm:$0xff] }
  0xc4   : > { %v422_v12 = vpop.permute.xlu0 %421  ;;  %v424_v13 = vpop.permute.xlu1 %423 }
  0xc5   : > { %498 = vst.msk [vmem:[#allocation3 + $0x100] sm:$0xff] %vm465_vm2, %v422_v12  ;;  %499 = vst.msk [vmem:[#allocation3 + $0x108] sm:$0xff] %vm465_vm2, %v424_v13  ;;  %v961_v13 = vld [vmem:[%s5501_s20 + $0xc3] sm:$0xff] }
  0xc6   : > { %829 = vrot.lane.b32.xlu0 %v5742_v28, %s5452_s23  ;;  %831 = vrot.lane.b32.xlu1 %v5745_v29, %s5452_s23  ;;  %v755_v29 = vld [vmem:[%s5501_s20 + $0x122] sm:$0xff] }
  0xc8   : > { %v426_v14 = vpop.permute.xlu0 %425  ;;  %v428_v15 = vpop.permute.xlu1 %427 }
  0xc9   : > { %500 = vst.msk [vmem:[#allocation3 + $0x110] sm:$0xff] %vm465_vm2, %v426_v14  ;;  %v962_v14 = vld [vmem:[%s5501_s20 + $0xcb] sm:$0xff] }
  0xca   : > { %502 = vst.msk [vmem:[#allocation3 + $0x118] sm:$0x3f] %vm501_vm3, %v428_v15  ;;  %833 = vrot.lane.b32.xlu0 %v5752_v30, %s5452_s23  ;;  %835 = vrot.lane.b32.xlu1 %v5755_v31, %s5452_s23  ;;  %v756_v30 = vld [vmem:[%s5501_s20 + $0x12a] sm:$0x3f] }
  0xcc   : > { %v576_v16 = vpop.permute.xlu0 %575  ;;  %v578_v17 = vpop.permute.xlu1 %577 }
  0xcd   : > { %684 = vst.msk [vmem:[#allocation3] sm:$0xff] %vm683_vm4, %v576_v16  ;;  %685 = vst.msk [vmem:[#allocation3 + $0x8] sm:$0xff] %vm683_vm4, %v578_v17  ;;  %v963_v17 = vld [vmem:[%s5501_s20 + $0xd3] sm:$0xff] }
  0xce   : > { %837 = vrot.lane.b32.xlu0 %v5764_v34, %s5452_s23  ;;  %839 = vrot.lane.b32.xlu1 %v5767_v35, %s5452_s23  ;;  %v940_v34 = vld [vmem:[%s5501_s20 + $0x1b] sm:$0xff] }
  0xd0   : > { %v580_v18 = vpop.permute.xlu0 %579  ;;  %v582_v19 = vpop.permute.xlu1 %581 }
  0xd1   : > { %686 = vst.msk [vmem:[#allocation3 + $0x10] sm:$0xff] %vm683_vm4, %v580_v18  ;;  %687 = vst.msk [vmem:[#allocation3 + $0x18] sm:$0xff] %vm683_vm4, %v582_v19  ;;  %v964_v18 = vld [vmem:[%s5501_s20 + $0xdb] sm:$0xff] }
  0xd2   : > { %841 = vrot.lane.b32.xlu0 %v5776_v38, %s5452_s23  ;;  %843 = vrot.lane.b32.xlu1 %v5779_v39, %s5452_s23  ;;  %v942_v38 = vld [vmem:[%s5501_s20 + $0x2b] sm:$0xff] }
  0xd4   : > { %v584_v20 = vpop.permute.xlu0 %583  ;;  %v586_v21 = vpop.permute.xlu1 %585 }
  0xd5   : > { %688 = vst.msk [vmem:[#allocation3 + $0x20] sm:$0xff] %vm683_vm4, %v584_v20  ;;  %689 = vst.msk [vmem:[#allocation3 + $0x28] sm:$0xff] %vm683_vm4, %v586_v21  ;;  %v965_v21 = vld [vmem:[%s5501_s20 + $0xe3] sm:$0xff] }
  0xd6   : > { %845 = vrot.lane.b32.xlu0 %v5788_v42, %s5452_s23  ;;  %847 = vrot.lane.b32.xlu1 %v5791_v43, %s5452_s23  ;;  %v944_v42 = vld [vmem:[%s5501_s20 + $0x3b] sm:$0xff] }
  0xd8   : > { %v588_v22 = vpop.permute.xlu0 %587  ;;  %v590_v23 = vpop.permute.xlu1 %589 }
  0xd9   : > { %690 = vst.msk [vmem:[#allocation3 + $0x30] sm:$0xff] %vm683_vm4, %v588_v22  ;;  %691 = vst.msk [vmem:[#allocation3 + $0x38] sm:$0xff] %vm683_vm4, %v590_v23  ;;  %v966_v22 = vld [vmem:[%s5501_s20 + $0xeb] sm:$0xff] }
  0xda   : > { %849 = vrot.lane.b32.xlu0 %v5800_v46, %s5452_s23  ;;  %851 = vrot.lane.b32.xlu1 %v5803_v47, %s5452_s23  ;;  %v946_v46 = vld [vmem:[%s5501_s20 + $0x4b] sm:$0xff] }
  0xdc   : > { %v592_v24 = vpop.permute.xlu0 %591  ;;  %v594_v25 = vpop.permute.xlu1 %593 }
  0xdd   : > { %692 = vst.msk [vmem:[#allocation3 + $0x40] sm:$0xff] %vm683_vm4, %v592_v24  ;;  %693 = vst.msk [vmem:[#allocation3 + $0x48] sm:$0xff] %vm683_vm4, %v594_v25  ;;  %v967_v25 = vld [vmem:[%s5501_s20 + $0xf3] sm:$0xff] }
  0xde   : > { %853 = vrot.lane.b32.xlu0 %v5812_v50, %s5452_s23  ;;  %855 = vrot.lane.b32.xlu1 %v5815_v51, %s5452_s23  ;;  %v948_v50 = vld [vmem:[%s5501_s20 + $0x5b] sm:$0xff] }
  0xe0   : > { %v596_v27 = vpop.permute.xlu0 %595  ;;  %v598_v28 = vpop.permute.xlu1 %597 }
  0xe1   : > { %694 = vst.msk [vmem:[#allocation3 + $0x50] sm:$0xff] %vm683_vm4, %v596_v27  ;;  %695 = vst.msk [vmem:[#allocation3 + $0x58] sm:$0xff] %vm683_vm4, %v598_v28 }
  0xe2   : > { %857 = vrot.lane.b32.xlu0 %v5824_v54, %s5452_s23  ;;  %859 = vrot.lane.b32.xlu1 %v754_v26, %s5452_s23  ;;  %v950_v54 = vld [vmem:[%s5501_s20 + $0x6b] sm:$0xff]  ;;  %v968_v26 = vld [vmem:[%s5501_s20 + $0xfb] sm:$0xff] }
  0xe4   : > { %v600_v31 = vpop.permute.xlu0 %599  ;;  %v602_v32 = vpop.permute.xlu1 %601 }
  0xe5   : > { %696 = vst.msk [vmem:[#allocation3 + $0x60] sm:$0xff] %vm683_vm4, %v600_v31  ;;  %697 = vst.msk [vmem:[#allocation3 + $0x68] sm:$0xff] %vm683_vm4, %v602_v32 }
  0xe6   : > { %861 = vrot.lane.b32.xlu0 %v755_v29, %s5452_s23  ;;  %863 = vrot.lane.b32.xlu1 %v756_v30, %s5452_s23  ;;  %v969_v29 = vld [vmem:[%s5501_s20 + $0x103] sm:$0xff]  ;;  %v970_v30 = vld [vmem:[%s5501_s20 + $0x10b] sm:$0xff] }
  0xe8   : > { %v604_v35 = vpop.permute.xlu0 %603  ;;  %v606_v36 = vpop.permute.xlu1 %605 }
  0xe9   : > { %698 = vst.msk [vmem:[#allocation3 + $0x70] sm:$0xff] %vm683_vm4, %v604_v35  ;;  %699 = vst.msk [vmem:[#allocation3 + $0x78] sm:$0xff] %vm683_vm4, %v606_v36 }
  0xea   : > { %1011 = vrot.lane.b32.xlu0 %v939_v33, %s5453_s24  ;;  %1013 = vrot.lane.b32.xlu1 %v940_v34, %s5453_s24  ;;  %v971_v33 = vld [vmem:[%s5501_s20 + $0x113] sm:$0xff]  ;;  %v972_v34 = vld [vmem:[%s5501_s20 + $0x11b] sm:$0xff] }
  0xec   : > { %v608_v39 = vpop.permute.xlu0 %607  ;;  %v610_v40 = vpop.permute.xlu1 %609 }
  0xed   : > { %700 = vst.msk [vmem:[#allocation3 + $0x80] sm:$0xff] %vm683_vm4, %v608_v39  ;;  %701 = vst.msk [vmem:[#allocation3 + $0x88] sm:$0xff] %vm683_vm4, %v610_v40 }
  0xee   : > { %1015 = vrot.lane.b32.xlu0 %v941_v37, %s5453_s24  ;;  %1017 = vrot.lane.b32.xlu1 %v942_v38, %s5453_s24  ;;  %v973_v37 = vld [vmem:[%s5501_s20 + $0x123] sm:$0xff]  ;;  %v974_v38 = vld [vmem:[%s5501_s20 + $0x12b] sm:$0x3f] }
  0xf0   : > { %v612_v43 = vpop.permute.xlu0 %611  ;;  %v614_v44 = vpop.permute.xlu1 %613 }
  0xf1   : > { %702 = vst.msk [vmem:[#allocation3 + $0x90] sm:$0xff] %vm683_vm4, %v612_v43  ;;  %703 = vst.msk [vmem:[#allocation3 + $0x98] sm:$0xff] %vm683_vm4, %v614_v44 }
  0xf2   : > { %1019 = vrot.lane.b32.xlu0 %v943_v41, %s5453_s24  ;;  %1021 = vrot.lane.b32.xlu1 %v944_v42, %s5453_s24  ;;  %v1157_v41 = vld [vmem:[%s5501_s20 + $0x14] sm:$0xff]  ;;  %v1158_v42 = vld [vmem:[%s5501_s20 + $0x1c] sm:$0xff] }
  0xf4   : > { %v616_v47 = vpop.permute.xlu0 %615  ;;  %v618_v48 = vpop.permute.xlu1 %617 }
  0xf5   : > { %704 = vst.msk [vmem:[#allocation3 + $0xa0] sm:$0xff] %vm683_vm4, %v616_v47  ;;  %705 = vst.msk [vmem:[#allocation3 + $0xa8] sm:$0xff] %vm683_vm4, %v618_v48 }
  0xf6   : > { %1023 = vrot.lane.b32.xlu0 %v945_v45, %s5453_s24  ;;  %1025 = vrot.lane.b32.xlu1 %v946_v46, %s5453_s24  ;;  %v6055_v45 = vld [vmem:[%s5501_s20 + $0x24] sm:$0xff]  ;;  %v6058_v46 = vld [vmem:[%s5501_s20 + $0x2c] sm:$0xff] }
  0xf8   : > { %v620_v51 = vpop.permute.xlu0 %619  ;;  %v622_v52 = vpop.permute.xlu1 %621 }
  0xf9   : > { %706 = vst.msk [vmem:[#allocation3 + $0xb0] sm:$0xff] %vm683_vm4, %v620_v51  ;;  %707 = vst.msk [vmem:[#allocation3 + $0xb8] sm:$0xff] %vm683_vm4, %v622_v52 }
  0xfa   : > { %1027 = vrot.lane.b32.xlu0 %v947_v49, %s5453_s24  ;;  %1029 = vrot.lane.b32.xlu1 %v948_v50, %s5453_s24  ;;  %v6067_v49 = vld [vmem:[%s5501_s20 + $0x34] sm:$0xff]  ;;  %v6070_v50 = vld [vmem:[%s5501_s20 + $0x3c] sm:$0xff] }
  0xfc   : > { %v624_v55 = vpop.permute.xlu0 %623  ;;  %v626_v56 = vpop.permute.xlu1 %625 }
  0xfd   : > { %708 = vst.msk [vmem:[#allocation3 + $0xc0] sm:$0xff] %vm683_vm4, %v624_v55  ;;  %709 = vst.msk [vmem:[#allocation3 + $0xc8] sm:$0xff] %vm683_vm4, %v626_v56 }
  0xfe   : > { %1031 = vrot.lane.b32.xlu0 %v949_v53, %s5453_s24  ;;  %1033 = vrot.lane.b32.xlu1 %v950_v54, %s5453_s24  ;;  %v6079_v53 = vld [vmem:[%s5501_s20 + $0x44] sm:$0xff]  ;;  %v6082_v54 = vld [vmem:[%s5501_s20 + $0x4c] sm:$0xff] }
 0x100   : > { %v628_v59 = vpop.permute.xlu0 %627  ;;  %v630_v60 = vpop.permute.xlu1 %629 }
 0x101   : > { %710 = vst.msk [vmem:[#allocation3 + $0xd0] sm:$0xff] %vm683_vm4, %v628_v59  ;;  %711 = vst.msk [vmem:[#allocation3 + $0xd8] sm:$0xff] %vm683_vm4, %v630_v60 }
 0x102   : > { %1035 = vrot.lane.b32.xlu0 %v951_v57, %s5453_s24  ;;  %1037 = vrot.lane.b32.xlu1 %v952_v58, %s5453_s24  ;;  %v6091_v57 = vld [vmem:[%s5501_s20 + $0x54] sm:$0xff]  ;;  %v6094_v58 = vld [vmem:[%s5501_s20 + $0x5c] sm:$0xff] }
 0x104   : > { %v632_v63 = vpop.permute.xlu0 %631  ;;  %v634_v0 = vpop.permute.xlu1 %633 }
 0x105   : > { %712 = vst.msk [vmem:[#allocation3 + $0xe0] sm:$0xff] %vm683_vm4, %v632_v63  ;;  %713 = vst.msk [vmem:[#allocation3 + $0xe8] sm:$0xff] %vm683_vm4, %v634_v0 }
 0x106   : > { %1039 = vrot.lane.b32.xlu0 %v953_v61, %s5453_s24  ;;  %1041 = vrot.lane.b32.xlu1 %v954_v62, %s5453_s24  ;;  %v6103_v61 = vld [vmem:[%s5501_s20 + $0x64] sm:$0xff]  ;;  %v6106_v62 = vld [vmem:[%s5501_s20 + $0x6c] sm:$0xff] }
 0x108   : > { %v636_v3 = vpop.permute.xlu0 %635  ;;  %v638_v4 = vpop.permute.xlu1 %637 }
 0x109   : > { %714 = vst.msk [vmem:[#allocation3 + $0xf0] sm:$0xff] %vm683_vm4, %v636_v3  ;;  %715 = vst.msk [vmem:[#allocation3 + $0xf8] sm:$0xff] %vm683_vm4, %v638_v4 }
 0x10a   : > { %1043 = vrot.lane.b32.xlu0 %v955_v1, %s5453_s24  ;;  %1045 = vrot.lane.b32.xlu1 %v956_v2, %s5453_s24  ;;  %v6115_v1 = vld [vmem:[%s5501_s20 + $0x74] sm:$0xff]  ;;  %v6118_v2 = vld [vmem:[%s5501_s20 + $0x7c] sm:$0xff] }
 0x10c   : > { %v640_v7 = vpop.permute.xlu0 %639  ;;  %v642_v8 = vpop.permute.xlu1 %641 }
 0x10d   : > { %716 = vst.msk [vmem:[#allocation3 + $0x100] sm:$0xff] %vm683_vm4, %v640_v7  ;;  %717 = vst.msk [vmem:[#allocation3 + $0x108] sm:$0xff] %vm683_vm4, %v642_v8 }
 0x10e   : > { %1047 = vrot.lane.b32.xlu0 %v957_v5, %s5453_s24  ;;  %1049 = vrot.lane.b32.xlu1 %v958_v6, %s5453_s24  ;;  %v6127_v5 = vld [vmem:[%s5501_s20 + $0x84] sm:$0xff]  ;;  %v6130_v6 = vld [vmem:[%s5501_s20 + $0x8c] sm:$0xff] }
 0x110   : > { %v644_v11 = vpop.permute.xlu0 %643  ;;  %v646_v12 = vpop.permute.xlu1 %645 }
 0x111   : > { %718 = vst.msk [vmem:[#allocation3 + $0x110] sm:$0xff] %vm683_vm4, %v644_v11 }
 0x112   : > { %720 = vst.msk [vmem:[#allocation3 + $0x118] sm:$0x3f] %vm719_vm5, %v646_v12  ;;  %1051 = vrot.lane.b32.xlu0 %v959_v9, %s5453_s24  ;;  %1053 = vrot.lane.b32.xlu1 %v960_v10, %s5453_s24  ;;  %v6139_v9 = vld [vmem:[%s5501_s20 + $0x94] sm:$0xff]  ;;  %v6142_v10 = vld [vmem:[%s5501_s20 + $0x9c] sm:$0xff] }
 0x114   : > { %v794_v15 = vpop.permute.xlu0 %793  ;;  %v796_v16 = vpop.permute.xlu1 %795 }
 0x115   : > { %902 = vst.msk [vmem:[#allocation3] sm:$0xff] %vm901_vm6, %v794_v15  ;;  %903 = vst.msk [vmem:[#allocation3 + $0x8] sm:$0xff] %vm901_vm6, %v796_v16 }
 0x116   : > { %1055 = vrot.lane.b32.xlu0 %v961_v13, %s5453_s24  ;;  %1057 = vrot.lane.b32.xlu1 %v962_v14, %s5453_s24  ;;  %v6151_v13 = vld [vmem:[%s5501_s20 + $0xa4] sm:$0xff]  ;;  %v6154_v14 = vld [vmem:[%s5501_s20 + $0xac] sm:$0xff] }
 0x118   : > { %v798_v19 = vpop.permute.xlu0 %797  ;;  %v800_v20 = vpop.permute.xlu1 %799 }
 0x119   : > { %904 = vst.msk [vmem:[#allocation3 + $0x10] sm:$0xff] %vm901_vm6, %v798_v19  ;;  %905 = vst.msk [vmem:[#allocation3 + $0x18] sm:$0xff] %vm901_vm6, %v800_v20 }
 0x11a   : > { %1059 = vrot.lane.b32.xlu0 %v963_v17, %s5453_s24  ;;  %1061 = vrot.lane.b32.xlu1 %v964_v18, %s5453_s24  ;;  %v6163_v17 = vld [vmem:[%s5501_s20 + $0xb4] sm:$0xff]  ;;  %v6166_v18 = vld [vmem:[%s5501_s20 + $0xbc] sm:$0xff] }
 0x11c   : > { %v802_v23 = vpop.permute.xlu0 %801  ;;  %v804_v24 = vpop.permute.xlu1 %803 }
 0x11d   : > { %906 = vst.msk [vmem:[#allocation3 + $0x20] sm:$0xff] %vm901_vm6, %v802_v23  ;;  %907 = vst.msk [vmem:[#allocation3 + $0x28] sm:$0xff] %vm901_vm6, %v804_v24 }
 0x11e   : > { %1063 = vrot.lane.b32.xlu0 %v965_v21, %s5453_s24  ;;  %1065 = vrot.lane.b32.xlu1 %v966_v22, %s5453_s24  ;;  %v6175_v21 = vld [vmem:[%s5501_s20 + $0xc4] sm:$0xff]  ;;  %v6178_v22 = vld [vmem:[%s5501_s20 + $0xcc] sm:$0xff] }
 0x120   : > { %v806_v27 = vpop.permute.xlu0 %805  ;;  %v808_v28 = vpop.permute.xlu1 %807 }
 0x121   : > { %908 = vst.msk [vmem:[#allocation3 + $0x30] sm:$0xff] %vm901_vm6, %v806_v27  ;;  %909 = vst.msk [vmem:[#allocation3 + $0x38] sm:$0xff] %vm901_vm6, %v808_v28 }
 0x122   : > { %1067 = vrot.lane.b32.xlu0 %v967_v25, %s5453_s24  ;;  %1069 = vrot.lane.b32.xlu1 %v968_v26, %s5453_s24  ;;  %v6187_v25 = vld [vmem:[%s5501_s20 + $0xd4] sm:$0xff]  ;;  %v6190_v26 = vld [vmem:[%s5501_s20 + $0xdc] sm:$0xff] }
 0x124   : > { %v810_v31 = vpop.permute.xlu0 %809  ;;  %v812_v32 = vpop.permute.xlu1 %811 }
 0x125   : > { %910 = vst.msk [vmem:[#allocation3 + $0x40] sm:$0xff] %vm901_vm6, %v810_v31  ;;  %911 = vst.msk [vmem:[#allocation3 + $0x48] sm:$0xff] %vm901_vm6, %v812_v32 }
 0x126   : > { %1071 = vrot.lane.b32.xlu0 %v969_v29, %s5453_s24  ;;  %1073 = vrot.lane.b32.xlu1 %v970_v30, %s5453_s24  ;;  %v6199_v29 = vld [vmem:[%s5501_s20 + $0xe4] sm:$0xff]  ;;  %v6202_v30 = vld [vmem:[%s5501_s20 + $0xec] sm:$0xff] }
 0x128   : > { %v814_v35 = vpop.permute.xlu0 %813  ;;  %v816_v36 = vpop.permute.xlu1 %815 }
 0x129   : > { %912 = vst.msk [vmem:[#allocation3 + $0x50] sm:$0xff] %vm901_vm6, %v814_v35  ;;  %913 = vst.msk [vmem:[#allocation3 + $0x58] sm:$0xff] %vm901_vm6, %v816_v36 }
 0x12a   : > { %1075 = vrot.lane.b32.xlu0 %v971_v33, %s5453_s24  ;;  %1077 = vrot.lane.b32.xlu1 %v972_v34, %s5453_s24  ;;  %v6211_v33 = vld [vmem:[%s5501_s20 + $0xf4] sm:$0xff]  ;;  %v6214_v34 = vld [vmem:[%s5501_s20 + $0xfc] sm:$0xff] }
 0x12c   : > { %v818_v39 = vpop.permute.xlu0 %817  ;;  %v820_v40 = vpop.permute.xlu1 %819 }
 0x12d   : > { %914 = vst.msk [vmem:[#allocation3 + $0x60] sm:$0xff] %vm901_vm6, %v818_v39  ;;  %915 = vst.msk [vmem:[#allocation3 + $0x68] sm:$0xff] %vm901_vm6, %v820_v40 }
 0x12e   : > { %1079 = vrot.lane.b32.xlu0 %v973_v37, %s5453_s24  ;;  %1081 = vrot.lane.b32.xlu1 %v974_v38, %s5453_s24  ;;  %v6223_v37 = vld [vmem:[%s5501_s20 + $0x104] sm:$0xff]  ;;  %v6226_v38 = vld [vmem:[%s5501_s20 + $0x10c] sm:$0xff] }
 0x130   : > { %v822_v43 = vpop.permute.xlu0 %821  ;;  %v824_v44 = vpop.permute.xlu1 %823 }
 0x131   : > { %916 = vst.msk [vmem:[#allocation3 + $0x70] sm:$0xff] %vm901_vm6, %v822_v43  ;;  %917 = vst.msk [vmem:[#allocation3 + $0x78] sm:$0xff] %vm901_vm6, %v824_v44 }
 0x132   : > { %1229 = vrot.lane.b32.xlu0 %v1157_v41, %s5454_s25  ;;  %1231 = vrot.lane.b32.xlu1 %v1158_v42, %s5454_s25  ;;  %v6235_v41 = vld [vmem:[%s5501_s20 + $0x114] sm:$0xff]  ;;  %v6238_v42 = vld [vmem:[%s5501_s20 + $0x11c] sm:$0xff] }
 0x134   : > { %v826_v47 = vpop.permute.xlu0 %825  ;;  %v828_v48 = vpop.permute.xlu1 %827 }
 0x135   : > { %918 = vst.msk [vmem:[#allocation3 + $0x80] sm:$0xff] %vm901_vm6, %v826_v47  ;;  %919 = vst.msk [vmem:[#allocation3 + $0x88] sm:$0xff] %vm901_vm6, %v828_v48  ;;  %v6247_v47 = vld [vmem:[%s5501_s20 + $0x124] sm:$0xff]  ;;  %v1192_v48 = vld [vmem:[%s5501_s20 + $0x12c] sm:$0x3f] }
 0x136   : > { %1233 = vrot.lane.b32.xlu0 %v6055_v45, %s5454_s25  ;;  %1235 = vrot.lane.b32.xlu1 %v6058_v46, %s5454_s25 }
 0x138   : > { %v830_v51 = vpop.permute.xlu0 %829  ;;  %v832_v52 = vpop.permute.xlu1 %831 }
 0x139   : > { %920 = vst.msk [vmem:[#allocation3 + $0x90] sm:$0xff] %vm901_vm6, %v830_v51  ;;  %921 = vst.msk [vmem:[#allocation3 + $0x98] sm:$0xff] %vm901_vm6, %v832_v52 }
 0x13a   : > { %1237 = vrot.lane.b32.xlu0 %v6067_v49, %s5454_s25  ;;  %1239 = vrot.lane.b32.xlu1 %v6070_v50, %s5454_s25 }
 0x13c   : > { %v834_v55 = vpop.permute.xlu0 %833  ;;  %v836_v56 = vpop.permute.xlu1 %835 }
 0x13d   : > { %922 = vst.msk [vmem:[#allocation3 + $0xa0] sm:$0xff] %vm901_vm6, %v834_v55  ;;  %923 = vst.msk [vmem:[#allocation3 + $0xa8] sm:$0xff] %vm901_vm6, %v836_v56 }
 0x13e   : > { %1241 = vrot.lane.b32.xlu0 %v6079_v53, %s5454_s25  ;;  %1243 = vrot.lane.b32.xlu1 %v6082_v54, %s5454_s25 }
 0x140   : > { %v838_v59 = vpop.permute.xlu0 %837  ;;  %v840_v60 = vpop.permute.xlu1 %839 }
 0x141   : > { %924 = vst.msk [vmem:[#allocation3 + $0xb0] sm:$0xff] %vm901_vm6, %v838_v59  ;;  %925 = vst.msk [vmem:[#allocation3 + $0xb8] sm:$0xff] %vm901_vm6, %v840_v60 }
 0x142   : > { %1245 = vrot.lane.b32.xlu0 %v6091_v57, %s5454_s25  ;;  %1247 = vrot.lane.b32.xlu1 %v6094_v58, %s5454_s25 }
 0x144   : > { %v842_v63 = vpop.permute.xlu0 %841  ;;  %v844_v0 = vpop.permute.xlu1 %843 }
 0x145   : > { %926 = vst.msk [vmem:[#allocation3 + $0xc0] sm:$0xff] %vm901_vm6, %v842_v63  ;;  %927 = vst.msk [vmem:[#allocation3 + $0xc8] sm:$0xff] %vm901_vm6, %v844_v0 }
 0x146   : > { %1249 = vrot.lane.b32.xlu0 %v6103_v61, %s5454_s25  ;;  %1251 = vrot.lane.b32.xlu1 %v6106_v62, %s5454_s25 }
 0x148   : > { %v846_v3 = vpop.permute.xlu0 %845  ;;  %v848_v4 = vpop.permute.xlu1 %847 }
 0x149   : > { %928 = vst.msk [vmem:[#allocation3 + $0xd0] sm:$0xff] %vm901_vm6, %v846_v3  ;;  %929 = vst.msk [vmem:[#allocation3 + $0xd8] sm:$0xff] %vm901_vm6, %v848_v4 }
 0x14a   : > { %1253 = vrot.lane.b32.xlu0 %v6115_v1, %s5454_s25  ;;  %1255 = vrot.lane.b32.xlu1 %v6118_v2, %s5454_s25 }
 0x14c   : > { %v850_v7 = vpop.permute.xlu0 %849  ;;  %v852_v8 = vpop.permute.xlu1 %851 }
 0x14d   : > { %930 = vst.msk [vmem:[#allocation3 + $0xe0] sm:$0xff] %vm901_vm6, %v850_v7  ;;  %931 = vst.msk [vmem:[#allocation3 + $0xe8] sm:$0xff] %vm901_vm6, %v852_v8 }
 0x14e   : > { %1257 = vrot.lane.b32.xlu0 %v6127_v5, %s5454_s25  ;;  %1259 = vrot.lane.b32.xlu1 %v6130_v6, %s5454_s25 }
 0x150   : > { %v854_v11 = vpop.permute.xlu0 %853  ;;  %v856_v12 = vpop.permute.xlu1 %855 }
 0x151   : > { %932 = vst.msk [vmem:[#allocation3 + $0xf0] sm:$0xff] %vm901_vm6, %v854_v11  ;;  %933 = vst.msk [vmem:[#allocation3 + $0xf8] sm:$0xff] %vm901_vm6, %v856_v12 }
 0x152   : > { %1261 = vrot.lane.b32.xlu0 %v6139_v9, %s5454_s25  ;;  %1263 = vrot.lane.b32.xlu1 %v6142_v10, %s5454_s25 }
 0x154   : > { %v858_v15 = vpop.permute.xlu0 %857  ;;  %v860_v16 = vpop.permute.xlu1 %859 }
 0x155   : > { %934 = vst.msk [vmem:[#allocation3 + $0x100] sm:$0xff] %vm901_vm6, %v858_v15  ;;  %935 = vst.msk [vmem:[#allocation3 + $0x108] sm:$0xff] %vm901_vm6, %v860_v16 }
 0x156   : > { %1265 = vrot.lane.b32.xlu0 %v6151_v13, %s5454_s25  ;;  %1267 = vrot.lane.b32.xlu1 %v6154_v14, %s5454_s25 }
 0x158   : > { %v862_v19 = vpop.permute.xlu0 %861  ;;  %v864_v20 = vpop.permute.xlu1 %863 }
 0x159   : > { %936 = vst.msk [vmem:[#allocation3 + $0x110] sm:$0xff] %vm901_vm6, %v862_v19 }
 0x15a   : > { %938 = vst.msk [vmem:[#allocation3 + $0x118] sm:$0x3f] %vm937_vm7, %v864_v20  ;;  %1269 = vrot.lane.b32.xlu0 %v6163_v17, %s5454_s25  ;;  %1271 = vrot.lane.b32.xlu1 %v6166_v18, %s5454_s25  ;;  %v1409_v20 = vld [vmem:[%s5501_s20 + $0x134] sm:$0xff] }
 0x15c   : > { %v1012_v23 = vpop.permute.xlu0 %1011  ;;  %v1014_v24 = vpop.permute.xlu1 %1013 }
 0x15d   : > { %1120 = vst.msk [vmem:[#allocation3] sm:$0xff] %vm1119_vm8, %v1012_v23  ;;  %1121 = vst.msk [vmem:[#allocation3 + $0x8] sm:$0xff] %vm1119_vm8, %v1014_v24  ;;  %v1593_v24 = vld [vmem:[%s5501_s20 + $0x25] sm:$0xff] }
 0x15e   : > { %1273 = vrot.lane.b32.xlu0 %v6175_v21, %s5454_s25  ;;  %1275 = vrot.lane.b32.xlu1 %v6178_v22, %s5454_s25 }
 0x160   : > { %v1016_v27 = vpop.permute.xlu0 %1015  ;;  %v1018_v28 = vpop.permute.xlu1 %1017 }
 0x161   : > { %1122 = vst.msk [vmem:[#allocation3 + $0x10] sm:$0xff] %vm1119_vm8, %v1016_v27  ;;  %1123 = vst.msk [vmem:[#allocation3 + $0x18] sm:$0xff] %vm1119_vm8, %v1018_v28  ;;  %v1595_v28 = vld [vmem:[%s5501_s20 + $0x35] sm:$0xff] }
 0x162   : > { %1277 = vrot.lane.b32.xlu0 %v6187_v25, %s5454_s25  ;;  %1279 = vrot.lane.b32.xlu1 %v6190_v26, %s5454_s25 }
 0x164   : > { %v1020_v31 = vpop.permute.xlu0 %1019  ;;  %v1022_v32 = vpop.permute.xlu1 %1021 }
 0x165   : > { %1124 = vst.msk [vmem:[#allocation3 + $0x20] sm:$0xff] %vm1119_vm8, %v1020_v31  ;;  %1125 = vst.msk [vmem:[#allocation3 + $0x28] sm:$0xff] %vm1119_vm8, %v1022_v32  ;;  %v1597_v32 = vld [vmem:[%s5501_s20 + $0x45] sm:$0xff] }
 0x166   : > { %1281 = vrot.lane.b32.xlu0 %v6199_v29, %s5454_s25  ;;  %1283 = vrot.lane.b32.xlu1 %v6202_v30, %s5454_s25 }
 0x168   : > { %v1024_v35 = vpop.permute.xlu0 %1023  ;;  %v1026_v36 = vpop.permute.xlu1 %1025 }
 0x169   : > { %1126 = vst.msk [vmem:[#allocation3 + $0x30] sm:$0xff] %vm1119_vm8, %v1024_v35  ;;  %1127 = vst.msk [vmem:[#allocation3 + $0x38] sm:$0xff] %vm1119_vm8, %v1026_v36  ;;  %v1599_v36 = vld [vmem:[%s5501_s20 + $0x55] sm:$0xff] }
 0x16a   : > { %1285 = vrot.lane.b32.xlu0 %v6211_v33, %s5454_s25  ;;  %1287 = vrot.lane.b32.xlu1 %v6214_v34, %s5454_s25 }
 0x16c   : > { %v1028_v39 = vpop.permute.xlu0 %1027  ;;  %v1030_v40 = vpop.permute.xlu1 %1029 }
 0x16d   : > { %1128 = vst.msk [vmem:[#allocation3 + $0x40] sm:$0xff] %vm1119_vm8, %v1028_v39  ;;  %1129 = vst.msk [vmem:[#allocation3 + $0x48] sm:$0xff] %vm1119_vm8, %v1030_v40  ;;  %v1601_v40 = vld [vmem:[%s5501_s20 + $0x65] sm:$0xff] }
 0x16e   : > { %1289 = vrot.lane.b32.xlu0 %v6223_v37, %s5454_s25  ;;  %1291 = vrot.lane.b32.xlu1 %v6226_v38, %s5454_s25 }
 0x170   : > { %v1032_v43 = vpop.permute.xlu0 %1031  ;;  %v1034_v44 = vpop.permute.xlu1 %1033 }
 0x171   : > { %1130 = vst.msk [vmem:[#allocation3 + $0x50] sm:$0xff] %vm1119_vm8, %v1032_v43  ;;  %1131 = vst.msk [vmem:[#allocation3 + $0x58] sm:$0xff] %vm1119_vm8, %v1034_v44  ;;  %v1603_v44 = vld [vmem:[%s5501_s20 + $0x75] sm:$0xff] }
 0x172   : > { %1293 = vrot.lane.b32.xlu0 %v6235_v41, %s5454_s25  ;;  %1295 = vrot.lane.b32.xlu1 %v6238_v42, %s5454_s25 }
 0x174   : > { %v1036_v51 = vpop.permute.xlu0 %1035  ;;  %v1038_v52 = vpop.permute.xlu1 %1037 }
 0x175   : > { %1132 = vst.msk [vmem:[#allocation3 + $0x60] sm:$0xff] %vm1119_vm8, %v1036_v51  ;;  %1133 = vst.msk [vmem:[#allocation3 + $0x68] sm:$0xff] %vm1119_vm8, %v1038_v52  ;;  %v1605_v52 = vld [vmem:[%s5501_s20 + $0x85] sm:$0xff] }
 0x176   : > { %1297 = vrot.lane.b32.xlu0 %v6247_v47, %s5454_s25  ;;  %1299 = vrot.lane.b32.xlu1 %v1192_v48, %s5454_s25 }
 0x178   : > { %v1040_v55 = vpop.permute.xlu0 %1039  ;;  %v1042_v56 = vpop.permute.xlu1 %1041 }
 0x179   : > { %1134 = vst.msk [vmem:[#allocation3 + $0x70] sm:$0xff] %vm1119_vm8, %v1040_v55  ;;  %1135 = vst.msk [vmem:[#allocation3 + $0x78] sm:$0xff] %vm1119_vm8, %v1042_v56  ;;  %v1606_v55 = vld [vmem:[%s5501_s20 + $0x8d] sm:$0xff] }
 0x17a   : > { %1447 = vrot.lane.b32.xlu0 %v6055_v45, %s5455_s26  ;;  %1449 = vrot.lane.b32.xlu1 %v6058_v46, %s5455_s26 }
 0x17c   : > { %v1044_v59 = vpop.permute.xlu0 %1043  ;;  %v1046_v60 = vpop.permute.xlu1 %1045 }
 0x17d   : > { %1136 = vst.msk [vmem:[#allocation3 + $0x80] sm:$0xff] %vm1119_vm8, %v1044_v59  ;;  %1137 = vst.msk [vmem:[#allocation3 + $0x88] sm:$0xff] %vm1119_vm8, %v1046_v60  ;;  %v1607_v60 = vld [vmem:[%s5501_s20 + $0x95] sm:$0xff] }
 0x17e   : > { %1451 = vrot.lane.b32.xlu0 %v6067_v49, %s5455_s26  ;;  %1453 = vrot.lane.b32.xlu1 %v6070_v50, %s5455_s26 }
 0x180   : > { %v1048_v63 = vpop.permute.xlu0 %1047  ;;  %v1050_v0 = vpop.permute.xlu1 %1049 }
 0x181   : > { %1138 = vst.msk [vmem:[#allocation3 + $0x90] sm:$0xff] %vm1119_vm8, %v1048_v63  ;;  %1139 = vst.msk [vmem:[#allocation3 + $0x98] sm:$0xff] %vm1119_vm8, %v1050_v0  ;;  %v1608_v63 = vld [vmem:[%s5501_s20 + $0x9d] sm:$0xff] }
 0x182   : > { %1455 = vrot.lane.b32.xlu0 %v6079_v53, %s5455_s26  ;;  %1457 = vrot.lane.b32.xlu1 %v6082_v54, %s5455_s26 }
 0x184   : > { %v1052_v45 = vpop.permute.xlu0 %1051  ;;  %v1054_v46 = vpop.permute.xlu1 %1053 }
 0x185   : > { %1140 = vst.msk [vmem:[#allocation3 + $0xa0] sm:$0xff] %vm1119_vm8, %v1052_v45  ;;  %1141 = vst.msk [vmem:[#allocation3 + $0xa8] sm:$0xff] %vm1119_vm8, %v1054_v46  ;;  %v1609_v46 = vld [vmem:[%s5501_s20 + $0xa5] sm:$0xff] }
 0x186   : > { %1459 = vrot.lane.b32.xlu0 %v6091_v57, %s5455_s26  ;;  %1461 = vrot.lane.b32.xlu1 %v6094_v58, %s5455_s26 }
 0x188   : > { %v1056_v49 = vpop.permute.xlu0 %1055  ;;  %v1058_v50 = vpop.permute.xlu1 %1057 }
 0x189   : > { %1142 = vst.msk [vmem:[#allocation3 + $0xb0] sm:$0xff] %vm1119_vm8, %v1056_v49  ;;  %1143 = vst.msk [vmem:[#allocation3 + $0xb8] sm:$0xff] %vm1119_vm8, %v1058_v50  ;;  %v1610_v49 = vld [vmem:[%s5501_s20 + $0xad] sm:$0xff] }
 0x18a   : > { %1463 = vrot.lane.b32.xlu0 %v6103_v61, %s5455_s26  ;;  %1465 = vrot.lane.b32.xlu1 %v6106_v62, %s5455_s26 }
 0x18c   : > { %v1060_v53 = vpop.permute.xlu0 %1059  ;;  %v1062_v54 = vpop.permute.xlu1 %1061 }
 0x18d   : > { %1144 = vst.msk [vmem:[#allocation3 + $0xc0] sm:$0xff] %vm1119_vm8, %v1060_v53  ;;  %1145 = vst.msk [vmem:[#allocation3 + $0xc8] sm:$0xff] %vm1119_vm8, %v1062_v54  ;;  %v1611_v54 = vld [vmem:[%s5501_s20 + $0xb5] sm:$0xff] }
 0x18e   : > { %1467 = vrot.lane.b32.xlu0 %v6115_v1, %s5455_s26  ;;  %1469 = vrot.lane.b32.xlu1 %v6118_v2, %s5455_s26 }
 0x190   : > { %v1064_v57 = vpop.permute.xlu0 %1063  ;;  %v1066_v58 = vpop.permute.xlu1 %1065 }
 0x191   : > { %1146 = vst.msk [vmem:[#allocation3 + $0xd0] sm:$0xff] %vm1119_vm8, %v1064_v57  ;;  %1147 = vst.msk [vmem:[#allocation3 + $0xd8] sm:$0xff] %vm1119_vm8, %v1066_v58  ;;  %v1612_v57 = vld [vmem:[%s5501_s20 + $0xbd] sm:$0xff] }
 0x192   : > { %1471 = vrot.lane.b32.xlu0 %v6127_v5, %s5455_s26  ;;  %1473 = vrot.lane.b32.xlu1 %v6130_v6, %s5455_s26 }
 0x194   : > { %v1068_v61 = vpop.permute.xlu0 %1067  ;;  %v1070_v62 = vpop.permute.xlu1 %1069 }
 0x195   : > { %1148 = vst.msk [vmem:[#allocation3 + $0xe0] sm:$0xff] %vm1119_vm8, %v1068_v61  ;;  %1149 = vst.msk [vmem:[#allocation3 + $0xe8] sm:$0xff] %vm1119_vm8, %v1070_v62  ;;  %v1613_v62 = vld [vmem:[%s5501_s20 + $0xc5] sm:$0xff] }
 0x196   : > { %1475 = vrot.lane.b32.xlu0 %v6139_v9, %s5455_s26  ;;  %1477 = vrot.lane.b32.xlu1 %v6142_v10, %s5455_s26 }
 0x198   : > { %v1072_v1 = vpop.permute.xlu0 %1071  ;;  %v1074_v2 = vpop.permute.xlu1 %1073 }
 0x199   : > { %1150 = vst.msk [vmem:[#allocation3 + $0xf0] sm:$0xff] %vm1119_vm8, %v1072_v1  ;;  %1151 = vst.msk [vmem:[#allocation3 + $0xf8] sm:$0xff] %vm1119_vm8, %v1074_v2  ;;  %v1614_v1 = vld [vmem:[%s5501_s20 + $0xcd] sm:$0xff] }
 0x19a   : > { %1479 = vrot.lane.b32.xlu0 %v6151_v13, %s5455_s26  ;;  %1481 = vrot.lane.b32.xlu1 %v6154_v14, %s5455_s26 }
 0x19c   : > { %v1076_v3 = vpop.permute.xlu0 %1075  ;;  %v1078_v4 = vpop.permute.xlu1 %1077 }
 0x19d   : > { %1152 = vst.msk [vmem:[#allocation3 + $0x100] sm:$0xff] %vm1119_vm8, %v1076_v3  ;;  %1153 = vst.msk [vmem:[#allocation3 + $0x108] sm:$0xff] %vm1119_vm8, %v1078_v4  ;;  %v1615_v4 = vld [vmem:[%s5501_s20 + $0xd5] sm:$0xff] }
 0x19e   : > { %1483 = vrot.lane.b32.xlu0 %v6163_v17, %s5455_s26  ;;  %1485 = vrot.lane.b32.xlu1 %v6166_v18, %s5455_s26  ;;  %v1408_v17 = vld [vmem:[%s5501_s20 + $0x12c] sm:$0xff] }
 0x1a0   : > { %v1080_v5 = vpop.permute.xlu0 %1079  ;;  %v1082_v6 = vpop.permute.xlu1 %1081 }
 0x1a1   : > { %1154 = vst.msk [vmem:[#allocation3 + $0x110] sm:$0xff] %vm1119_vm8, %v1080_v5  ;;  %v1616_v5 = vld [vmem:[%s5501_s20 + $0xdd] sm:$0xff] }
 0x1a2   : > { %1156 = vst.msk [vmem:[#allocation3 + $0x118] sm:$0x3f] %vm7865_vm9, %v1082_v6  ;;  %1487 = vrot.lane.b32.xlu0 %v6175_v21, %s5455_s26  ;;  %1489 = vrot.lane.b32.xlu1 %v6178_v22, %s5455_s26  ;;  %v1410_v21 = vld [vmem:[%s5501_s20 + $0x13c] sm:$0x3f]  ;;  %vm2027_vm9 = vcmask 292096  }
 0x1a4   : > { %v1230_v7 = vpop.permute.xlu0 %1229  ;;  %v1232_v8 = vpop.permute.xlu1 %1231 }
 0x1a5   : > { %1338 = vst.msk [vmem:[#allocation3] sm:$0xff] %vm1337_vm10, %v1230_v7  ;;  %1339 = vst.msk [vmem:[#allocation3 + $0x8] sm:$0xff] %vm1337_vm10, %v1232_v8  ;;  %v1617_v8 = vld [vmem:[%s5501_s20 + $0xe5] sm:$0xff] }
 0x1a6   : > { %1491 = vrot.lane.b32.xlu0 %v6187_v25, %s5455_s26  ;;  %1493 = vrot.lane.b32.xlu1 %v6190_v26, %s5455_s26  ;;  %v1594_v25 = vld [vmem:[%s5501_s20 + $0x2d] sm:$0xff] }
 0x1a8   : > { %v1234_v9 = vpop.permute.xlu0 %1233  ;;  %v1236_v10 = vpop.permute.xlu1 %1235 }
 0x1a9   : > { %1340 = vst.msk [vmem:[#allocation3 + $0x10] sm:$0xff] %vm1337_vm10, %v1234_v9  ;;  %1341 = vst.msk [vmem:[#allocation3 + $0x18] sm:$0xff] %vm1337_vm10, %v1236_v10  ;;  %v1618_v9 = vld [vmem:[%s5501_s20 + $0xed] sm:$0xff] }
 0x1aa   : > { %1495 = vrot.lane.b32.xlu0 %v6199_v29, %s5455_s26  ;;  %1497 = vrot.lane.b32.xlu1 %v6202_v30, %s5455_s26  ;;  %v1596_v29 = vld [vmem:[%s5501_s20 + $0x3d] sm:$0xff] }
 0x1ac   : > { %v1238_v11 = vpop.permute.xlu0 %1237  ;;  %v1240_v12 = vpop.permute.xlu1 %1239 }
 0x1ad   : > { %1342 = vst.msk [vmem:[#allocation3 + $0x20] sm:$0xff] %vm1337_vm10, %v1238_v11  ;;  %1343 = vst.msk [vmem:[#allocation3 + $0x28] sm:$0xff] %vm1337_vm10, %v1240_v12  ;;  %v1619_v12 = vld [vmem:[%s5501_s20 + $0xf5] sm:$0xff] }
 0x1ae   : > { %1499 = vrot.lane.b32.xlu0 %v6211_v33, %s5455_s26  ;;  %1501 = vrot.lane.b32.xlu1 %v6214_v34, %s5455_s26  ;;  %v1598_v33 = vld [vmem:[%s5501_s20 + $0x4d] sm:$0xff] }
 0x1b0   : > { %v1242_v13 = vpop.permute.xlu0 %1241  ;;  %v1244_v14 = vpop.permute.xlu1 %1243 }
 0x1b1   : > { %1344 = vst.msk [vmem:[#allocation3 + $0x30] sm:$0xff] %vm1337_vm10, %v1242_v13  ;;  %1345 = vst.msk [vmem:[#allocation3 + $0x38] sm:$0xff] %vm1337_vm10, %v1244_v14  ;;  %v1620_v13 = vld [vmem:[%s5501_s20 + $0xfd] sm:$0xff] }
 0x1b2   : > { %1503 = vrot.lane.b32.xlu0 %v6223_v37, %s5455_s26  ;;  %1505 = vrot.lane.b32.xlu1 %v6226_v38, %s5455_s26  ;;  %v1600_v37 = vld [vmem:[%s5501_s20 + $0x5d] sm:$0xff] }
 0x1b4   : > { %v1246_v15 = vpop.permute.xlu0 %1245  ;;  %v1248_v16 = vpop.permute.xlu1 %1247 }
 0x1b5   : > { %1346 = vst.msk [vmem:[#allocation3 + $0x40] sm:$0xff] %vm1337_vm10, %v1246_v15  ;;  %1347 = vst.msk [vmem:[#allocation3 + $0x48] sm:$0xff] %vm1337_vm10, %v1248_v16  ;;  %v1621_v16 = vld [vmem:[%s5501_s20 + $0x105] sm:$0xff] }
 0x1b6   : > { %1507 = vrot.lane.b32.xlu0 %v6235_v41, %s5455_s26  ;;  %1509 = vrot.lane.b32.xlu1 %v6238_v42, %s5455_s26  ;;  %v1602_v41 = vld [vmem:[%s5501_s20 + $0x6d] sm:$0xff] }
 0x1b8   : > { %v1250_v18 = vpop.permute.xlu0 %1249  ;;  %v1252_v19 = vpop.permute.xlu1 %1251 }
 0x1b9   : > { %1348 = vst.msk [vmem:[#allocation3 + $0x50] sm:$0xff] %vm1337_vm10, %v1250_v18  ;;  %1349 = vst.msk [vmem:[#allocation3 + $0x58] sm:$0xff] %vm1337_vm10, %v1252_v19 }
 0x1ba   : > { %1511 = vrot.lane.b32.xlu0 %v6247_v47, %s5455_s26  ;;  %1513 = vrot.lane.b32.xlu1 %v1408_v17, %s5455_s26  ;;  %v1604_v47 = vld [vmem:[%s5501_s20 + $0x7d] sm:$0xff]  ;;  %v1622_v17 = vld [vmem:[%s5501_s20 + $0x10d] sm:$0xff] }
 0x1bc   : > { %v1254_v22 = vpop.permute.xlu0 %1253  ;;  %v1256_v23 = vpop.permute.xlu1 %1255 }
 0x1bd   : > { %1350 = vst.msk [vmem:[#allocation3 + $0x60] sm:$0xff] %vm1337_vm10, %v1254_v22  ;;  %1351 = vst.msk [vmem:[#allocation3 + $0x68] sm:$0xff] %vm1337_vm10, %v1256_v23  ;;  %v1623_v23 = vld [vmem:[%s5501_s20 + $0x115] sm:$0xff] }
 0x1be   : > { %1515 = vrot.lane.b32.xlu0 %v1409_v20, %s5455_s26  ;;  %1517 = vrot.lane.b32.xlu1 %v1410_v21, %s5455_s26  ;;  %v2065_v20 = vld [vmem:[%s7859_s2] sm:$0xff]  ;;  %v2066_v21 = vld [vmem:[%s7859_s2 + $0x8] sm:$0xff] }
 0x1bf   : > { %v5405_v22 = vpack.c.bf16 %v2066_v21, %v2065_v20  ;;  %v1833_v20 = vld [vmem:[%s5501_s20 + $0xd6] sm:$0xff]  ;;  %v1834_v21 = vld [vmem:[%s5501_s20 + $0xde] sm:$0xff] }
 0x1c0   : > { %v1258_v26 = vpop.permute.xlu0 %1257  ;;  %v1260_v27 = vpop.permute.xlu1 %1259 }
 0x1c1   : > { %1352 = vst.msk [vmem:[#allocation3 + $0x70] sm:$0xff] %vm1337_vm10, %v1258_v26  ;;  %1353 = vst.msk [vmem:[#allocation3 + $0x78] sm:$0xff] %vm1337_vm10, %v1260_v27  ;;  %5406 = vmatprep.subr.bf16.mxu0 %v5405_v22  ;;  %v2067_v27 = vld [vmem:[%s7859_s2 + $0x10] sm:$0xff] }
 0x1c2   : > { %1665 = vrot.lane.b32.xlu0 %v1593_v24, %s5456_s27  ;;  %1667 = vrot.lane.b32.xlu1 %v1594_v25, %s5456_s27  ;;  %v1624_v24 = vld [vmem:[%s5501_s20 + $0x11d] sm:$0xff] }
 0x1c3   : > { %5408 = vmatpush3.bf16.msra.mxu0 %v5405_v22 }
 0x1c4   : > { %v1262_v30 = vpop.permute.xlu0 %1261  ;;  %v1264_v31 = vpop.permute.xlu1 %1263 }
 0x1c5   : > { %1354 = vst.msk [vmem:[#allocation3 + $0x80] sm:$0xff] %vm1337_vm10, %v1262_v30  ;;  %1355 = vst.msk [vmem:[#allocation3 + $0x88] sm:$0xff] %vm1337_vm10, %v1264_v31  ;;  %v1625_v30 = vld [vmem:[%s5501_s20 + $0x125] sm:$0xff]  ;;  %v1626_v31 = vld [vmem:[%s5501_s20 + $0x12d] sm:$0xff] }
 0x1c6   : > { %1669 = vrot.lane.b32.xlu0 %v1595_v28, %s5456_s27  ;;  %1671 = vrot.lane.b32.xlu1 %v1596_v29, %s5456_s27  ;;  %v2068_v28 = vld [vmem:[%s7859_s2 + $0x18] sm:$0xff] }
 0x1c7   : > { %v5409_v29 = vpack.c.bf16 %v2068_v28, %v2067_v27  ;;  %v1837_v28 = vld [vmem:[%s5501_s20 + $0xf6] sm:$0xff] }
 0x1c8   : > { %v1266_v34 = vpop.permute.xlu0 %1265  ;;  %v1268_v35 = vpop.permute.xlu1 %1267 }
 0x1c9   : > { %1356 = vst.msk [vmem:[#allocation3 + $0x90] sm:$0xff] %vm1337_vm10, %v1266_v34  ;;  %1357 = vst.msk [vmem:[#allocation3 + $0x98] sm:$0xff] %vm1337_vm10, %v1268_v35  ;;  %5410 = vmatprep.subr.bf16.mxu0 %v5409_v29  ;;  %v2069_v34 = vld [vmem:[%s7859_s2 + $0x20] sm:$0xf]  ;;  %v1627_v35 = vld [vmem:[%s5501_s20 + $0x135] sm:$0xff] }
 0x1ca   : > { %1673 = vrot.lane.b32.xlu0 %v1597_v32, %s5456_s27  ;;  %1675 = vrot.lane.b32.xlu1 %v1598_v33, %s5456_s27 }
 0x1cb   : > { %5412 = vmatpush3.bf16.msra.mxu0 %v5409_v29  ;;  %v1838_v29 = vld [vmem:[%s5501_s20 + $0xfe] sm:$0xff] }
 0x1cc   : > { %v1270_v38 = vpop.permute.xlu0 %1269  ;;  %v1272_v39 = vpop.permute.xlu1 %1271  ;;  %5285 = vmatprep.subr.msk.mxu0 %vm2179_vm13, %v2069_v34 }
 0x1cd   : > { %1358 = vst.msk [vmem:[#allocation3 + $0xa0] sm:$0xff] %vm1337_vm10, %v1270_v38  ;;  %1359 = vst.msk [vmem:[#allocation3 + $0xa8] sm:$0xff] %vm1337_vm10, %v1272_v39  ;;  %v1811_v39 = vld [vmem:[%s5501_s20 + $0x26] sm:$0xff] }
 0x1ce   : > { %1677 = vrot.lane.b32.xlu0 %v1599_v36, %s5456_s27  ;;  %1679 = vrot.lane.b32.xlu1 %v1600_v37, %s5456_s27  ;;  %v1628_v36 = vld [vmem:[%s5501_s20 + $0x13d] sm:$0x3f] }
 0x1cf   : > { %5286 = vmatpush3.msk.msra.mxu0 %vm2179_vm13, %v2069_v34 }
 0x1d0   : > { %v1274_v42 = vpop.permute.xlu0 %1273  ;;  %v1276_v43 = vpop.permute.xlu1 %1275 }
 0x1d1   : > { %1360 = vst.msk [vmem:[#allocation3 + $0xb0] sm:$0xff] %vm1337_vm10, %v1274_v42  ;;  %1361 = vst.msk [vmem:[#allocation3 + $0xb8] sm:$0xff] %vm1337_vm10, %v1276_v43  ;;  %v1813_v43 = vld [vmem:[%s5501_s20 + $0x36] sm:$0xff] }
 0x1d2   : > { %1681 = vrot.lane.b32.xlu0 %v1601_v40, %s5456_s27  ;;  %1683 = vrot.lane.b32.xlu1 %v1602_v41, %s5456_s27  ;;  %v1812_v40 = vld [vmem:[%s5501_s20 + $0x2e] sm:$0xff] }
 0x1d4   : > { %v1278_v48 = vpop.permute.xlu0 %1277  ;;  %v1280_v51 = vpop.permute.xlu1 %1279 }
 0x1d5   : > { %1362 = vst.msk [vmem:[#allocation3 + $0xc0] sm:$0xff] %vm1337_vm10, %v1278_v48  ;;  %1363 = vst.msk [vmem:[#allocation3 + $0xc8] sm:$0xff] %vm1337_vm10, %v1280_v51  ;;  %v1815_v51 = vld [vmem:[%s5501_s20 + $0x46] sm:$0xff] }
 0x1d6   : > { %1685 = vrot.lane.b32.xlu0 %v1603_v44, %s5456_s27  ;;  %1687 = vrot.lane.b32.xlu1 %v1604_v47, %s5456_s27  ;;  %v1814_v44 = vld [vmem:[%s5501_s20 + $0x3e] sm:$0xff] }
 0x1d8   : > { %v1282_v56 = vpop.permute.xlu0 %1281  ;;  %v1284_v59 = vpop.permute.xlu1 %1283 }
 0x1d9   : > { %1364 = vst.msk [vmem:[#allocation3 + $0xd0] sm:$0xff] %vm1337_vm10, %v1282_v56  ;;  %1365 = vst.msk [vmem:[#allocation3 + $0xd8] sm:$0xff] %vm1337_vm10, %v1284_v59  ;;  %v1817_v59 = vld [vmem:[%s5501_s20 + $0x56] sm:$0xff] }
 0x1da   : > { %1689 = vrot.lane.b32.xlu0 %v1605_v52, %s5456_s27  ;;  %1691 = vrot.lane.b32.xlu1 %v1606_v55, %s5456_s27  ;;  %v1816_v52 = vld [vmem:[%s5501_s20 + $0x4e] sm:$0xff] }
 0x1dc   : > { %v1286_v0 = vpop.permute.xlu0 %1285  ;;  %v1288_v45 = vpop.permute.xlu1 %1287 }
 0x1dd   : > { %1366 = vst.msk [vmem:[#allocation3 + $0xe0] sm:$0xff] %vm1337_vm10, %v1286_v0  ;;  %1367 = vst.msk [vmem:[#allocation3 + $0xe8] sm:$0xff] %vm1337_vm10, %v1288_v45  ;;  %v1819_v45 = vld [vmem:[%s5501_s20 + $0x66] sm:$0xff] }
 0x1de   : > { %1693 = vrot.lane.b32.xlu0 %v1607_v60, %s5456_s27  ;;  %1695 = vrot.lane.b32.xlu1 %v1608_v63, %s5456_s27  ;;  %v1818_v60 = vld [vmem:[%s5501_s20 + $0x5e] sm:$0xff] }
 0x1e0   : > { %v1290_v50 = vpop.permute.xlu0 %1289  ;;  %v1292_v53 = vpop.permute.xlu1 %1291 }
 0x1e1   : > { %1368 = vst.msk [vmem:[#allocation3 + $0xf0] sm:$0xff] %vm1337_vm10, %v1290_v50  ;;  %1369 = vst.msk [vmem:[#allocation3 + $0xf8] sm:$0xff] %vm1337_vm10, %v1292_v53 }
 0x1e2   : > { %1697 = vrot.lane.b32.xlu0 %v1609_v46, %s5456_s27  ;;  %1699 = vrot.lane.b32.xlu1 %v1610_v49, %s5456_s27  ;;  %v1820_v46 = vld [vmem:[%s5501_s20 + $0x6e] sm:$0xff]  ;;  %v5458_v49 = vmov 0  }
 0x1e3   : > { %5441 = vset.pattern.permute.xlu1 %v5458_v49  ;;  %5440 = vset.pattern.permute.xlu0 %v5458_v49  ;;  %v2469_v49 = vld [vmem:[%s7858_s1 + $0x28] sm:$0xff] }
 0x1e4   : > { %v1294_v58 = vpop.permute.xlu0 %1293  ;;  %v1296_v61 = vpop.permute.xlu1 %1295 }
 0x1e5   : > { %1370 = vst.msk [vmem:[#allocation3 + $0x100] sm:$0xff] %vm1337_vm10, %v1294_v58  ;;  %1371 = vst.msk [vmem:[#allocation3 + $0x108] sm:$0xff] %vm1337_vm10, %v1296_v61 }
 0x1e6   : > { %1701 = vrot.lane.b32.xlu0 %v1611_v54, %s5456_s27  ;;  %1703 = vrot.lane.b32.xlu1 %v1612_v57, %s5456_s27  ;;  %v1821_v54 = vld [vmem:[%s5501_s20 + $0x76] sm:$0xff]  ;;  %v1822_v57 = vld [vmem:[%s5501_s20 + $0x7e] sm:$0xff] }
 0x1e8   : > { %v1298_v2 = vpop.permute.xlu0 %1297  ;;  %v1300_v3 = vpop.permute.xlu1 %1299 }
 0x1e9   : > { %1372 = vst.msk [vmem:[#allocation3 + $0x110] sm:$0xff] %vm1337_vm10, %v1298_v2 }
 0x1ea   : > { %1374 = vst.msk [vmem:[#allocation3 + $0x118] sm:$0x3f] %vm7863_vm11, %v1300_v3  ;;  %1705 = vrot.lane.b32.xlu0 %v1613_v62, %s5456_s27  ;;  %1707 = vrot.lane.b32.xlu1 %v1614_v1, %s5456_s27  ;;  %v1823_v62 = vld [vmem:[%s5501_s20 + $0x86] sm:$0xff]  ;;  %v1824_v1 = vld [vmem:[%s5501_s20 + $0x8e] sm:$0xff]  ;;  %vm7866_vm11 = vcmask 294144  }
 0x1ec   : > { %v1448_v6 = vpop.permute.xlu0 %1447  ;;  %v1450_v7 = vpop.permute.xlu1 %1449 }
 0x1ed   : > { %1556 = vst.msk [vmem:[#allocation3] sm:$0xff] %vm1555_vm12, %v1448_v6  ;;  %1557 = vst.msk [vmem:[#allocation3 + $0x8] sm:$0xff] %vm1555_vm12, %v1450_v7 }
 0x1ee   : > { %1709 = vrot.lane.b32.xlu0 %v1615_v4, %s5456_s27  ;;  %1711 = vrot.lane.b32.xlu1 %v1616_v5, %s5456_s27  ;;  %v1825_v4 = vld [vmem:[%s5501_s20 + $0x96] sm:$0xff]  ;;  %v1826_v5 = vld [vmem:[%s5501_s20 + $0x9e] sm:$0xff] }
 0x1f0   : > { %v1452_v10 = vpop.permute.xlu0 %1451  ;;  %v1454_v11 = vpop.permute.xlu1 %1453 }
 0x1f1   : > { %1558 = vst.msk [vmem:[#allocation3 + $0x10] sm:$0xff] %vm1555_vm12, %v1452_v10  ;;  %1559 = vst.msk [vmem:[#allocation3 + $0x18] sm:$0xff] %vm1555_vm12, %v1454_v11 }
 0x1f2   : > { %1713 = vrot.lane.b32.xlu0 %v1617_v8, %s5456_s27  ;;  %1715 = vrot.lane.b32.xlu1 %v1618_v9, %s5456_s27  ;;  %v1827_v8 = vld [vmem:[%s5501_s20 + $0xa6] sm:$0xff]  ;;  %v1828_v9 = vld [vmem:[%s5501_s20 + $0xae] sm:$0xff] }
 0x1f4   : > { %v1456_v14 = vpop.permute.xlu0 %1455  ;;  %v1458_v15 = vpop.permute.xlu1 %1457 }
 0x1f5   : > { %1560 = vst.msk [vmem:[#allocation3 + $0x20] sm:$0xff] %vm1555_vm12, %v1456_v14  ;;  %1561 = vst.msk [vmem:[#allocation3 + $0x28] sm:$0xff] %vm1555_vm12, %v1458_v15 }
 0x1f6   : > { %1717 = vrot.lane.b32.xlu0 %v1619_v12, %s5456_s27  ;;  %1719 = vrot.lane.b32.xlu1 %v1620_v13, %s5456_s27  ;;  %v1829_v12 = vld [vmem:[%s5501_s20 + $0xb6] sm:$0xff]  ;;  %v1830_v13 = vld [vmem:[%s5501_s20 + $0xbe] sm:$0xff] }
 0x1f8   : > { %v1460_v18 = vpop.permute.xlu0 %1459  ;;  %v1462_v19 = vpop.permute.xlu1 %1461 }
 0x1f9   : > { %1562 = vst.msk [vmem:[#allocation3 + $0x30] sm:$0xff] %vm1555_vm12, %v1460_v18  ;;  %1563 = vst.msk [vmem:[#allocation3 + $0x38] sm:$0xff] %vm1555_vm12, %v1462_v19 }
 0x1fa   : > { %1721 = vrot.lane.b32.xlu0 %v1621_v16, %s5456_s27  ;;  %1723 = vrot.lane.b32.xlu1 %v1622_v17, %s5456_s27  ;;  %v1831_v16 = vld [vmem:[%s5501_s20 + $0xc6] sm:$0xff]  ;;  %v1832_v17 = vld [vmem:[%s5501_s20 + $0xce] sm:$0xff] }
 0x1fc   : > { %v1464_v25 = vpop.permute.xlu0 %1463  ;;  %v1466_v26 = vpop.permute.xlu1 %1465 }
 0x1fd   : > { %1564 = vst.msk [vmem:[#allocation3 + $0x40] sm:$0xff] %vm1555_vm12, %v1464_v25  ;;  %1565 = vst.msk [vmem:[#allocation3 + $0x48] sm:$0xff] %vm1555_vm12, %v1466_v26  ;;  %v1836_v25 = vld [vmem:[%s5501_s20 + $0xee] sm:$0xff] }
 0x1fe   : > { %1725 = vrot.lane.b32.xlu0 %v1623_v23, %s5456_s27  ;;  %1727 = vrot.lane.b32.xlu1 %v1624_v24, %s5456_s27  ;;  %v1835_v24 = vld [vmem:[%s5501_s20 + $0xe6] sm:$0xff] }
 0x200   : > { %v1468_v32 = vpop.permute.xlu0 %1467  ;;  %v1470_v33 = vpop.permute.xlu1 %1469 }
 0x201   : > { %1566 = vst.msk [vmem:[#allocation3 + $0x50] sm:$0xff] %vm1555_vm12, %v1468_v32  ;;  %1567 = vst.msk [vmem:[#allocation3 + $0x58] sm:$0xff] %vm1555_vm12, %v1470_v33  ;;  %v1839_v32 = vld [vmem:[%s5501_s20 + $0x106] sm:$0xff]  ;;  %v1840_v33 = vld [vmem:[%s5501_s20 + $0x10e] sm:$0xff] }
 0x202   : > { %1729 = vrot.lane.b32.xlu0 %v1625_v30, %s5456_s27  ;;  %1731 = vrot.lane.b32.xlu1 %v1626_v31, %s5456_s27 }
 0x204   : > { %v1472_v37 = vpop.permute.xlu0 %1471  ;;  %v1474_v38 = vpop.permute.xlu1 %1473 }
 0x205   : > { %1568 = vst.msk [vmem:[#allocation3 + $0x60] sm:$0xff] %vm1555_vm12, %v1472_v37  ;;  %1569 = vst.msk [vmem:[#allocation3 + $0x68] sm:$0xff] %vm1555_vm12, %v1474_v38  ;;  %v1842_v37 = vld [vmem:[%s5501_s20 + $0x11e] sm:$0xff] }
 0x206   : > { %1733 = vrot.lane.b32.xlu0 %v1627_v35, %s5456_s27  ;;  %1735 = vrot.lane.b32.xlu1 %v1628_v36, %s5456_s27  ;;  %v1841_v36 = vld [vmem:[%s5501_s20 + $0x116] sm:$0xff] }
 0x208   : > { %v1476_v41 = vpop.permute.xlu0 %1475  ;;  %v1478_v42 = vpop.permute.xlu1 %1477 }
 0x209   : > { %1570 = vst.msk [vmem:[#allocation3 + $0x70] sm:$0xff] %vm1555_vm12, %v1476_v41  ;;  %1571 = vst.msk [vmem:[#allocation3 + $0x78] sm:$0xff] %vm1555_vm12, %v1478_v42  ;;  %v1844_v41 = vld [vmem:[%s5501_s20 + $0x12e] sm:$0xff] }
 0x20a   : > { %1883 = vrot.lane.b32.xlu0 %v1811_v39, %s5457_s12  ;;  %1885 = vrot.lane.b32.xlu1 %v1812_v40, %s5457_s12  ;;  %v1843_v40 = vld [vmem:[%s5501_s20 + $0x126] sm:$0xff] }
 0x20c   : > { %v1480_v47 = vpop.permute.xlu0 %1479  ;;  %v1482_v48 = vpop.permute.xlu1 %1481 }
 0x20d   : > { %1572 = vst.msk [vmem:[#allocation3 + $0x80] sm:$0xff] %vm1555_vm12, %v1480_v47  ;;  %1573 = vst.msk [vmem:[#allocation3 + $0x88] sm:$0xff] %vm1555_vm12, %v1482_v48  ;;  %v1846_v47 = vld [vmem:[%s5501_s20 + $0x13e] sm:$0x3f] }
 0x20e   : > { %1887 = vrot.lane.b32.xlu0 %v1813_v43, %s5457_s12  ;;  %1889 = vrot.lane.b32.xlu1 %v1814_v44, %s5457_s12  ;;  %v1845_v44 = vld [vmem:[%s5501_s20 + $0x136] sm:$0xff] }
 0x210   : > { %v1484_v55 = vpop.permute.xlu0 %1483  ;;  %v1486_v56 = vpop.permute.xlu1 %1485 }
 0x211   : > { %1574 = vst.msk [vmem:[#allocation3 + $0x90] sm:$0xff] %vm1555_vm12, %v1484_v55  ;;  %1575 = vst.msk [vmem:[#allocation3 + $0x98] sm:$0xff] %vm1555_vm12, %v1486_v56  ;;  %v2464_v55 = vld [vmem:[%s7858_s1] sm:$0xff] }
 0x212   : > { %1891 = vrot.lane.b32.xlu0 %v1815_v51, %s5457_s12  ;;  %1893 = vrot.lane.b32.xlu1 %v1816_v52, %s5457_s12  ;;  %v2465_v52 = vld [vmem:[%s7858_s1 + $0x8] sm:$0xff] }
 0x214   : > { %v1488_v63 = vpop.permute.xlu0 %1487  ;;  %v1490_v0 = vpop.permute.xlu1 %1489 }
 0x215   : > { %1576 = vst.msk [vmem:[#allocation3 + $0xa0] sm:$0xff] %vm1555_vm12, %v1488_v63  ;;  %1577 = vst.msk [vmem:[#allocation3 + $0xa8] sm:$0xff] %vm1555_vm12, %v1490_v0  ;;  %v2467_v63 = vld [vmem:[%s7858_s1 + $0x18] sm:$0xff] }
 0x216   : > { %1895 = vrot.lane.b32.xlu0 %v1817_v59, %s5457_s12  ;;  %1897 = vrot.lane.b32.xlu1 %v1818_v60, %s5457_s12  ;;  %v2466_v60 = vld [vmem:[%s7858_s1 + $0x10] sm:$0xff] }
 0x218   : > { %v1492_v50 = vpop.permute.xlu0 %1491  ;;  %v1494_v53 = vpop.permute.xlu1 %1493 }
 0x219   : > { %1578 = vst.msk [vmem:[#allocation3 + $0xb0] sm:$0xff] %vm1555_vm12, %v1492_v50  ;;  %1579 = vst.msk [vmem:[#allocation3 + $0xb8] sm:$0xff] %vm1555_vm12, %v1494_v53 }
 0x21a   : > { %1899 = vrot.lane.b32.xlu0 %v1819_v45, %s5457_s12  ;;  %1901 = vrot.lane.b32.xlu1 %v1820_v46, %s5457_s12  ;;  %v2468_v46 = vld [vmem:[%s7858_s1 + $0x20] sm:$0xff] }
 0x21c   : > { %v1496_v58 = vpop.permute.xlu0 %1495  ;;  %v1498_v61 = vpop.permute.xlu1 %1497 }
 0x21d   : > { %1580 = vst.msk [vmem:[#allocation3 + $0xc0] sm:$0xff] %vm1555_vm12, %v1496_v58  ;;  %1581 = vst.msk [vmem:[#allocation3 + $0xc8] sm:$0xff] %vm1555_vm12, %v1498_v61 }
 0x21e   : > { %1903 = vrot.lane.b32.xlu0 %v1821_v54, %s5457_s12  ;;  %1905 = vrot.lane.b32.xlu1 %v1822_v57, %s5457_s12  ;;  %v2470_v54 = vld [vmem:[%s7858_s1 + $0x30] sm:$0xff]  ;;  %v2471_v57 = vld [vmem:[%s7858_s1 + $0x38] sm:$0xff] }
 0x220   : > { %v1500_v2 = vpop.permute.xlu0 %1499  ;;  %v1502_v3 = vpop.permute.xlu1 %1501 }
 0x221   : > { %1582 = vst.msk [vmem:[#allocation3 + $0xd0] sm:$0xff] %vm1555_vm12, %v1500_v2  ;;  %1583 = vst.msk [vmem:[#allocation3 + $0xd8] sm:$0xff] %vm1555_vm12, %v1502_v3 }
 0x222   : > { %1907 = vrot.lane.b32.xlu0 %v1823_v62, %s5457_s12  ;;  %1909 = vrot.lane.b32.xlu1 %v1824_v1, %s5457_s12  ;;  %v2472_v62 = vld [vmem:[%s7858_s1 + $0x40] sm:$0xff]  ;;  %v2473_v1 = vld [vmem:[%s7858_s1 + $0x48] sm:$0xff] }
 0x224   : > { %v1504_v6 = vpop.permute.xlu0 %1503  ;;  %v1506_v7 = vpop.permute.xlu1 %1505 }
 0x225   : > { %1584 = vst.msk [vmem:[#allocation3 + $0xe0] sm:$0xff] %vm1555_vm12, %v1504_v6  ;;  %1585 = vst.msk [vmem:[#allocation3 + $0xe8] sm:$0xff] %vm1555_vm12, %v1506_v7 }
 0x226   : > { %1911 = vrot.lane.b32.xlu0 %v1825_v4, %s5457_s12  ;;  %1913 = vrot.lane.b32.xlu1 %v1826_v5, %s5457_s12  ;;  %v2474_v4 = vld [vmem:[%s7858_s1 + $0x50] sm:$0xff]  ;;  %v2475_v5 = vld [vmem:[%s7858_s1 + $0x58] sm:$0xff] }
 0x228   : > { %v1508_v10 = vpop.permute.xlu0 %1507  ;;  %v1510_v11 = vpop.permute.xlu1 %1509 }
 0x229   : > { %1586 = vst.msk [vmem:[#allocation3 + $0xf0] sm:$0xff] %vm1555_vm12, %v1508_v10  ;;  %1587 = vst.msk [vmem:[#allocation3 + $0xf8] sm:$0xff] %vm1555_vm12, %v1510_v11 }
 0x22a   : > { %1915 = vrot.lane.b32.xlu0 %v1827_v8, %s5457_s12  ;;  %1917 = vrot.lane.b32.xlu1 %v1828_v9, %s5457_s12  ;;  %v2476_v8 = vld [vmem:[%s7858_s1 + $0x60] sm:$0xff]  ;;  %v2477_v9 = vld [vmem:[%s7858_s1 + $0x68] sm:$0xff] }
 0x22c   : > { %v1512_v14 = vpop.permute.xlu0 %1511  ;;  %v1514_v15 = vpop.permute.xlu1 %1513 }
 0x22d   : > { %1588 = vst.msk [vmem:[#allocation3 + $0x100] sm:$0xff] %vm1555_vm12, %v1512_v14  ;;  %1589 = vst.msk [vmem:[#allocation3 + $0x108] sm:$0xff] %vm1555_vm12, %v1514_v15 }
 0x22e   : > { %1919 = vrot.lane.b32.xlu0 %v1829_v12, %s5457_s12  ;;  %1921 = vrot.lane.b32.xlu1 %v1830_v13, %s5457_s12  ;;  %v2478_v12 = vld [vmem:[%s7858_s1 + $0x70] sm:$0xff]  ;;  %v2479_v13 = vld [vmem:[%s7858_s1 + $0x78] sm:$0xff] }
 0x230   : > { %v1516_v18 = vpop.permute.xlu0 %1515  ;;  %v1518_v19 = vpop.permute.xlu1 %1517 }
 0x231   : > { %1590 = vst.msk [vmem:[#allocation3 + $0x110] sm:$0xff] %vm1555_vm12, %v1516_v18 }
 0x232   : > { %1592 = vst.msk [vmem:[#allocation3 + $0x118] sm:$0x3f] %vm7862_vm14, %v1518_v19  ;;  %1923 = vrot.lane.b32.xlu0 %v1831_v16, %s5457_s12  ;;  %1925 = vrot.lane.b32.xlu1 %v1832_v17, %s5457_s12  ;;  %v2480_v16 = vld [vmem:[%s7858_s1 + $0x80] sm:$0xff]  ;;  %v2481_v17 = vld [vmem:[%s7858_s1 + $0x88] sm:$0xff]  ;;  %vm7864_vm14 = vcmask 259296  }
 0x234   : > { %v1666_v22 = vpop.permute.xlu0 %1665  ;;  %v1668_v23 = vpop.permute.xlu1 %1667 }
 0x235   : > { %1774 = vst.msk [vmem:[#allocation3] sm:$0xff] %vm1773_vm15, %v1666_v22  ;;  %1775 = vst.msk [vmem:[#allocation3 + $0x8] sm:$0xff] %vm1773_vm15, %v1668_v23 }
 0x236   : > { %1927 = vrot.lane.b32.xlu0 %v1833_v20, %s5457_s12  ;;  %1929 = vrot.lane.b32.xlu1 %v1834_v21, %s5457_s12  ;;  %v2482_v20 = vld [vmem:[%s7858_s1 + $0x90] sm:$0xff]  ;;  %v2483_v21 = vld [vmem:[%s7858_s1 + $0x98] sm:$0xff] }
 0x238   : > { %v1670_v26 = vpop.permute.xlu0 %1669  ;;  %v1672_v27 = vpop.permute.xlu1 %1671 }
 0x239   : > { %1776 = vst.msk [vmem:[#allocation3 + $0x10] sm:$0xff] %vm1773_vm15, %v1670_v26  ;;  %1777 = vst.msk [vmem:[#allocation3 + $0x18] sm:$0xff] %vm1773_vm15, %v1672_v27 }
 0x23a   : > { %1931 = vrot.lane.b32.xlu0 %v1835_v24, %s5457_s12  ;;  %1933 = vrot.lane.b32.xlu1 %v1836_v25, %s5457_s12  ;;  %v2484_v24 = vld [vmem:[%s7858_s1 + $0xa0] sm:$0xff]  ;;  %v2485_v25 = vld [vmem:[%s7858_s1 + $0xa8] sm:$0xff] }
 0x23c   : > { %v1674_v30 = vpop.permute.xlu0 %1673  ;;  %v1676_v31 = vpop.permute.xlu1 %1675 }
 0x23d   : > { %1778 = vst.msk [vmem:[#allocation3 + $0x20] sm:$0xff] %vm1773_vm15, %v1674_v30  ;;  %1779 = vst.msk [vmem:[#allocation3 + $0x28] sm:$0xff] %vm1773_vm15, %v1676_v31 }
 0x23e   : > { %1935 = vrot.lane.b32.xlu0 %v1837_v28, %s5457_s12  ;;  %1937 = vrot.lane.b32.xlu1 %v1838_v29, %s5457_s12  ;;  %v2486_v28 = vld [vmem:[%s7858_s1 + $0xb0] sm:$0xff]  ;;  %v2487_v29 = vld [vmem:[%s7858_s1 + $0xb8] sm:$0xff] }
 0x240   : > { %v1678_v34 = vpop.permute.xlu0 %1677  ;;  %v1680_v35 = vpop.permute.xlu1 %1679 }
 0x241   : > { %1780 = vst.msk [vmem:[#allocation3 + $0x30] sm:$0xff] %vm1773_vm15, %v1678_v34  ;;  %1781 = vst.msk [vmem:[#allocation3 + $0x38] sm:$0xff] %vm1773_vm15, %v1680_v35 }
 0x242   : > { %1939 = vrot.lane.b32.xlu0 %v1839_v32, %s5457_s12  ;;  %1941 = vrot.lane.b32.xlu1 %v1840_v33, %s5457_s12  ;;  %v2488_v32 = vld [vmem:[%s7858_s1 + $0xc0] sm:$0xff]  ;;  %v2489_v33 = vld [vmem:[%s7858_s1 + $0xc8] sm:$0xff] }
 0x244   : > { %v1682_v38 = vpop.permute.xlu0 %1681  ;;  %v1684_v39 = vpop.permute.xlu1 %1683 }
 0x245   : > { %1782 = vst.msk [vmem:[#allocation3 + $0x40] sm:$0xff] %vm1773_vm15, %v1682_v38  ;;  %1783 = vst.msk [vmem:[#allocation3 + $0x48] sm:$0xff] %vm1773_vm15, %v1684_v39 }
 0x246   : > { %1943 = vrot.lane.b32.xlu0 %v1841_v36, %s5457_s12  ;;  %1945 = vrot.lane.b32.xlu1 %v1842_v37, %s5457_s12  ;;  %v2490_v36 = vld [vmem:[%s7858_s1 + $0xd0] sm:$0xff] }
 0x248   : > { %v1686_v42 = vpop.permute.xlu0 %1685  ;;  %v1688_v43 = vpop.permute.xlu1 %1687 }
 0x249   : > { %1784 = vst.msk [vmem:[#allocation3 + $0x50] sm:$0xff] %vm1773_vm15, %v1686_v42  ;;  %1785 = vst.msk [vmem:[#allocation3 + $0x58] sm:$0xff] %vm1773_vm15, %v1688_v43  ;;  %v2492_v42 = vld [vmem:[%s7858_s1 + $0xe0] sm:$0xff] }
 0x24a   : > { %1947 = vrot.lane.b32.xlu0 %v1843_v40, %s5457_s12  ;;  %1949 = vrot.lane.b32.xlu1 %v1844_v41, %s5457_s12  ;;  %v2491_v41 = vld [vmem:[%s7858_s1 + $0xd8] sm:$0xff] }
 0x24c   : > { %v1690_v48 = vpop.permute.xlu0 %1689  ;;  %v1692_v51 = vpop.permute.xlu1 %1691 }
 0x24d   : > { %1786 = vst.msk [vmem:[#allocation3 + $0x60] sm:$0xff] %vm1773_vm15, %v1690_v48  ;;  %1787 = vst.msk [vmem:[#allocation3 + $0x68] sm:$0xff] %vm1773_vm15, %v1692_v51  ;;  %v2493_v51 = vld [vmem:[%s7858_s1 + $0xe8] sm:$0xff] }
 0x24e   : > { %1951 = vrot.lane.b32.xlu0 %v1845_v44, %s5457_s12  ;;  %1953 = vrot.lane.b32.xlu1 %v1846_v47, %s5457_s12 }
 0x250   : > { %v1694_v56 = vpop.permute.xlu0 %1693  ;;  %v1696_v59 = vpop.permute.xlu1 %1695 }
 0x251   : > { %1788 = vst.msk [vmem:[#allocation3 + $0x70] sm:$0xff] %vm1773_vm15, %v1694_v56  ;;  %1789 = vst.msk [vmem:[#allocation3 + $0x78] sm:$0xff] %vm1773_vm15, %v1696_v59 }
 0x252   : > { %2507 = vperm.xlu1 %5441, %v2465_v52   ;;  %2502 = vperm.xlu0 %5440, %v2464_v55   ;;  %v2494_v52 = vld [vmem:[%s7858_s1 + $0xf0] sm:$0xff] }
 0x254   : > { %v1698_v0 = vpop.permute.xlu0 %1697  ;;  %v1700_v45 = vpop.permute.xlu1 %1699 }
 0x255   : > { %1790 = vst.msk [vmem:[#allocation3 + $0x80] sm:$0xff] %vm1773_vm15, %v1698_v0  ;;  %1791 = vst.msk [vmem:[#allocation3 + $0x88] sm:$0xff] %vm1773_vm15, %v1700_v45  ;;  %v2496_v0 = vld [vmem:[%s7858_s1 + $0x100] sm:$0xff] }
 0x256   : > { %2512 = vperm.xlu1 %5441, %v2466_v60   ;;  %2517 = vperm.xlu0 %5440, %v2467_v63   ;;  %v2495_v63 = vld [vmem:[%s7858_s1 + $0xf8] sm:$0xff] }
 0x258   : > { %v1702_v50 = vpop.permute.xlu0 %1701  ;;  %v1704_v53 = vpop.permute.xlu1 %1703 }
 0x259   : > { %1792 = vst.msk [vmem:[#allocation3 + $0x90] sm:$0xff] %vm1773_vm15, %v1702_v50  ;;  %1793 = vst.msk [vmem:[#allocation3 + $0x98] sm:$0xff] %vm1773_vm15, %v1704_v53  ;;  %v2497_v53 = vld [vmem:[%s7858_s1 + $0x108] sm:$0xff] }
 0x25a   : > { %2522 = vperm.xlu1 %5441, %v2468_v46   ;;  %2527 = vperm.xlu0 %5440, %v2469_v49  }
 0x25c   : > { %v1706_v58 = vpop.permute.xlu0 %1705  ;;  %v1708_v61 = vpop.permute.xlu1 %1707 }
 0x25d   : > { %1794 = vst.msk [vmem:[#allocation3 + $0xa0] sm:$0xff] %vm1773_vm15, %v1706_v58  ;;  %1795 = vst.msk [vmem:[#allocation3 + $0xa8] sm:$0xff] %vm1773_vm15, %v1708_v61 }
 0x25e   : > { %2532 = vperm.xlu1 %5441, %v2470_v54   ;;  %2537 = vperm.xlu0 %5440, %v2471_v57   ;;  %v2498_v54 = vld [vmem:[%s7858_s1 + $0x110] sm:$0xff] }
 0x260   : > { %v1710_v2 = vpop.permute.xlu0 %1709  ;;  %v1712_v3 = vpop.permute.xlu1 %1711 }
 0x261   : > { %1796 = vst.msk [vmem:[#allocation3 + $0xb0] sm:$0xff] %vm1773_vm15, %v1710_v2  ;;  %1797 = vst.msk [vmem:[#allocation3 + $0xb8] sm:$0xff] %vm1773_vm15, %v1712_v3 }
 0x262   : > { %2542 = vperm.xlu1 %5441, %v2472_v62   ;;  %2547 = vperm.xlu0 %5440, %v2473_v1   ;;  %v2499_v1 = vld [vmem:[%s7858_s1 + $0x118] sm:$0x3f] }
 0x264   : > { %v1714_v6 = vpop.permute.xlu0 %1713  ;;  %v1716_v7 = vpop.permute.xlu1 %1715 }
 0x265   : > { %1798 = vst.msk [vmem:[#allocation3 + $0xc0] sm:$0xff] %vm1773_vm15, %v1714_v6  ;;  %1799 = vst.msk [vmem:[#allocation3 + $0xc8] sm:$0xff] %vm1773_vm15, %v1716_v7 }
 0x266   : > { %2552 = vperm.xlu1 %5441, %v2474_v4   ;;  %2557 = vperm.xlu0 %5440, %v2475_v5  }
 0x268   : > { %v1718_v10 = vpop.permute.xlu0 %1717  ;;  %v1720_v11 = vpop.permute.xlu1 %1719 }
 0x269   : > { %1800 = vst.msk [vmem:[#allocation3 + $0xd0] sm:$0xff] %vm1773_vm15, %v1718_v10  ;;  %1801 = vst.msk [vmem:[#allocation3 + $0xd8] sm:$0xff] %vm1773_vm15, %v1720_v11 }
 0x26a   : > { %2562 = vperm.xlu1 %5441, %v2476_v8   ;;  %2567 = vperm.xlu0 %5440, %v2477_v9  }
 0x26c   : > { %v1722_v14 = vpop.permute.xlu0 %1721  ;;  %v1724_v15 = vpop.permute.xlu1 %1723 }
 0x26d   : > { %1802 = vst.msk [vmem:[#allocation3 + $0xe0] sm:$0xff] %vm1773_vm15, %v1722_v14  ;;  %1803 = vst.msk [vmem:[#allocation3 + $0xe8] sm:$0xff] %vm1773_vm15, %v1724_v15 }
 0x26e   : > { %2572 = vperm.xlu1 %5441, %v2478_v12   ;;  %2577 = vperm.xlu0 %5440, %v2479_v13  }
 0x270   : > { %v1726_v18 = vpop.permute.xlu0 %1725  ;;  %v1728_v19 = vpop.permute.xlu1 %1727 }
 0x271   : > { %1804 = vst.msk [vmem:[#allocation3 + $0xf0] sm:$0xff] %vm1773_vm15, %v1726_v18  ;;  %1805 = vst.msk [vmem:[#allocation3 + $0xf8] sm:$0xff] %vm1773_vm15, %v1728_v19 }
 0x272   : > { %2582 = vperm.xlu1 %5441, %v2480_v16   ;;  %2587 = vperm.xlu0 %5440, %v2481_v17  }
 0x274   : > { %v1730_v22 = vpop.permute.xlu0 %1729  ;;  %v1732_v23 = vpop.permute.xlu1 %1731 }
 0x275   : > { %1806 = vst.msk [vmem:[#allocation3 + $0x100] sm:$0xff] %vm1773_vm15, %v1730_v22  ;;  %1807 = vst.msk [vmem:[#allocation3 + $0x108] sm:$0xff] %vm1773_vm15, %v1732_v23 }
 0x276   : > { %2592 = vperm.xlu1 %5441, %v2482_v20   ;;  %2597 = vperm.xlu0 %5440, %v2483_v21  }
 0x278   : > { %v1734_v26 = vpop.permute.xlu0 %1733  ;;  %v1736_v27 = vpop.permute.xlu1 %1735 }
 0x279   : > { %1808 = vst.msk [vmem:[#allocation3 + $0x110] sm:$0xff] %vm1773_vm15, %v1734_v26 }
 0x27a   : > { %1810 = vst.msk [vmem:[#allocation3 + $0x118] sm:$0x3f] %vm7864_vm14, %v1736_v27  ;;  %2602 = vperm.xlu1 %5441, %v2484_v24   ;;  %2607 = vperm.xlu0 %5440, %v2485_v25   ;;  %vm2070_vm14 = vcmask 293888  }
 0x27c   : > { %v1884_v30 = vpop.permute.xlu0 %1883  ;;  %v1886_v31 = vpop.permute.xlu1 %1885 }
 0x27d   : > { %1992 = vst.msk [vmem:[#allocation3] sm:$0xff] %vm7866_vm11, %v1884_v30  ;;  %1993 = vst.msk [vmem:[#allocation3 + $0x8] sm:$0xff] %vm7866_vm11, %v1886_v31 }
 0x27e   : > { %2612 = vperm.xlu1 %5441, %v2486_v28   ;;  %2617 = vperm.xlu0 %5440, %v2487_v29  }
 0x280   : > { %v1888_v34 = vpop.permute.xlu0 %1887  ;;  %v1890_v35 = vpop.permute.xlu1 %1889 }
 0x281   : > { %1994 = vst.msk [vmem:[#allocation3 + $0x10] sm:$0xff] %vm7866_vm11, %v1888_v34  ;;  %1995 = vst.msk [vmem:[#allocation3 + $0x18] sm:$0xff] %vm7866_vm11, %v1890_v35 }
 0x282   : > { %2622 = vperm.xlu1 %5441, %v2488_v32   ;;  %2627 = vperm.xlu0 %5440, %v2489_v33  }
 0x284   : > { %v1892_v37 = vpop.permute.xlu0 %1891  ;;  %v1894_v38 = vpop.permute.xlu1 %1893  ;;  %v2029_v39 = vld [vmem:[#allocation3] sm:$0xff]  ;;  %v2030_v40 = vld [vmem:[#allocation3 + $0x8] sm:$0xff] }
 0x285   : > { %1996 = vst.msk [vmem:[#allocation3 + $0x20] sm:$0xff] %vm7866_vm11, %v1892_v37  ;;  %1997 = vst.msk [vmem:[#allocation3 + $0x28] sm:$0xff] %vm7866_vm11, %v1894_v38  ;;  %5287 = vmatprep.mubr.msk.f32.mxu0 %vm2070_vm14, %v2029_v39 }
 0x286   : > { %5288 = vmatmul.mubr.msk.f32.vlgmr.msra.gmra.mrb[0].mxu0 %vm2070_vm14, %v2030_v40  ;;  %2632 = vperm.xlu1 %5441, %v2490_v36  }
 0x287   : > { %2637 = vperm.xlu0 %5440, %v2491_v41  }
 0x288   : > { %v1896_v43 = vpop.permute.xlu0 %1895  ;;  %v1898_v44 = vpop.permute.xlu1 %1897  ;;  %v2031_v47 = vld [vmem:[#allocation3 + $0x10] sm:$0xff]  ;;  %v2032_v48 = vld [vmem:[#allocation3 + $0x18] sm:$0xff] }
 0x289   : > { %1998 = vst.msk [vmem:[#allocation3 + $0x30] sm:$0xff] %vm7866_vm11, %v1896_v43  ;;  %1999 = vst.msk [vmem:[#allocation3 + $0x38] sm:$0xff] %vm7866_vm11, %v1898_v44  ;;  %5290 = vmatprep.mubr.msk.f32.mxu0 %vm2070_vm14, %v2031_v47 }
 0x28a   : > { %5291 = vmatmul.mubr.msk.f32.gmra.mrb[2].mxu0 %vm2070_vm14, %v2032_v48  ;;  %2642 = vperm.xlu1 %5441, %v2492_v42  }
 0x28b   : > { %2647 = vperm.xlu0 %5440, %v2493_v51  }
 0x28c   : > { %v1900_v55 = vpop.permute.xlu0 %1899  ;;  %v1902_v56 = vpop.permute.xlu1 %1901  ;;  %v2033_v59 = vld [vmem:[#allocation3 + $0x20] sm:$0xff]  ;;  %v2034_v60 = vld [vmem:[#allocation3 + $0x28] sm:$0xff] }
 0x28d   : > { %2000 = vst.msk [vmem:[#allocation3 + $0x40] sm:$0xff] %vm7866_vm11, %v1900_v55  ;;  %2001 = vst.msk [vmem:[#allocation3 + $0x48] sm:$0xff] %vm7866_vm11, %v1902_v56  ;;  %5293 = vmatprep.mubr.msk.f32.mxu0 %vm2070_vm14, %v2033_v59  ;;  %v5459_v56 = vmov 0.0  }
 0x28e   : > { %5294 = vmatmul.mubr.msk.f32.gmra.mrb[4].mxu0 %vm2070_vm14, %v2034_v60  ;;  %2652 = vperm.xlu1 %5441, %v2494_v52   ;;  %199 = vst.msk [vmem:[#allocation2] sm:$0xff] %vm198_vm0, %v5459_v56  ;;  %200 = vst.msk [vmem:[#allocation2 + $0x8] sm:$0xff] %vm198_vm0, %v5459_v56 }
 0x28f   : > { %2657 = vperm.xlu0 %5440, %v2495_v63   ;;  %203 = vst.msk [vmem:[#allocation2 + $0x131] sm:$0xff] %vm198_vm0, %v5459_v56  ;;  %204 = vst.msk [vmem:[#allocation2 + $0x139] sm:$0xff] %vm198_vm0, %v5459_v56 }
 0x290   : > { %v1904_v45 = vpop.permute.xlu0 %1903  ;;  %v1906_v46 = vpop.permute.xlu1 %1905  ;;  %v2035_v49 = vld [vmem:[#allocation3 + $0x30] sm:$0xff]  ;;  %v2036_v50 = vld [vmem:[#allocation3 + $0x38] sm:$0xff]  ;;  %206 = vst.msk [vmem:[%s6811_s28] sm:$0xff] %vm198_vm0, %v5459_v56  ;;  %207 = vst.msk [vmem:[%s6811_s28 + $0x8] sm:$0xff] %vm198_vm0, %v5459_v56 }
 0x291   : > { %2002 = vst.msk [vmem:[#allocation3 + $0x50] sm:$0xff] %vm7866_vm11, %v1904_v45  ;;  %2003 = vst.msk [vmem:[#allocation3 + $0x58] sm:$0xff] %vm7866_vm11, %v1906_v46  ;;  %5296 = vmatprep.mubr.msk.f32.mxu0 %vm2070_vm14, %v2035_v49 }
 0x292   : > { %5297 = vmatmul.mubr.msk.f32.gmra.mrb[6].mxu0 %vm2070_vm14, %v2036_v50  ;;  %2662 = vperm.xlu1 %5441, %v2496_v0   ;;  %209 = vst.msk [vmem:[%s6811_s28 + $0x131] sm:$0xff] %vm198_vm0, %v5459_v56  ;;  %210 = vst.msk [vmem:[%s6811_s28 + $0x139] sm:$0xff] %vm198_vm0, %v5459_v56 }
 0x293   : > { %2667 = vperm.xlu0 %5440, %v2497_v53  }
 0x294   : > { %v1908_v57 = vpop.permute.xlu0 %1907  ;;  %v1910_v58 = vpop.permute.xlu1 %1909  ;;  %v2037_v61 = vld [vmem:[#allocation3 + $0x40] sm:$0xff]  ;;  %v2038_v62 = vld [vmem:[#allocation3 + $0x48] sm:$0xff] }
 0x295   : > { %2004 = vst.msk [vmem:[#allocation3 + $0x60] sm:$0xff] %vm7866_vm11, %v1908_v57  ;;  %2005 = vst.msk [vmem:[#allocation3 + $0x68] sm:$0xff] %vm7866_vm11, %v1910_v58  ;;  %5299 = vmatprep.mubr.msk.f32.mxu0 %vm2070_vm14, %v2037_v61  ;;  %v2824_v59 = vld [vmem:[#allocation2 + $0x1] sm:$0xff] }
 0x296   : > { %5300 = vmatmul.mubr.msk.f32.gmra.mrb[8].mxu0 %vm2070_vm14, %v2038_v62  ;;  %2672 = vperm.xlu1 %5441, %v2498_v54  }
 0x297   : > { %2677 = vperm.xlu0 %5440, %v2499_v1  }
 0x298   : > { %v1912_v2 = vpop.permute.xlu0 %1911  ;;  %v1914_v3 = vpop.permute.xlu1 %1913  ;;  %v2039_v4 = vld [vmem:[#allocation3 + $0x50] sm:$0xff]  ;;  %v2040_v5 = vld [vmem:[#allocation3 + $0x58] sm:$0xff] }
 0x299   : > { %2006 = vst.msk [vmem:[#allocation3 + $0x70] sm:$0xff] %vm7866_vm11, %v1912_v2  ;;  %2007 = vst.msk [vmem:[#allocation3 + $0x78] sm:$0xff] %vm7866_vm11, %v1914_v3  ;;  %5302 = vmatprep.mubr.msk.f32.mxu0 %vm2070_vm14, %v2039_v4 }
 0x29a   : > { %5303 = vmatmul.mubr.msk.f32.gmra.mrb[10].mxu0 %vm2070_vm14, %v2040_v5  ;;  %2896 = vrot.lane.b32.xlu1 %v2824_v59, %s5450_s21 }
 0x29c   : > { %v1916_v6 = vpop.permute.xlu0 %1915  ;;  %v1918_v7 = vpop.permute.xlu1 %1917  ;;  %v2041_v8 = vld [vmem:[#allocation3 + $0x60] sm:$0xff]  ;;  %v2042_v9 = vld [vmem:[#allocation3 + $0x68] sm:$0xff] }
 0x29d   : > { %2008 = vst.msk [vmem:[#allocation3 + $0x80] sm:$0xff] %vm7866_vm11, %v1916_v6  ;;  %2009 = vst.msk [vmem:[#allocation3 + $0x88] sm:$0xff] %vm7866_vm11, %v1918_v7  ;;  %5305 = vmatprep.mubr.msk.f32.mxu0 %vm2070_vm14, %v2041_v8 }
 0x29e   : > { %5306 = vmatmul.mubr.msk.f32.gmra.mrb[12].mxu0 %vm2070_vm14, %v2042_v9 }
 0x2a0   : > { %v1920_v10 = vpop.permute.xlu0 %1919  ;;  %v1922_v11 = vpop.permute.xlu1 %1921  ;;  %v2043_v12 = vld [vmem:[#allocation3 + $0x70] sm:$0xff]  ;;  %v2044_v13 = vld [vmem:[#allocation3 + $0x78] sm:$0xff] }
 0x2a1   : > { %2010 = vst.msk [vmem:[#allocation3 + $0x90] sm:$0xff] %vm7866_vm11, %v1920_v10  ;;  %2011 = vst.msk [vmem:[#allocation3 + $0x98] sm:$0xff] %vm7866_vm11, %v1922_v11  ;;  %5308 = vmatprep.mubr.msk.f32.mxu0 %vm2070_vm14, %v2043_v12 }
 0x2a2   : > { %5309 = vmatmul.mubr.msk.f32.gmra.mrb[14].mxu0 %vm2070_vm14, %v2044_v13 }
 0x2a4   : > { %v1924_v14 = vpop.permute.xlu0 %1923  ;;  %v1926_v15 = vpop.permute.xlu1 %1925  ;;  %v2045_v16 = vld [vmem:[#allocation3 + $0x80] sm:$0xff]  ;;  %v2046_v17 = vld [vmem:[#allocation3 + $0x88] sm:$0xff] }
 0x2a5   : > { %2012 = vst.msk [vmem:[#allocation3 + $0xa0] sm:$0xff] %vm7866_vm11, %v1924_v14  ;;  %2013 = vst.msk [vmem:[#allocation3 + $0xa8] sm:$0xff] %vm7866_vm11, %v1926_v15  ;;  %5311 = vmatprep.mubr.msk.f32.mxu0 %vm2070_vm14, %v2045_v16 }
 0x2a6   : > { %5312 = vmatmul.mubr.msk.f32.gmra.mrb[16].mxu0 %vm2070_vm14, %v2046_v17 }
 0x2a8   : > { %v1928_v18 = vpop.permute.xlu0 %1927  ;;  %v1930_v19 = vpop.permute.xlu1 %1929  ;;  %v2047_v20 = vld [vmem:[#allocation3 + $0x90] sm:$0xff]  ;;  %v2048_v21 = vld [vmem:[#allocation3 + $0x98] sm:$0xff] }
 0x2a9   : > { %2014 = vst.msk [vmem:[#allocation3 + $0xb0] sm:$0xff] %vm7866_vm11, %v1928_v18  ;;  %2015 = vst.msk [vmem:[#allocation3 + $0xb8] sm:$0xff] %vm7866_vm11, %v1930_v19  ;;  %5314 = vmatprep.mubr.msk.f32.mxu0 %vm2070_vm14, %v2047_v20 }
 0x2aa   : > { %5315 = vmatmul.mubr.msk.f32.gmra.mrb[18].mxu0 %vm2070_vm14, %v2048_v21 }
 0x2ac   : > { %v1932_v22 = vpop.permute.xlu0 %1931  ;;  %v1934_v23 = vpop.permute.xlu1 %1933  ;;  %v2049_v24 = vld [vmem:[#allocation3 + $0xa0] sm:$0xff]  ;;  %v2050_v25 = vld [vmem:[#allocation3 + $0xa8] sm:$0xff] }
 0x2ad   : > { %2016 = vst.msk [vmem:[#allocation3 + $0xc0] sm:$0xff] %vm7866_vm11, %v1932_v22  ;;  %2017 = vst.msk [vmem:[#allocation3 + $0xc8] sm:$0xff] %vm7866_vm11, %v1934_v23  ;;  %5317 = vmatprep.mubr.msk.f32.mxu0 %vm2070_vm14, %v2049_v24 }
 0x2ae   : > { %5318 = vmatmul.mubr.msk.f32.gmra.mrb[20].mxu0 %vm2070_vm14, %v2050_v25  ;;  %v2752_v25 = vld [vmem:[#allocation2] sm:$0xff] }
 0x2af   : > { %2788 = vst.msk [vmem:[#allocation3] sm:$0xff] %vm198_vm0, %v2752_v25 }
 0x2b0   : > { %v1936_v26 = vpop.permute.xlu0 %1935  ;;  %v1938_v27 = vpop.permute.xlu1 %1937  ;;  %v2051_v28 = vld [vmem:[#allocation3 + $0xb0] sm:$0xff]  ;;  %v2052_v29 = vld [vmem:[#allocation3 + $0xb8] sm:$0xff] }
 0x2b1   : > { %2018 = vst.msk [vmem:[#allocation3 + $0xd0] sm:$0xff] %vm7866_vm11, %v1936_v26  ;;  %2019 = vst.msk [vmem:[#allocation3 + $0xd8] sm:$0xff] %vm7866_vm11, %v1938_v27  ;;  %5320 = vmatprep.mubr.msk.f32.mxu0 %vm2070_vm14, %v2051_v28  ;;  %v2753_v26 = vld [vmem:[#allocation2 + $0x8] sm:$0xff] }
 0x2b2   : > { %5321 = vmatmul.mubr.msk.f32.gmra.mrb[22].mxu0 %vm2070_vm14, %v2052_v29  ;;  %2789 = vst.msk [vmem:[#allocation3 + $0x8] sm:$0xff] %vm198_vm0, %v2753_v26 }
 0x2b4   : > { %v1940_v30 = vpop.permute.xlu0 %1939  ;;  %v1942_v31 = vpop.permute.xlu1 %1941  ;;  %v2053_v32 = vld [vmem:[#allocation3 + $0xc0] sm:$0xff]  ;;  %v2054_v33 = vld [vmem:[#allocation3 + $0xc8] sm:$0xff] }
 0x2b5   : > { %2020 = vst.msk [vmem:[#allocation3 + $0xe0] sm:$0xff] %vm7866_vm11, %v1940_v30  ;;  %2021 = vst.msk [vmem:[#allocation3 + $0xe8] sm:$0xff] %vm7866_vm11, %v1942_v31  ;;  %5323 = vmatprep.mubr.msk.f32.mxu0 %vm2070_vm14, %v2053_v32 }
 0x2b6   : > { %5324 = vmatmul.mubr.msk.f32.gmra.mrb[24].mxu0 %vm2070_vm14, %v2054_v33 }
 0x2b8   : > { %v1944_v34 = vpop.permute.xlu0 %1943  ;;  %v1946_v35 = vpop.permute.xlu1 %1945  ;;  %v2055_v36 = vld [vmem:[#allocation3 + $0xd0] sm:$0xff]  ;;  %v2056_v37 = vld [vmem:[#allocation3 + $0xd8] sm:$0xff] }
 0x2b9   : > { %2022 = vst.msk [vmem:[#allocation3 + $0xf0] sm:$0xff] %vm7866_vm11, %v1944_v34  ;;  %2023 = vst.msk [vmem:[#allocation3 + $0xf8] sm:$0xff] %vm7866_vm11, %v1946_v35  ;;  %5326 = vmatprep.mubr.msk.f32.mxu0 %vm2070_vm14, %v2055_v36 }
 0x2ba   : > { %5327 = vmatmul.mubr.msk.f32.gmra.mrb[26].mxu0 %vm2070_vm14, %v2056_v37 }
 0x2bc   : > { %v1948_v38 = vpop.permute.xlu0 %1947  ;;  %v1950_v39 = vpop.permute.xlu1 %1949  ;;  %v2057_v40 = vld [vmem:[#allocation3 + $0xe0] sm:$0xff]  ;;  %v2058_v41 = vld [vmem:[#allocation3 + $0xe8] sm:$0xff] }
 0x2bd   : > { %2024 = vst.msk [vmem:[#allocation3 + $0x100] sm:$0xff] %vm7866_vm11, %v1948_v38  ;;  %2025 = vst.msk [vmem:[#allocation3 + $0x108] sm:$0xff] %vm7866_vm11, %v1950_v39  ;;  %5329 = vmatprep.mubr.msk.f32.mxu0 %vm2070_vm14, %v2057_v40 }
 0x2be   : > { %5330 = vmatmul.mubr.msk.f32.gmra.mrb[28].mxu0 %vm2070_vm14, %v2058_v41 }
 0x2c0   : > { %v1952_v42 = vpop.permute.xlu0 %1951  ;;  %v1954_v43 = vpop.permute.xlu1 %1953  ;;  %v2059_v44 = vld [vmem:[#allocation3 + $0xf0] sm:$0xff]  ;;  %v2060_v47 = vld [vmem:[#allocation3 + $0xf8] sm:$0xff] }
 0x2c1   : > { %2026 = vst.msk [vmem:[#allocation3 + $0x110] sm:$0xff] %vm7866_vm11, %v1952_v42  ;;  %5332 = vmatprep.mubr.msk.f32.mxu0 %vm2070_vm14, %v2059_v44  ;;  %vm201_vm11 = vcmask 26624  }
 0x2c2   : > { %2028 = vst.msk [vmem:[#allocation3 + $0x118] sm:$0x3f] %vm2027_vm9, %v1954_v43  ;;  %5333 = vmatmul.mubr.msk.f32.gmra.mrb[30].mxu0 %vm2070_vm14, %v2060_v47 }
 0x2c3   : > { %202 = vst.msk [vmem:[#allocation2 + $0x10] sm:$0x7] %vm201_vm11, %v5459_v56  ;;  %205 = vst.msk [vmem:[#allocation2 + $0x141] sm:$0x7] %vm201_vm11, %v5459_v56 }
 0x2c4   : > { %v2061_v48 = vld [vmem:[#allocation3 + $0x100] sm:$0xff]  ;;  %v2062_v51 = vld [vmem:[#allocation3 + $0x108] sm:$0xff]  ;;  %208 = vst.msk [vmem:[%s6811_s28 + $0x10] sm:$0x7] %vm201_vm11, %v5459_v56  ;;  %211 = vst.msk [vmem:[%s6811_s28 + $0x141] sm:$0x7] %vm201_vm11, %v5459_v56 }
 0x2c5   : > { %5335 = vmatprep.mubr.msk.f32.mxu0 %vm2070_vm14, %v2061_v48 }
 0x2c6   : > { %5336 = vmatmul.mubr.msk.f32.gmra.mrb[32].mxu0 %vm2070_vm14, %v2062_v51 }
 0x2c8   : > { %v2063_v52 = vld [vmem:[#allocation3 + $0x110] sm:$0xff] }
 0x2c9   : > { %v2064_v55 = vld [vmem:[#allocation3 + $0x118] sm:$0x3f]  ;;  %5338 = vmatprep.mubr.msk.f32.mxu0 %vm2070_vm14, %v2063_v52 }
 0x2ca   : > { %5339 = vmatmul.mubr.msk.f32.gmra.mrb[34].mxu0 %vm2070_vm14, %v2064_v55  ;;  %v2825_v60 = vld [vmem:[#allocation2 + $0x9] sm:$0xff] }
 0x2cb   : > { %2898 = vrot.lane.b32.xlu0 %v2825_v60, %s5450_s21 }
 0x2d1   : > { %v2508_v63 = vpop.permute.xlu1 %2507  ;;  %v2503_v0 = vpop.permute.xlu0 %2502 }
 0x2d5   : > { %v2513_v45 = vpop.permute.xlu1 %2512  ;;  %v2518_v46 = vpop.permute.xlu0 %2517 }
 0x2d9   : > { %v2523_v49 = vpop.permute.xlu1 %2522  ;;  %v2528_v50 = vpop.permute.xlu0 %2527 }
 0x2dd   : > { %v6825_v53 = vpop.permute.xlu1 %2532  ;;  %v6827_v54 = vpop.permute.xlu0 %2537 }
 0x2e1   : > { %v6829_v57 = vpop.permute.xlu1 %2542  ;;  %v6831_v58 = vpop.permute.xlu0 %2547 }
 0x2e5   : > { %v6833_v61 = vpop.permute.xlu1 %2552  ;;  %v6835_v62 = vpop.permute.xlu0 %2557 }
 0x2e9   : > { %v6837_v1 = vpop.permute.xlu1 %2562  ;;  %v6839_v2 = vpop.permute.xlu0 %2567 }
 0x2ed   : > { %v6841_v3 = vpop.permute.xlu1 %2572  ;;  %v6843_v4 = vpop.permute.xlu0 %2577 }
 0x2f1   : > { %v6845_v5 = vpop.permute.xlu1 %2582  ;;  %v6847_v6 = vpop.permute.xlu0 %2587 }
 0x2f5   : > { %v6849_v7 = vpop.permute.xlu1 %2592  ;;  %v6851_v8 = vpop.permute.xlu0 %2597 }
 0x2f9   : > { %v6853_v9 = vpop.permute.xlu1 %2602  ;;  %v6855_v10 = vpop.permute.xlu0 %2607 }
 0x2fd   : > { %v6857_v11 = vpop.permute.xlu1 %2612  ;;  %v6859_v12 = vpop.permute.xlu0 %2617 }
 0x301   : > { %v6861_v13 = vpop.permute.xlu1 %2622  ;;  %v6863_v14 = vpop.permute.xlu0 %2627 }
 0x305   : > { %v6865_v15 = vpop.permute.xlu1 %2632 }
 0x306   : > { %v6867_v16 = vpop.permute.xlu0 %2637 }
 0x309   : > { %v6869_v17 = vpop.permute.xlu1 %2642 }
 0x30a   : > { %v6871_v18 = vpop.permute.xlu0 %2647 }
 0x30d   : > { %v6873_v19 = vpop.permute.xlu1 %2652 }
 0x30e   : > { %v6875_v20 = vpop.permute.xlu0 %2657 }
 0x311   : > { %v6877_v21 = vpop.permute.xlu1 %2662 }
 0x312   : > { %v6879_v22 = vpop.permute.xlu0 %2667 }
 0x315   : > { %v6881_v23 = vpop.permute.xlu1 %2672 }
 0x316   : > { %v6883_v24 = vpop.permute.xlu0 %2677 }
 0x319   : > { %v2897_v27 = vpop.permute.xlu1 %2896 }
 0x31a   : > { %3004 = vst.msk [vmem:[#allocation3] sm:$0xff] %vm465_vm2, %v2897_v27 }
 0x33d   : > { %v2899_v28 = vpop.permute.xlu0 %2898 }
 0x33e   : > { %3005 = vst.msk [vmem:[#allocation3 + $0x8] sm:$0xff] %vm465_vm2, %v2899_v28 }
 0x359   : > { %v5289_v29 = vpop.f32.mrb[0].mxu0 }
 0x35a   : > { %v2429_v30 = vmax.f32 %v5289_v29, 0.0  ;;  %v2249_v31 = vpop.f32.mrb[1].mxu0 }
 0x35b   : > { %v2428_v32 = vmax.f32 %v2249_v31, 0.0 }
 0x35c   : > { %v2681_v33 = vmul.f32 %v2508_v63, %v2429_v30 }
 0x35d   : > { %v2680_v34 = vmul.f32 %v2503_v0, %v2428_v32  ;;  %v5292_v35 = vpop.f32.mrb[2].mxu0 }
 0x35e   : > { %2717 = vst.msk [vmem:[#allocation2 + $0x1b] sm:$0xff] %vm198_vm0, %v2681_v33  ;;  %v2431_v36 = vmax.f32 %v5292_v35, 0.0  ;;  %v2259_v37 = vpop.f32.mrb[3].mxu0 }
 0x35f   : > { %2716 = vst.msk [vmem:[#allocation2 + $0x13] sm:$0xff] %vm198_vm0, %v2680_v34  ;;  %v2430_v38 = vmax.f32 %v2259_v37, 0.0 }
 0x360   : > { %v2683_v39 = vmul.f32 %v2518_v46, %v2431_v36 }
 0x361   : > { %v2682_v40 = vmul.f32 %v2513_v45, %v2430_v38  ;;  %v5295_v41 = vpop.f32.mrb[4].mxu0 }
 0x362   : > { %2719 = vst.msk [vmem:[#allocation2 + $0x2b] sm:$0xff] %vm198_vm0, %v2683_v39  ;;  %v2433_v42 = vmax.f32 %v5295_v41, 0.0  ;;  %v2269_v43 = vpop.f32.mrb[5].mxu0 }
 0x363   : > { %2718 = vst.msk [vmem:[#allocation2 + $0x23] sm:$0xff] %vm198_vm0, %v2682_v40  ;;  %v2432_v44 = vmax.f32 %v2269_v43, 0.0 }
 0x364   : > { %v2685_v47 = vmul.f32 %v2528_v50, %v2433_v42 }
 0x365   : > { %v2684_v48 = vmul.f32 %v2523_v49, %v2432_v44  ;;  %v5298_v51 = vpop.f32.mrb[6].mxu0 }
 0x366   : > { %2721 = vst.msk [vmem:[#allocation2 + $0x3b] sm:$0xff] %vm198_vm0, %v2685_v47  ;;  %v2435_v52 = vmax.f32 %v5298_v51, 0.0  ;;  %v2279_v55 = vpop.f32.mrb[7].mxu0  ;;  %v2827_v56 = vld [vmem:[#allocation2 + $0x19] sm:$0xff]  ;;  %v2826_v59 = vld [vmem:[#allocation2 + $0x11] sm:$0xff] }
 0x367   : > { %2720 = vst.msk [vmem:[#allocation2 + $0x33] sm:$0xff] %vm198_vm0, %v2684_v48  ;;  %v2434_v60 = vmax.f32 %v2279_v55, 0.0  ;;  %2902 = vrot.lane.b32.xlu0 %v2827_v56, %s5450_s21  ;;  %2900 = vrot.lane.b32.xlu1 %v2826_v59, %s5450_s21  ;;  %v2755_v63 = vld [vmem:[#allocation2 + $0x18] sm:$0xff]  ;;  %v2754_v0 = vld [vmem:[#allocation2 + $0x10] sm:$0xff] }
 0x368   : > { %v2687_v45 = vmul.f32 %v6827_v54, %v2435_v52  ;;  %2791 = vst.msk [vmem:[#allocation3 + $0x18] sm:$0xff] %vm198_vm0, %v2755_v63  ;;  %2790 = vst.msk [vmem:[#allocation3 + $0x10] sm:$0xff] %vm198_vm0, %v2754_v0 }
 0x369   : > { %v2686_v46 = vmul.f32 %v6825_v53, %v2434_v60  ;;  %v5301_v49 = vpop.f32.mrb[8].mxu0 }
 0x36a   : > { %2723 = vst.msk [vmem:[#allocation2 + $0x4b] sm:$0xff] %vm198_vm0, %v2687_v45  ;;  %v2437_v50 = vmax.f32 %v5301_v49, 0.0  ;;  %v2289_v25 = vpop.f32.mrb[9].mxu0  ;;  %v2829_v26 = vld [vmem:[#allocation2 + $0x29] sm:$0xff]  ;;  %v2828_v27 = vld [vmem:[#allocation2 + $0x21] sm:$0xff] }
 0x36b   : > { %2722 = vst.msk [vmem:[#allocation2 + $0x43] sm:$0xff] %vm198_vm0, %v2686_v46  ;;  %v2436_v28 = vmax.f32 %v2289_v25, 0.0  ;;  %2906 = vrot.lane.b32.xlu0 %v2829_v26, %s5450_s21  ;;  %2904 = vrot.lane.b32.xlu1 %v2828_v27, %s5450_s21  ;;  %v2757_v54 = vld [vmem:[#allocation2 + $0x28] sm:$0xff]  ;;  %v2756_v29 = vld [vmem:[#allocation2 + $0x20] sm:$0xff] }
 0x36c   : > { %v2689_v30 = vmul.f32 %v6831_v58, %v2437_v50  ;;  %2793 = vst.msk [vmem:[#allocation3 + $0x28] sm:$0xff] %vm198_vm0, %v2757_v54  ;;  %2792 = vst.msk [vmem:[#allocation3 + $0x20] sm:$0xff] %vm198_vm0, %v2756_v29 }
 0x36d   : > { %v2688_v53 = vmul.f32 %v6829_v57, %v2436_v28  ;;  %v5304_v31 = vpop.f32.mrb[10].mxu0 }
 0x36e   : > { %2725 = vst.msk [vmem:[#allocation2 + $0x5b] sm:$0xff] %vm198_vm0, %v2689_v30  ;;  %v2439_v32 = vmax.f32 %v5304_v31, 0.0  ;;  %v2299_v33 = vpop.f32.mrb[11].mxu0  ;;  %v2831_v34 = vld [vmem:[#allocation2 + $0x39] sm:$0xff]  ;;  %v2830_v35 = vld [vmem:[#allocation2 + $0x31] sm:$0xff] }
 0x36f   : > { %2724 = vst.msk [vmem:[#allocation2 + $0x53] sm:$0xff] %vm198_vm0, %v2688_v53  ;;  %v2438_v36 = vmax.f32 %v2299_v33, 0.0  ;;  %2910 = vrot.lane.b32.xlu0 %v2831_v34, %s5450_s21  ;;  %2908 = vrot.lane.b32.xlu1 %v2830_v35, %s5450_s21  ;;  %v2759_v58 = vld [vmem:[#allocation2 + $0x38] sm:$0xff]  ;;  %v2758_v37 = vld [vmem:[#allocation2 + $0x30] sm:$0xff] }
 0x370   : > { %v2691_v38 = vmul.f32 %v6835_v62, %v2439_v32  ;;  %2795 = vst.msk [vmem:[#allocation3 + $0x38] sm:$0xff] %vm198_vm0, %v2759_v58  ;;  %2794 = vst.msk [vmem:[#allocation3 + $0x30] sm:$0xff] %vm198_vm0, %v2758_v37 }
 0x371   : > { %v2690_v57 = vmul.f32 %v6833_v61, %v2438_v36  ;;  %v5307_v39 = vpop.f32.mrb[12].mxu0 }
 0x372   : > { %2727 = vst.msk [vmem:[#allocation2 + $0x6b] sm:$0xff] %vm198_vm0, %v2691_v38  ;;  %v2441_v40 = vmax.f32 %v5307_v39, 0.0  ;;  %v2309_v41 = vpop.f32.mrb[13].mxu0  ;;  %v2833_v42 = vld [vmem:[#allocation2 + $0x49] sm:$0xff]  ;;  %v2832_v43 = vld [vmem:[#allocation2 + $0x41] sm:$0xff] }
 0x373   : > { %2726 = vst.msk [vmem:[#allocation2 + $0x63] sm:$0xff] %vm198_vm0, %v2690_v57  ;;  %v2440_v44 = vmax.f32 %v2309_v41, 0.0  ;;  %2914 = vrot.lane.b32.xlu0 %v2833_v42, %s5450_s21  ;;  %2912 = vrot.lane.b32.xlu1 %v2832_v43, %s5450_s21  ;;  %v2761_v62 = vld [vmem:[#allocation2 + $0x48] sm:$0xff]  ;;  %v2760_v47 = vld [vmem:[#allocation2 + $0x40] sm:$0xff] }
 0x374   : > { %v2693_v48 = vmul.f32 %v6839_v2, %v2441_v40  ;;  %2797 = vst.msk [vmem:[#allocation3 + $0x48] sm:$0xff] %vm198_vm0, %v2761_v62  ;;  %2796 = vst.msk [vmem:[#allocation3 + $0x40] sm:$0xff] %vm198_vm0, %v2760_v47 }
 0x375   : > { %v2692_v61 = vmul.f32 %v6837_v1, %v2440_v44  ;;  %v5310_v51 = vpop.f32.mrb[14].mxu0 }
 0x376   : > { %2729 = vst.msk [vmem:[#allocation2 + $0x7b] sm:$0xff] %vm198_vm0, %v2693_v48  ;;  %v2443_v52 = vmax.f32 %v5310_v51, 0.0  ;;  %v2319_v55 = vpop.f32.mrb[15].mxu0  ;;  %v2835_v56 = vld [vmem:[#allocation2 + $0x59] sm:$0xff]  ;;  %v2834_v59 = vld [vmem:[#allocation2 + $0x51] sm:$0xff] }
 0x377   : > { %2728 = vst.msk [vmem:[#allocation2 + $0x73] sm:$0xff] %vm198_vm0, %v2692_v61  ;;  %v2442_v60 = vmax.f32 %v2319_v55, 0.0  ;;  %2918 = vrot.lane.b32.xlu0 %v2835_v56, %s5450_s21  ;;  %2916 = vrot.lane.b32.xlu1 %v2834_v59, %s5450_s21  ;;  %v2763_v2 = vld [vmem:[#allocation2 + $0x58] sm:$0xff]  ;;  %v2762_v63 = vld [vmem:[#allocation2 + $0x50] sm:$0xff] }
 0x378   : > { %v2695_v0 = vmul.f32 %v6843_v4, %v2443_v52  ;;  %2799 = vst.msk [vmem:[#allocation3 + $0x58] sm:$0xff] %vm198_vm0, %v2763_v2  ;;  %2798 = vst.msk [vmem:[#allocation3 + $0x50] sm:$0xff] %vm198_vm0, %v2762_v63 }
 0x379   : > { %v2694_v1 = vmul.f32 %v6841_v3, %v2442_v60  ;;  %v5313_v45 = vpop.f32.mrb[16].mxu0 }
 0x37a   : > { %2731 = vst.msk [vmem:[#allocation2 + $0x8b] sm:$0xff] %vm198_vm0, %v2695_v0  ;;  %v2445_v46 = vmax.f32 %v5313_v45, 0.0  ;;  %v2329_v49 = vpop.f32.mrb[17].mxu0  ;;  %v2837_v50 = vld [vmem:[#allocation2 + $0x69] sm:$0xff]  ;;  %v2836_v25 = vld [vmem:[#allocation2 + $0x61] sm:$0xff] }
 0x37b   : > { %2730 = vst.msk [vmem:[#allocation2 + $0x83] sm:$0xff] %vm198_vm0, %v2694_v1  ;;  %v2444_v26 = vmax.f32 %v2329_v49, 0.0  ;;  %2922 = vrot.lane.b32.xlu0 %v2837_v50, %s5450_s21  ;;  %2920 = vrot.lane.b32.xlu1 %v2836_v25, %s5450_s21  ;;  %v2765_v4 = vld [vmem:[#allocation2 + $0x68] sm:$0xff]  ;;  %v2764_v27 = vld [vmem:[#allocation2 + $0x60] sm:$0xff] }
 0x37c   : > { %v2697_v28 = vmul.f32 %v6847_v6, %v2445_v46  ;;  %2801 = vst.msk [vmem:[#allocation3 + $0x68] sm:$0xff] %vm198_vm0, %v2765_v4  ;;  %2800 = vst.msk [vmem:[#allocation3 + $0x60] sm:$0xff] %vm198_vm0, %v2764_v27 }
 0x37d   : > { %v2696_v3 = vmul.f32 %v6845_v5, %v2444_v26  ;;  %v5316_v54 = vpop.f32.mrb[18].mxu0 }
 0x37e   : > { %2733 = vst.msk [vmem:[#allocation2 + $0x9b] sm:$0xff] %vm198_vm0, %v2697_v28  ;;  %v2447_v29 = vmax.f32 %v5316_v54, 0.0  ;;  %v2339_v30 = vpop.f32.mrb[19].mxu0  ;;  %v2839_v53 = vld [vmem:[#allocation2 + $0x79] sm:$0xff]  ;;  %v2838_v31 = vld [vmem:[#allocation2 + $0x71] sm:$0xff] }
 0x37f   : > { %2732 = vst.msk [vmem:[#allocation2 + $0x93] sm:$0xff] %vm198_vm0, %v2696_v3  ;;  %v2446_v32 = vmax.f32 %v2339_v30, 0.0  ;;  %2926 = vrot.lane.b32.xlu0 %v2839_v53, %s5450_s21  ;;  %2924 = vrot.lane.b32.xlu1 %v2838_v31, %s5450_s21  ;;  %v2767_v6 = vld [vmem:[#allocation2 + $0x78] sm:$0xff]  ;;  %v2766_v33 = vld [vmem:[#allocation2 + $0x70] sm:$0xff] }
 0x380   : > { %v2699_v34 = vmul.f32 %v6851_v8, %v2447_v29  ;;  %2803 = vst.msk [vmem:[#allocation3 + $0x78] sm:$0xff] %vm198_vm0, %v2767_v6  ;;  %2802 = vst.msk [vmem:[#allocation3 + $0x70] sm:$0xff] %vm198_vm0, %v2766_v33 }
 0x381   : > { %v2698_v5 = vmul.f32 %v6849_v7, %v2446_v32  ;;  %v5319_v35 = vpop.f32.mrb[20].mxu0 }
 0x382   : > { %2735 = vst.msk [vmem:[#allocation2 + $0xab] sm:$0xff] %vm198_vm0, %v2699_v34  ;;  %v2449_v36 = vmax.f32 %v5319_v35, 0.0  ;;  %v2349_v58 = vpop.f32.mrb[21].mxu0  ;;  %v2841_v37 = vld [vmem:[#allocation2 + $0x89] sm:$0xff]  ;;  %v2840_v38 = vld [vmem:[#allocation2 + $0x81] sm:$0xff] }
 0x383   : > { %2734 = vst.msk [vmem:[#allocation2 + $0xa3] sm:$0xff] %vm198_vm0, %v2698_v5  ;;  %v2448_v57 = vmax.f32 %v2349_v58, 0.0  ;;  %2930 = vrot.lane.b32.xlu0 %v2841_v37, %s5450_s21  ;;  %2928 = vrot.lane.b32.xlu1 %v2840_v38, %s5450_s21  ;;  %v2769_v8 = vld [vmem:[#allocation2 + $0x88] sm:$0xff]  ;;  %v2768_v39 = vld [vmem:[#allocation2 + $0x80] sm:$0xff] }
 0x384   : > { %v2701_v40 = vmul.f32 %v6855_v10, %v2449_v36  ;;  %2805 = vst.msk [vmem:[#allocation3 + $0x88] sm:$0xff] %vm198_vm0, %v2769_v8  ;;  %2804 = vst.msk [vmem:[#allocation3 + $0x80] sm:$0xff] %vm198_vm0, %v2768_v39 }
 0x385   : > { %v2700_v7 = vmul.f32 %v6853_v9, %v2448_v57  ;;  %v5322_v41 = vpop.f32.mrb[22].mxu0 }
 0x386   : > { %2737 = vst.msk [vmem:[#allocation2 + $0xbb] sm:$0xff] %vm198_vm0, %v2701_v40  ;;  %v2451_v42 = vmax.f32 %v5322_v41, 0.0  ;;  %v2359_v43 = vpop.f32.mrb[23].mxu0  ;;  %v2843_v44 = vld [vmem:[#allocation2 + $0x99] sm:$0xff]  ;;  %v2842_v62 = vld [vmem:[#allocation2 + $0x91] sm:$0xff] }
 0x387   : > { %2736 = vst.msk [vmem:[#allocation2 + $0xb3] sm:$0xff] %vm198_vm0, %v2700_v7  ;;  %v2450_v47 = vmax.f32 %v2359_v43, 0.0  ;;  %2934 = vrot.lane.b32.xlu0 %v2843_v44, %s5450_s21  ;;  %2932 = vrot.lane.b32.xlu1 %v2842_v62, %s5450_s21  ;;  %v2771_v10 = vld [vmem:[#allocation2 + $0x98] sm:$0xff]  ;;  %v2770_v48 = vld [vmem:[#allocation2 + $0x90] sm:$0xff] }
 0x388   : > { %v2703_v61 = vmul.f32 %v6859_v12, %v2451_v42  ;;  %2807 = vst.msk [vmem:[#allocation3 + $0x98] sm:$0xff] %vm198_vm0, %v2771_v10  ;;  %2806 = vst.msk [vmem:[#allocation3 + $0x90] sm:$0xff] %vm198_vm0, %v2770_v48 }
 0x389   : > { %v2702_v9 = vmul.f32 %v6857_v11, %v2450_v47  ;;  %v5325_v51 = vpop.f32.mrb[24].mxu0 }
 0x38a   : > { %2739 = vst.msk [vmem:[#allocation2 + $0xcb] sm:$0xff] %vm198_vm0, %v2703_v61  ;;  %v2453_v52 = vmax.f32 %v5325_v51, 0.0  ;;  %v2369_v55 = vpop.f32.mrb[25].mxu0  ;;  %v2845_v56 = vld [vmem:[#allocation2 + $0xa9] sm:$0xff]  ;;  %v2844_v59 = vld [vmem:[#allocation2 + $0xa1] sm:$0xff] }
 0x38b   : > { %2738 = vst.msk [vmem:[#allocation2 + $0xc3] sm:$0xff] %vm198_vm0, %v2702_v9  ;;  %v2452_v60 = vmax.f32 %v2369_v55, 0.0  ;;  %2938 = vrot.lane.b32.xlu0 %v2845_v56, %s5450_s21  ;;  %2936 = vrot.lane.b32.xlu1 %v2844_v59, %s5450_s21  ;;  %v2773_v12 = vld [vmem:[#allocation2 + $0xa8] sm:$0xff]  ;;  %v2772_v2 = vld [vmem:[#allocation2 + $0xa0] sm:$0xff] }
 0x38c   : > { %v2705_v63 = vmul.f32 %v6863_v14, %v2453_v52  ;;  %2809 = vst.msk [vmem:[#allocation3 + $0xa8] sm:$0xff] %vm198_vm0, %v2773_v12  ;;  %2808 = vst.msk [vmem:[#allocation3 + $0xa0] sm:$0xff] %vm198_vm0, %v2772_v2  ;;  %v3041_v59 = vld [vmem:[#allocation2 + $0xa] sm:$0xff]  ;;  %v7025_v12 = vld [vmem:[#allocation2 + $0x1a] sm:$0xff] }
 0x38d   : > { %v2704_v11 = vmul.f32 %v6861_v13, %v2452_v60  ;;  %v5328_v0 = vpop.f32.mrb[26].mxu0  ;;  %v3040_v60 = vld [vmem:[#allocation2 + $0x2] sm:$0xff]  ;;  %v7027_v2 = vld [vmem:[#allocation2 + $0x12] sm:$0xff] }
 0x38e   : > { %2741 = vst.msk [vmem:[#allocation2 + $0xdb] sm:$0xff] %vm198_vm0, %v2705_v63  ;;  %v2455_v1 = vmax.f32 %v5328_v0, 0.0  ;;  %v2379_v45 = vpop.f32.mrb[27].mxu0  ;;  %v2847_v46 = vld [vmem:[#allocation2 + $0xb9] sm:$0xff]  ;;  %v2846_v49 = vld [vmem:[#allocation2 + $0xb1] sm:$0xff] }
 0x38f   : > { %2740 = vst.msk [vmem:[#allocation2 + $0xd3] sm:$0xff] %vm198_vm0, %v2704_v11  ;;  %v2454_v50 = vmax.f32 %v2379_v45, 0.0  ;;  %2942 = vrot.lane.b32.xlu0 %v2847_v46, %s5450_s21  ;;  %2940 = vrot.lane.b32.xlu1 %v2846_v49, %s5450_s21  ;;  %v2775_v14 = vld [vmem:[#allocation2 + $0xb8] sm:$0xff]  ;;  %v2774_v25 = vld [vmem:[#allocation2 + $0xb0] sm:$0xff]  ;;  %v7035_v11 = vld [vmem:[#allocation2 + $0x22] sm:$0xff] }
 0x390   : > { %v2707_v26 = vmul.f32 %v6867_v16, %v2455_v1  ;;  %2811 = vst.msk [vmem:[#allocation3 + $0xb8] sm:$0xff] %vm198_vm0, %v2775_v14  ;;  %2810 = vst.msk [vmem:[#allocation3 + $0xb0] sm:$0xff] %vm198_vm0, %v2774_v25  ;;  %v7033_v63 = vld [vmem:[#allocation2 + $0x2a] sm:$0xff]  ;;  %v7041_v0 = vld [vmem:[#allocation2 + $0x3a] sm:$0xff] }
 0x391   : > { %v2706_v13 = vmul.f32 %v6865_v15, %v2454_v50  ;;  %v5331_v4 = vpop.f32.mrb[28].mxu0  ;;  %v7043_v1 = vld [vmem:[#allocation2 + $0x32] sm:$0xff]  ;;  %v7049_v45 = vld [vmem:[#allocation2 + $0x4a] sm:$0xff]  ;;  %v7051_v46 = vld [vmem:[#allocation2 + $0x42] sm:$0xff] }
 0x392   : > { %2743 = vst.msk [vmem:[#allocation2 + $0xeb] sm:$0xff] %vm198_vm0, %v2707_v26  ;;  %v2457_v27 = vmax.f32 %v5331_v4, 0.0  ;;  %v2389_v28 = vpop.f32.mrb[29].mxu0  ;;  %v2849_v3 = vld [vmem:[#allocation2 + $0xc9] sm:$0xff]  ;;  %v2848_v54 = vld [vmem:[#allocation2 + $0xc1] sm:$0xff]  ;;  %v7059_v50 = vld [vmem:[#allocation2 + $0x52] sm:$0xff] }
 0x393   : > { %2742 = vst.msk [vmem:[#allocation2 + $0xe3] sm:$0xff] %vm198_vm0, %v2706_v13  ;;  %v2456_v29 = vmax.f32 %v2389_v28, 0.0  ;;  %2946 = vrot.lane.b32.xlu0 %v2849_v3, %s5450_s21  ;;  %2944 = vrot.lane.b32.xlu1 %v2848_v54, %s5450_s21  ;;  %v2777_v16 = vld [vmem:[#allocation2 + $0xc8] sm:$0xff]  ;;  %v2776_v30 = vld [vmem:[#allocation2 + $0xc0] sm:$0xff]  ;;  %v7075_v13 = vld [vmem:[#allocation2 + $0x72] sm:$0xff] }
 0x394   : > { %v2709_v53 = vmul.f32 %v6871_v18, %v2457_v27  ;;  %2813 = vst.msk [vmem:[#allocation3 + $0xc8] sm:$0xff] %vm198_vm0, %v2777_v16  ;;  %2812 = vst.msk [vmem:[#allocation3 + $0xc0] sm:$0xff] %vm198_vm0, %v2776_v30  ;;  %v7057_v49 = vld [vmem:[#allocation2 + $0x5a] sm:$0xff]  ;;  %v7065_v14 = vld [vmem:[#allocation2 + $0x6a] sm:$0xff] }
 0x395   : > { %v2708_v15 = vmul.f32 %v6869_v17, %v2456_v29  ;;  %v5334_v31 = vpop.f32.mrb[30].mxu0  ;;  %v7067_v25 = vld [vmem:[#allocation2 + $0x62] sm:$0xff]  ;;  %v7073_v26 = vld [vmem:[#allocation2 + $0x7a] sm:$0xff]  ;;  %v7081_v4 = vld [vmem:[#allocation2 + $0x8a] sm:$0xff] }
 0x396   : > { %2745 = vst.msk [vmem:[#allocation2 + $0xfb] sm:$0xff] %vm198_vm0, %v2709_v53  ;;  %v2459_v32 = vmax.f32 %v5334_v31, 0.0  ;;  %v2399_v6 = vpop.f32.mrb[31].mxu0  ;;  %v2851_v33 = vld [vmem:[#allocation2 + $0xd9] sm:$0xff]  ;;  %v2850_v34 = vld [vmem:[#allocation2 + $0xd1] sm:$0xff]  ;;  %v7083_v27 = vld [vmem:[#allocation2 + $0x82] sm:$0xff] }
 0x397   : > { %2744 = vst.msk [vmem:[#allocation2 + $0xf3] sm:$0xff] %vm198_vm0, %v2708_v15  ;;  %v2458_v5 = vmax.f32 %v2399_v6, 0.0  ;;  %2950 = vrot.lane.b32.xlu0 %v2851_v33, %s5450_s21  ;;  %2948 = vrot.lane.b32.xlu1 %v2850_v34, %s5450_s21  ;;  %v2779_v18 = vld [vmem:[#allocation2 + $0xd8] sm:$0xff]  ;;  %v2778_v35 = vld [vmem:[#allocation2 + $0xd0] sm:$0xff]  ;;  %v7099_v29 = vld [vmem:[#allocation2 + $0xa2] sm:$0xff] }
 0x398   : > { %v2711_v36 = vmul.f32 %v6875_v20, %v2459_v32  ;;  %2815 = vst.msk [vmem:[#allocation3 + $0xd8] sm:$0xff] %vm198_vm0, %v2779_v18  ;;  %2814 = vst.msk [vmem:[#allocation3 + $0xd0] sm:$0xff] %vm198_vm0, %v2778_v35  ;;  %v7089_v28 = vld [vmem:[#allocation2 + $0x9a] sm:$0xff]  ;;  %v7091_v3 = vld [vmem:[#allocation2 + $0x92] sm:$0xff] }
 0x399   : > { %v2710_v17 = vmul.f32 %v6873_v19, %v2458_v5  ;;  %v5337_v58 = vpop.f32.mrb[32].mxu0  ;;  %v7097_v54 = vld [vmem:[#allocation2 + $0xaa] sm:$0xff]  ;;  %v7105_v16 = vld [vmem:[#allocation2 + $0xba] sm:$0xff]  ;;  %v7107_v30 = vld [vmem:[#allocation2 + $0xb2] sm:$0xff] }
 0x39a   : > { %2747 = vst.msk [vmem:[#allocation2 + $0x10b] sm:$0xff] %vm198_vm0, %v2711_v36  ;;  %v2461_v37 = vmax.f32 %v5337_v58, 0.0  ;;  %v2409_v38 = vpop.f32.mrb[33].mxu0  ;;  %v2853_v57 = vld [vmem:[#allocation2 + $0xe9] sm:$0xff]  ;;  %v2852_v8 = vld [vmem:[#allocation2 + $0xe1] sm:$0xff]  ;;  %v7127_v5 = vld [vmem:[#allocation2 + $0xd2] sm:$0xff] }
 0x39b   : > { %2746 = vst.msk [vmem:[#allocation2 + $0x103] sm:$0xff] %vm198_vm0, %v2710_v17  ;;  %v2460_v39 = vmax.f32 %v2409_v38, 0.0  ;;  %2954 = vrot.lane.b32.xlu0 %v2853_v57, %s5450_s21  ;;  %2952 = vrot.lane.b32.xlu1 %v2852_v8, %s5450_s21  ;;  %v2781_v20 = vld [vmem:[#allocation2 + $0xe8] sm:$0xff]  ;;  %v2780_v40 = vld [vmem:[#allocation2 + $0xe0] sm:$0xff] }
 0x39c   : > { %v2713_v7 = vmul.f32 %v6879_v22, %v2461_v37  ;;  %2817 = vst.msk [vmem:[#allocation3 + $0xe8] sm:$0xff] %vm198_vm0, %v2781_v20  ;;  %2816 = vst.msk [vmem:[#allocation3 + $0xe0] sm:$0xff] %vm198_vm0, %v2780_v40  ;;  %v7115_v31 = vld [vmem:[#allocation2 + $0xca] sm:$0xff]  ;;  %v7117_v32 = vld [vmem:[#allocation2 + $0xc2] sm:$0xff] }
 0x39d   : > { %v2712_v19 = vmul.f32 %v6877_v21, %v2460_v39  ;;  %v5340_v41 = vpop.f32.mrb[34].mxu0  ;;  %v7125_v34 = vld [vmem:[#allocation2 + $0xda] sm:$0xff]  ;;  %v7135_v36 = vld [vmem:[#allocation2 + $0xea] sm:$0xff]  ;;  %v7137_v17 = vld [vmem:[#allocation2 + $0xe2] sm:$0xff] }
 0x39e   : > { %2749 = vst.msk [vmem:[#allocation2 + $0x11b] sm:$0xff] %vm198_vm0, %v2713_v7  ;;  %v2463_v42 = vmax.f32 %v5340_v41, 0.0  ;;  %v2419_v43 = vpop.f32.mrb[35].mxu0  ;;  %v2855_v44 = vld [vmem:[#allocation2 + $0xf9] sm:$0xff]  ;;  %v2854_v62 = vld [vmem:[#allocation2 + $0xf1] sm:$0xff] }
 0x39f   : > { %2748 = vst.msk [vmem:[#allocation2 + $0x113] sm:$0xff] %vm198_vm0, %v2712_v19  ;;  %v2462_v47 = vmax.f32 %v2419_v43, 0.0  ;;  %2958 = vrot.lane.b32.xlu0 %v2855_v44, %s5450_s21  ;;  %2956 = vrot.lane.b32.xlu1 %v2854_v62, %s5450_s21  ;;  %v2783_v22 = vld [vmem:[#allocation2 + $0xf8] sm:$0xff]  ;;  %v2782_v10 = vld [vmem:[#allocation2 + $0xf0] sm:$0xff] }
 0x3a0   : > { %v2715_v48 = vmul.f32 %v6883_v24, %v2463_v42  ;;  %2819 = vst.msk [vmem:[#allocation3 + $0xf8] sm:$0xff] %vm198_vm0, %v2783_v22  ;;  %2818 = vst.msk [vmem:[#allocation3 + $0xf0] sm:$0xff] %vm198_vm0, %v2782_v10  ;;  %v7145_v38 = vld [vmem:[#allocation2 + $0xfa] sm:$0xff]  ;;  %v7147_v57 = vld [vmem:[#allocation2 + $0xf2] sm:$0xff] }
 0x3a1   : > { %v2714_v21 = vmul.f32 %v6881_v23, %v2462_v47 }
 0x3a2   : > { %2751 = vst.msk [vmem:[#allocation2 + $0x12b] sm:$0x3f] %vm283_vm1, %v2715_v48  ;;  %v2857_v61 = vld [vmem:[#allocation2 + $0x109] sm:$0xff]  ;;  %v2856_v9 = vld [vmem:[#allocation2 + $0x101] sm:$0xff] }
 0x3a3   : > { %2750 = vst.msk [vmem:[#allocation2 + $0x123] sm:$0xff] %vm198_vm0, %v2714_v21  ;;  %2962 = vrot.lane.b32.xlu0 %v2857_v61, %s5450_s21  ;;  %2960 = vrot.lane.b32.xlu1 %v2856_v9, %s5450_s21  ;;  %v2785_v51 = vld [vmem:[#allocation2 + $0x108] sm:$0xff]  ;;  %v2784_v52 = vld [vmem:[#allocation2 + $0x100] sm:$0xff] }
 0x3a4   : > { %2821 = vst.msk [vmem:[#allocation3 + $0x108] sm:$0xff] %vm198_vm0, %v2785_v51  ;;  %2820 = vst.msk [vmem:[#allocation3 + $0x100] sm:$0xff] %vm198_vm0, %v2784_v52  ;;  %v7155_v20 = vld [vmem:[#allocation2 + $0x10a] sm:$0xff]  ;;  %v7157_v40 = vld [vmem:[#allocation2 + $0x102] sm:$0xff] }
 0x3a6   : > { %v2859_v24 = vld [vmem:[#allocation2 + $0x119] sm:$0x3f]  ;;  %v2858_v55 = vld [vmem:[#allocation2 + $0x111] sm:$0xff] }
 0x3a7   : > { %2966 = vrot.lane.b32.xlu0 %v2859_v24, %s5450_s21  ;;  %2964 = vrot.lane.b32.xlu1 %v2858_v55, %s5450_s21  ;;  %v2787_v23 = vld [vmem:[#allocation2 + $0x118] sm:$0x3f]  ;;  %v2786_v56 = vld [vmem:[#allocation2 + $0x110] sm:$0xff] }
 0x3a8   : > { %2823 = vst.msk [vmem:[#allocation3 + $0x118] sm:$0x3f] %vm283_vm1, %v2787_v23  ;;  %v3075_v41 = vld [vmem:[#allocation2 + $0x11a] sm:$0x3f]  ;;  %v7165_v42 = vld [vmem:[#allocation2 + $0x112] sm:$0xff] }
 0x3a9   : > { %2822 = vst.msk [vmem:[#allocation3 + $0x110] sm:$0xff] %vm198_vm0, %v2786_v56 }
 0x3ab   : > { %3114 = vrot.lane.b32.xlu0 %v3041_v59, %s5451_s22  ;;  %3112 = vrot.lane.b32.xlu1 %v3040_v60, %s5451_s22 }
 0x3af   : > { %3118 = vrot.lane.b32.xlu0 %v7025_v12, %s5451_s22  ;;  %3116 = vrot.lane.b32.xlu1 %v7027_v2, %s5451_s22 }
 0x3b3   : > { %3122 = vrot.lane.b32.xlu0 %v7033_v63, %s5451_s22  ;;  %3120 = vrot.lane.b32.xlu1 %v7035_v11, %s5451_s22 }
 0x3b7   : > { %3126 = vrot.lane.b32.xlu0 %v7041_v0, %s5451_s22  ;;  %3124 = vrot.lane.b32.xlu1 %v7043_v1, %s5451_s22 }
 0x3bb   : > { %3130 = vrot.lane.b32.xlu0 %v7049_v45, %s5451_s22  ;;  %3128 = vrot.lane.b32.xlu1 %v7051_v46, %s5451_s22 }
 0x3bf   : > { %3134 = vrot.lane.b32.xlu0 %v7057_v49, %s5451_s22  ;;  %3132 = vrot.lane.b32.xlu1 %v7059_v50, %s5451_s22 }
 0x3c3   : > { %3138 = vrot.lane.b32.xlu0 %v7065_v14, %s5451_s22  ;;  %3136 = vrot.lane.b32.xlu1 %v7067_v25, %s5451_s22 }
 0x3c7   : > { %3142 = vrot.lane.b32.xlu0 %v7073_v26, %s5451_s22  ;;  %3140 = vrot.lane.b32.xlu1 %v7075_v13, %s5451_s22 }
 0x3cb   : > { %3146 = vrot.lane.b32.xlu0 %v7081_v4, %s5451_s22  ;;  %3144 = vrot.lane.b32.xlu1 %v7083_v27, %s5451_s22 }
 0x3cf   : > { %3150 = vrot.lane.b32.xlu0 %v7089_v28, %s5451_s22  ;;  %3148 = vrot.lane.b32.xlu1 %v7091_v3, %s5451_s22 }
 0x3d3   : > { %3154 = vrot.lane.b32.xlu0 %v7097_v54, %s5451_s22  ;;  %3152 = vrot.lane.b32.xlu1 %v7099_v29, %s5451_s22 }
 0x3d7   : > { %3158 = vrot.lane.b32.xlu0 %v7105_v16, %s5451_s22  ;;  %3156 = vrot.lane.b32.xlu1 %v7107_v30, %s5451_s22 }
 0x3d9   : > { %v2903_v53 = vpop.permute.xlu0 %2902  ;;  %v2901_v15 = vpop.permute.xlu1 %2900 }
 0x3da   : > { %3007 = vst.msk [vmem:[#allocation3 + $0x18] sm:$0xff] %vm465_vm2, %v2903_v53  ;;  %3006 = vst.msk [vmem:[#allocation3 + $0x10] sm:$0xff] %vm465_vm2, %v2901_v15  ;;  %v3473_v15 = vld [vmem:[#allocation2 + $0x1b] sm:$0xff] }
 0x3db   : > { %3162 = vrot.lane.b32.xlu0 %v7115_v31, %s5451_s22  ;;  %3160 = vrot.lane.b32.xlu1 %v7117_v32, %s5451_s22 }
 0x3dd   : > { %v2907_v6 = vpop.permute.xlu0 %2906  ;;  %v2905_v33 = vpop.permute.xlu1 %2904 }
 0x3de   : > { %3009 = vst.msk [vmem:[#allocation3 + $0x28] sm:$0xff] %vm465_vm2, %v2907_v6  ;;  %3008 = vst.msk [vmem:[#allocation3 + $0x20] sm:$0xff] %vm465_vm2, %v2905_v33  ;;  %v3688_v33 = vld [vmem:[#allocation2 + $0x14] sm:$0xff] }
 0x3df   : > { %3166 = vrot.lane.b32.xlu0 %v7125_v34, %s5451_s22  ;;  %3164 = vrot.lane.b32.xlu1 %v7127_v5, %s5451_s22 }
 0x3e1   : > { %v2911_v18 = vpop.permute.xlu0 %2910  ;;  %v2909_v35 = vpop.permute.xlu1 %2908 }
 0x3e2   : > { %3011 = vst.msk [vmem:[#allocation3 + $0x38] sm:$0xff] %vm465_vm2, %v2911_v18  ;;  %3010 = vst.msk [vmem:[#allocation3 + $0x30] sm:$0xff] %vm465_vm2, %v2909_v35  ;;  %v3904_v35 = vld [vmem:[#allocation2 + $0x24] sm:$0xff] }
 0x3e3   : > { %3170 = vrot.lane.b32.xlu0 %v7135_v36, %s5451_s22  ;;  %3168 = vrot.lane.b32.xlu1 %v7137_v17, %s5451_s22 }
 0x3e5   : > { %v2915_v58 = vpop.permute.xlu0 %2914  ;;  %v2913_v37 = vpop.permute.xlu1 %2912 }
 0x3e6   : > { %3013 = vst.msk [vmem:[#allocation3 + $0x48] sm:$0xff] %vm465_vm2, %v2915_v58  ;;  %3012 = vst.msk [vmem:[#allocation3 + $0x40] sm:$0xff] %vm465_vm2, %v2913_v37  ;;  %v4589_v58 = vld [vmem:[%s7860_s3 + $0x8] sm:$0xff] }
 0x3e7   : > { %3174 = vrot.lane.b32.xlu0 %v7145_v38, %s5451_s22  ;;  %3172 = vrot.lane.b32.xlu1 %v7147_v57, %s5451_s22 }
 0x3e9   : > { %v2919_v8 = vpop.permute.xlu0 %2918  ;;  %v2917_v39 = vpop.permute.xlu1 %2916 }
 0x3ea   : > { %3015 = vst.msk [vmem:[#allocation3 + $0x58] sm:$0xff] %vm465_vm2, %v2919_v8  ;;  %3014 = vst.msk [vmem:[#allocation3 + $0x50] sm:$0xff] %vm465_vm2, %v2917_v39  ;;  %v4120_v8 = vld [vmem:[#allocation2 + $0x25] sm:$0xff] }
 0x3eb   : > { %3178 = vrot.lane.b32.xlu0 %v7155_v20, %s5451_s22  ;;  %3176 = vrot.lane.b32.xlu1 %v7157_v40, %s5451_s22  ;;  %v3905_v39 = vld [vmem:[#allocation2 + $0x2c] sm:$0xff] }
 0x3ed   : > { %v2923_v7 = vpop.permute.xlu0 %2922  ;;  %v2921_v19 = vpop.permute.xlu1 %2920 }
 0x3ee   : > { %3017 = vst.msk [vmem:[#allocation3 + $0x68] sm:$0xff] %vm465_vm2, %v2923_v7  ;;  %3016 = vst.msk [vmem:[#allocation3 + $0x60] sm:$0xff] %vm465_vm2, %v2921_v19 }
 0x3ef   : > { %3182 = vrot.lane.b32.xlu0 %v3075_v41, %s5451_s22  ;;  %3180 = vrot.lane.b32.xlu1 %v7165_v42, %s5451_s22 }
 0x3f1   : > { %v2927_v43 = vpop.permute.xlu0 %2926  ;;  %v2925_v44 = vpop.permute.xlu1 %2924 }
 0x3f2   : > { %3019 = vst.msk [vmem:[#allocation3 + $0x78] sm:$0xff] %vm465_vm2, %v2927_v43  ;;  %3018 = vst.msk [vmem:[#allocation3 + $0x70] sm:$0xff] %vm465_vm2, %v2925_v44  ;;  %v4121_v43 = vld [vmem:[#allocation2 + $0x2d] sm:$0xff]  ;;  %v4592_v44 = vld [vmem:[%s7860_s3 + $0x20] sm:$0xf] }
 0x3f3   : > { %3330 = vrot.lane.b32.xlu0 %v7025_v12, %s5452_s23  ;;  %3328 = vrot.lane.b32.xlu1 %v7027_v2, %s5452_s23 }
 0x3f5   : > { %v2931_v62 = vpop.permute.xlu0 %2930  ;;  %v2929_v47 = vpop.permute.xlu1 %2928 }
 0x3f6   : > { %3021 = vst.msk [vmem:[#allocation3 + $0x88] sm:$0xff] %vm465_vm2, %v2931_v62  ;;  %3020 = vst.msk [vmem:[#allocation3 + $0x80] sm:$0xff] %vm465_vm2, %v2929_v47 }
 0x3f7   : > { %3334 = vrot.lane.b32.xlu0 %v7033_v63, %s5452_s23  ;;  %3332 = vrot.lane.b32.xlu1 %v7035_v11, %s5452_s23 }
 0x3f9   : > { %v2935_v22 = vpop.permute.xlu0 %2934  ;;  %v2933_v10 = vpop.permute.xlu1 %2932 }
 0x3fa   : > { %3023 = vst.msk [vmem:[#allocation3 + $0x98] sm:$0xff] %vm465_vm2, %v2935_v22  ;;  %3022 = vst.msk [vmem:[#allocation3 + $0x90] sm:$0xff] %vm465_vm2, %v2933_v10  ;;  %v3475_v22 = vld [vmem:[#allocation2 + $0x2b] sm:$0xff] }
 0x3fb   : > { %3338 = vrot.lane.b32.xlu0 %v7041_v0, %s5452_s23  ;;  %3336 = vrot.lane.b32.xlu1 %v7043_v1, %s5452_s23 }
 0x3fd   : > { %v2939_v48 = vpop.permute.xlu0 %2938  ;;  %v2937_v21 = vpop.permute.xlu1 %2936 }
 0x3fe   : > { %3025 = vst.msk [vmem:[#allocation3 + $0xa8] sm:$0xff] %vm465_vm2, %v2939_v48  ;;  %3024 = vst.msk [vmem:[#allocation3 + $0xa0] sm:$0xff] %vm465_vm2, %v2937_v21  ;;  %v4337_v21 = vld [vmem:[#allocation2 + $0x2e] sm:$0xff] }
 0x3ff   : > { %3342 = vrot.lane.b32.xlu0 %v7049_v45, %s5452_s23  ;;  %3340 = vrot.lane.b32.xlu1 %v7051_v46, %s5452_s23 }
 0x401   : > { %v2943_v61 = vpop.permute.xlu0 %2942  ;;  %v2941_v9 = vpop.permute.xlu1 %2940 }
 0x402   : > { %3027 = vst.msk [vmem:[#allocation3 + $0xb8] sm:$0xff] %vm465_vm2, %v2943_v61  ;;  %3026 = vst.msk [vmem:[#allocation3 + $0xb0] sm:$0xff] %vm465_vm2, %v2941_v9 }
 0x403   : > { %3346 = vrot.lane.b32.xlu0 %v7057_v49, %s5452_s23  ;;  %3344 = vrot.lane.b32.xlu1 %v7059_v50, %s5452_s23 }
 0x405   : > { %v2947_v51 = vpop.permute.xlu0 %2946  ;;  %v2945_v52 = vpop.permute.xlu1 %2944 }
 0x406   : > { %3029 = vst.msk [vmem:[#allocation3 + $0xc8] sm:$0xff] %vm465_vm2, %v2947_v51  ;;  %3028 = vst.msk [vmem:[#allocation3 + $0xc0] sm:$0xff] %vm465_vm2, %v2945_v52  ;;  %v3907_v51 = vld [vmem:[#allocation2 + $0x3c] sm:$0xff]  ;;  %v3906_v52 = vld [vmem:[#allocation2 + $0x34] sm:$0xff] }
 0x407   : > { %3350 = vrot.lane.b32.xlu0 %v7065_v14, %s5452_s23  ;;  %3348 = vrot.lane.b32.xlu1 %v7067_v25, %s5452_s23 }
 0x409   : > { %v2951_v24 = vpop.permute.xlu0 %2950  ;;  %v2949_v55 = vpop.permute.xlu1 %2948 }
 0x40a   : > { %3031 = vst.msk [vmem:[#allocation3 + $0xd8] sm:$0xff] %vm465_vm2, %v2951_v24  ;;  %3030 = vst.msk [vmem:[#allocation3 + $0xd0] sm:$0xff] %vm465_vm2, %v2949_v55 }
 0x40b   : > { %3354 = vrot.lane.b32.xlu0 %v7073_v26, %s5452_s23  ;;  %3352 = vrot.lane.b32.xlu1 %v7075_v13, %s5452_s23 }
 0x40d   : > { %v2955_v23 = vpop.permute.xlu0 %2954  ;;  %v2953_v56 = vpop.permute.xlu1 %2952 }
 0x40e   : > { %3033 = vst.msk [vmem:[#allocation3 + $0xe8] sm:$0xff] %vm465_vm2, %v2955_v23  ;;  %3032 = vst.msk [vmem:[#allocation3 + $0xe0] sm:$0xff] %vm465_vm2, %v2953_v56  ;;  %v3476_v23 = vld [vmem:[#allocation2 + $0x33] sm:$0xff] }
 0x40f   : > { %3358 = vrot.lane.b32.xlu0 %v7081_v4, %s5452_s23  ;;  %3356 = vrot.lane.b32.xlu1 %v7083_v27, %s5452_s23  ;;  %v4122_v56 = vld [vmem:[#allocation2 + $0x35] sm:$0xff] }
 0x411   : > { %v2959_v59 = vpop.permute.xlu0 %2958  ;;  %v2957_v60 = vpop.permute.xlu1 %2956 }
 0x412   : > { %3035 = vst.msk [vmem:[#allocation3 + $0xf8] sm:$0xff] %vm465_vm2, %v2959_v59  ;;  %3034 = vst.msk [vmem:[#allocation3 + $0xf0] sm:$0xff] %vm465_vm2, %v2957_v60 }
 0x413   : > { %3362 = vrot.lane.b32.xlu0 %v7089_v28, %s5452_s23  ;;  %3360 = vrot.lane.b32.xlu1 %v7091_v3, %s5452_s23  ;;  %v3289_v28 = vld [vmem:[#allocation2 + $0x11a] sm:$0xff] }
 0x415   : > { %v2963_v12 = vpop.permute.xlu0 %2962  ;;  %v2961_v2 = vpop.permute.xlu1 %2960 }
 0x416   : > { %3037 = vst.msk [vmem:[#allocation3 + $0x108] sm:$0xff] %vm465_vm2, %v2963_v12  ;;  %3036 = vst.msk [vmem:[#allocation3 + $0x100] sm:$0xff] %vm465_vm2, %v2961_v2  ;;  %v4338_v12 = vld [vmem:[#allocation2 + $0x36] sm:$0xff] }
 0x417   : > { %3366 = vrot.lane.b32.xlu0 %v7097_v54, %s5452_s23  ;;  %3364 = vrot.lane.b32.xlu1 %v7099_v29, %s5452_s23  ;;  %v3291_v29 = vld [vmem:[#allocation2 + $0x12a] sm:$0x3f]  ;;  %v4123_v2 = vld [vmem:[#allocation2 + $0x3d] sm:$0xff] }
 0x419   : > { %v2967_v63 = vpop.permute.xlu0 %2966  ;;  %v2965_v11 = vpop.permute.xlu1 %2964 }
 0x41a   : > { %3039 = vst.msk [vmem:[#allocation3 + $0x118] sm:$0x3f] %vm501_vm3, %v2967_v63 }
 0x41b   : > { %3038 = vst.msk [vmem:[#allocation3 + $0x110] sm:$0xff] %vm465_vm2, %v2965_v11  ;;  %3370 = vrot.lane.b32.xlu0 %v7105_v16, %s5452_s23  ;;  %3368 = vrot.lane.b32.xlu1 %v7107_v30, %s5452_s23  ;;  %v3290_v16 = vld [vmem:[#allocation2 + $0x122] sm:$0xff]  ;;  %vm7867_vm2 = vcmask 294144  }
 0x41c   : > { %vm7868_vm3 = vmmov %vm7867_vm2 }
 0x41d   : > { %v3115_v0 = vpop.permute.xlu0 %3114  ;;  %v3113_v1 = vpop.permute.xlu1 %3112  ;;  %vm7873_vm11 = vmmov %vm7867_vm2 }
 0x41e   : > { %3221 = vst.msk [vmem:[#allocation3 + $0x8] sm:$0xff] %vm683_vm4, %v3115_v0  ;;  %3220 = vst.msk [vmem:[#allocation3] sm:$0xff] %vm683_vm4, %v3113_v1  ;;  %v3477_v0 = vld [vmem:[#allocation2 + $0x3b] sm:$0xff] }
 0x41f   : > { %3374 = vrot.lane.b32.xlu0 %v7115_v31, %s5452_s23  ;;  %3372 = vrot.lane.b32.xlu1 %v7117_v32, %s5452_s23  ;;  %v3472_v31 = vld [vmem:[#allocation2 + $0x13] sm:$0xff] }
 0x421   : > { %v3119_v45 = vpop.permute.xlu0 %3118  ;;  %v3117_v46 = vpop.permute.xlu1 %3116 }
 0x422   : > { %3223 = vst.msk [vmem:[#allocation3 + $0x18] sm:$0xff] %vm683_vm4, %v3119_v45  ;;  %3222 = vst.msk [vmem:[#allocation3 + $0x10] sm:$0xff] %vm683_vm4, %v3117_v46  ;;  %v4339_v46 = vld [vmem:[#allocation2 + $0x3e] sm:$0xff] }
 0x423   : > { %3378 = vrot.lane.b32.xlu0 %v7125_v34, %s5452_s23  ;;  %3376 = vrot.lane.b32.xlu1 %v7127_v5, %s5452_s23  ;;  %v3474_v34 = vld [vmem:[#allocation2 + $0x23] sm:$0xff] }
 0x425   : > { %v3123_v49 = vpop.permute.xlu0 %3122  ;;  %v3121_v50 = vpop.permute.xlu1 %3120 }
 0x426   : > { %3225 = vst.msk [vmem:[#allocation3 + $0x28] sm:$0xff] %vm683_vm4, %v3123_v49  ;;  %3224 = vst.msk [vmem:[#allocation3 + $0x20] sm:$0xff] %vm683_vm4, %v3121_v50 }
 0x427   : > { %3382 = vrot.lane.b32.xlu0 %v7135_v36, %s5452_s23  ;;  %3380 = vrot.lane.b32.xlu1 %v7137_v17, %s5452_s23  ;;  %v3689_v36 = vld [vmem:[#allocation2 + $0x1c] sm:$0xff] }
 0x428   : > { %v4588_v17 = vld [vmem:[%s7860_s3] sm:$0xff] }
 0x429   : > { %v3127_v14 = vpop.permute.xlu0 %3126  ;;  %v3125_v25 = vpop.permute.xlu1 %3124  ;;  %v5413_v37 = vpack.c.bf16 %v4589_v58, %v4588_v17  ;;  %v4126_v17 = vld [vmem:[#allocation2 + $0x55] sm:$0xff] }
 0x42a   : > { %3227 = vst.msk [vmem:[#allocation3 + $0x38] sm:$0xff] %vm683_vm4, %v3127_v14  ;;  %3226 = vst.msk [vmem:[#allocation3 + $0x30] sm:$0xff] %vm683_vm4, %v3125_v25  ;;  %v3909_v14 = vld [vmem:[#allocation2 + $0x4c] sm:$0xff]  ;;  %v3908_v25 = vld [vmem:[#allocation2 + $0x44] sm:$0xff] }
 0x42b   : > { %3386 = vrot.lane.b32.xlu0 %v7145_v38, %s5452_s23  ;;  %3384 = vrot.lane.b32.xlu1 %v7147_v57, %s5452_s23 }
 0x42c   : > { %5414 = vmatprep.subr.bf16.mxu1 %v5413_v37 }
 0x42d   : > { %v3131_v26 = vpop.permute.xlu0 %3130  ;;  %v3129_v13 = vpop.permute.xlu1 %3128  ;;  %5416 = vmatpush3.bf16.msra.mxu1 %v5413_v37 }
 0x42e   : > { %3229 = vst.msk [vmem:[#allocation3 + $0x48] sm:$0xff] %vm683_vm4, %v3131_v26  ;;  %3228 = vst.msk [vmem:[#allocation3 + $0x40] sm:$0xff] %vm683_vm4, %v3129_v13 }
 0x42f   : > { %3390 = vrot.lane.b32.xlu0 %v7155_v20, %s5452_s23  ;;  %3388 = vrot.lane.b32.xlu1 %v7157_v40, %s5452_s23  ;;  %v4590_v20 = vld [vmem:[%s7860_s3 + $0x10] sm:$0xff]  ;;  %v4591_v40 = vld [vmem:[%s7860_s3 + $0x18] sm:$0xff] }
 0x430   : > { %v5417_v7 = vpack.c.bf16 %v4591_v40, %v4590_v20  ;;  %v3481_v20 = vld [vmem:[#allocation2 + $0x5b] sm:$0xff] }
 0x431   : > { %v3135_v4 = vpop.permute.xlu0 %3134  ;;  %v3133_v27 = vpop.permute.xlu1 %3132 }
 0x432   : > { %3231 = vst.msk [vmem:[#allocation3 + $0x58] sm:$0xff] %vm683_vm4, %v3135_v4  ;;  %3230 = vst.msk [vmem:[#allocation3 + $0x50] sm:$0xff] %vm683_vm4, %v3133_v27  ;;  %5418 = vmatprep.subr.bf16.mxu1 %v5417_v7  ;;  %v3478_v4 = vld [vmem:[#allocation2 + $0x43] sm:$0xff] }
 0x433   : > { %3394 = vrot.lane.b32.xlu0 %v3289_v28, %s5452_s23  ;;  %3392 = vrot.lane.b32.xlu1 %v7165_v42, %s5452_s23  ;;  %v4336_v42 = vld [vmem:[#allocation2 + $0x26] sm:$0xff] }
 0x434   : > { %5420 = vmatpush3.bf16.msra.mxu1 %v5417_v7  ;;  %v4124_v27 = vld [vmem:[#allocation2 + $0x45] sm:$0xff] }
 0x435   : > { %v3139_v3 = vpop.permute.xlu0 %3138  ;;  %v3137_v54 = vpop.permute.xlu1 %3136  ;;  %5349 = vmatprep.subr.msk.mxu1 %vm2179_vm13, %v4592_v44 }
 0x436   : > { %3233 = vst.msk [vmem:[#allocation3 + $0x68] sm:$0xff] %vm683_vm4, %v3139_v3  ;;  %3232 = vst.msk [vmem:[#allocation3 + $0x60] sm:$0xff] %vm683_vm4, %v3137_v54  ;;  %v4340_v54 = vld [vmem:[#allocation2 + $0x46] sm:$0xff] }
 0x437   : > { %3398 = vrot.lane.b32.xlu0 %v3291_v29, %s5452_s23  ;;  %3396 = vrot.lane.b32.xlu1 %v3290_v16, %s5452_s23  ;;  %v4125_v29 = vld [vmem:[#allocation2 + $0x4d] sm:$0xff] }
 0x438   : > { %5350 = vmatpush3.msk.msra.mxu1 %vm2179_vm13, %v4592_v44  ;;  %v3912_v44 = vld [vmem:[#allocation2 + $0x64] sm:$0xff]  ;;  %vm7874_vm13 = vmmov %vm7867_vm2 }
 0x439   : > { %v3143_v30 = vpop.permute.xlu0 %3142  ;;  %v3141_v53 = vpop.permute.xlu1 %3140 }
 0x43a   : > { %3235 = vst.msk [vmem:[#allocation3 + $0x78] sm:$0xff] %vm683_vm4, %v3143_v30  ;;  %3234 = vst.msk [vmem:[#allocation3 + $0x70] sm:$0xff] %vm683_vm4, %v3141_v53  ;;  %v3479_v53 = vld [vmem:[#allocation2 + $0x4b] sm:$0xff] }
 0x43b   : > { %3546 = vrot.lane.b32.xlu0 %v3473_v15, %s5453_s24  ;;  %3544 = vrot.lane.b32.xlu1 %v3472_v31, %s5453_s24 }
 0x43d   : > { %v3147_v32 = vpop.permute.xlu0 %3146  ;;  %v3145_v6 = vpop.permute.xlu1 %3144 }
 0x43e   : > { %3237 = vst.msk [vmem:[#allocation3 + $0x88] sm:$0xff] %vm683_vm4, %v3147_v32  ;;  %3236 = vst.msk [vmem:[#allocation3 + $0x80] sm:$0xff] %vm683_vm4, %v3145_v6  ;;  %v4341_v32 = vld [vmem:[#allocation2 + $0x4e] sm:$0xff] }
 0x43f   : > { %3760 = vrot.lane.b32.xlu0 %v3688_v33, %s5454_s25  ;;  %3548 = vrot.lane.b32.xlu1 %v3474_v34, %s5453_s24  ;;  %v3911_v34 = vld [vmem:[#allocation2 + $0x5c] sm:$0xff] }
 0x441   : > { %v3151_v5 = vpop.permute.xlu0 %3150  ;;  %v3149_v18 = vpop.permute.xlu1 %3148 }
 0x442   : > { %3239 = vst.msk [vmem:[#allocation3 + $0x98] sm:$0xff] %vm683_vm4, %v3151_v5  ;;  %3238 = vst.msk [vmem:[#allocation3 + $0x90] sm:$0xff] %vm683_vm4, %v3149_v18  ;;  %v3910_v5 = vld [vmem:[#allocation2 + $0x54] sm:$0xff] }
 0x443   : > { %3976 = vrot.lane.b32.xlu0 %v3904_v35, %s5455_s26  ;;  %3762 = vrot.lane.b32.xlu1 %v3689_v36, %s5454_s25  ;;  %v3480_v36 = vld [vmem:[#allocation2 + $0x53] sm:$0xff] }
 0x445   : > { %v3155_v38 = vpop.permute.xlu0 %3154  ;;  %v3153_v57 = vpop.permute.xlu1 %3152 }
 0x446   : > { %3241 = vst.msk [vmem:[#allocation3 + $0xa8] sm:$0xff] %vm683_vm4, %v3155_v38  ;;  %3240 = vst.msk [vmem:[#allocation3 + $0xa0] sm:$0xff] %vm683_vm4, %v3153_v57  ;;  %v4342_v38 = vld [vmem:[#allocation2 + $0x56] sm:$0xff] }
 0x447   : > { %4192 = vrot.lane.b32.xlu0 %v4120_v8, %s5456_s27  ;;  %3978 = vrot.lane.b32.xlu1 %v3905_v39, %s5455_s26  ;;  %v4127_v57 = vld [vmem:[#allocation2 + $0x5d] sm:$0xff] }
 0x449   : > { %v3159_v19 = vpop.permute.xlu0 %3158  ;;  %v3157_v41 = vpop.permute.xlu1 %3156 }
 0x44a   : > { %3243 = vst.msk [vmem:[#allocation3 + $0xb8] sm:$0xff] %vm683_vm4, %v3159_v19  ;;  %3242 = vst.msk [vmem:[#allocation3 + $0xb0] sm:$0xff] %vm683_vm4, %v3157_v41  ;;  %v4343_v19 = vld [vmem:[#allocation2 + $0x5e] sm:$0xff] }
 0x44b   : > { %4408 = vrot.lane.b32.xlu0 %v4336_v42, %s5457_s12  ;;  %4194 = vrot.lane.b32.xlu1 %v4121_v43, %s5456_s27  ;;  %v3913_v43 = vld [vmem:[#allocation2 + $0x6c] sm:$0xff] }
 0x44d   : > { %v3163_v62 = vpop.permute.xlu0 %3162  ;;  %v3161_v47 = vpop.permute.xlu1 %3160 }
 0x44e   : > { %3245 = vst.msk [vmem:[#allocation3 + $0xc8] sm:$0xff] %vm683_vm4, %v3163_v62  ;;  %3244 = vst.msk [vmem:[#allocation3 + $0xc0] sm:$0xff] %vm683_vm4, %v3161_v47 }
 0x44f   : > { %3764 = vrot.lane.b32.xlu0 %v3904_v35, %s5454_s25  ;;  %3550 = vrot.lane.b32.xlu1 %v3475_v22, %s5453_s24  ;;  %v3482_v22 = vld [vmem:[#allocation2 + $0x63] sm:$0xff] }
 0x451   : > { %v3167_v10 = vpop.permute.xlu0 %3166  ;;  %v3165_v48 = vpop.permute.xlu1 %3164 }
 0x452   : > { %3247 = vst.msk [vmem:[#allocation3 + $0xd8] sm:$0xff] %vm683_vm4, %v3167_v10  ;;  %3246 = vst.msk [vmem:[#allocation3 + $0xd0] sm:$0xff] %vm683_vm4, %v3165_v48  ;;  %v4128_v10 = vld [vmem:[#allocation2 + $0x65] sm:$0xff] }
 0x453   : > { %3766 = vrot.lane.b32.xlu0 %v3905_v39, %s5454_s25  ;;  %4410 = vrot.lane.b32.xlu1 %v4337_v21, %s5457_s12 }
 0x455   : > { %v3171_v61 = vpop.permute.xlu0 %3170  ;;  %v3169_v9 = vpop.permute.xlu1 %3168 }
 0x456   : > { %3249 = vst.msk [vmem:[#allocation3 + $0xe8] sm:$0xff] %vm683_vm4, %v3171_v61  ;;  %3248 = vst.msk [vmem:[#allocation3 + $0xe0] sm:$0xff] %vm683_vm4, %v3169_v9  ;;  %v4344_v61 = vld [vmem:[#allocation2 + $0x66] sm:$0xff] }
 0x457   : > { %3982 = vrot.lane.b32.xlu0 %v3907_v51, %s5455_s26  ;;  %3980 = vrot.lane.b32.xlu1 %v3906_v52, %s5455_s26  ;;  %v4129_v9 = vld [vmem:[#allocation2 + $0x6d] sm:$0xff] }
 0x459   : > { %v3175_v24 = vpop.permute.xlu0 %3174  ;;  %v3173_v55 = vpop.permute.xlu1 %3172 }
 0x45a   : > { %3251 = vst.msk [vmem:[#allocation3 + $0xf8] sm:$0xff] %vm683_vm4, %v3175_v24  ;;  %3250 = vst.msk [vmem:[#allocation3 + $0xf0] sm:$0xff] %vm683_vm4, %v3173_v55  ;;  %v3483_v24 = vld [vmem:[#allocation2 + $0x6b] sm:$0xff] }
 0x45b   : > { %3552 = vrot.lane.b32.xlu0 %v3476_v23, %s5453_s24  ;;  %4196 = vrot.lane.b32.xlu1 %v4122_v56, %s5456_s27  ;;  %v4345_v56 = vld [vmem:[#allocation2 + $0x6e] sm:$0xff] }
 0x45d   : > { %v3179_v59 = vpop.permute.xlu0 %3178  ;;  %v3177_v60 = vpop.permute.xlu1 %3176 }
 0x45e   : > { %3253 = vst.msk [vmem:[#allocation3 + $0x108] sm:$0xff] %vm683_vm4, %v3179_v59  ;;  %3252 = vst.msk [vmem:[#allocation3 + $0x100] sm:$0xff] %vm683_vm4, %v3177_v60 }
 0x45f   : > { %4412 = vrot.lane.b32.xlu0 %v4338_v12, %s5457_s12  ;;  %4198 = vrot.lane.b32.xlu1 %v4123_v2, %s5456_s27  ;;  %v3915_v12 = vld [vmem:[#allocation2 + $0x7c] sm:$0xff]  ;;  %v3914_v2 = vld [vmem:[#allocation2 + $0x74] sm:$0xff] }
 0x461   : > { %v3183_v63 = vpop.permute.xlu0 %3182  ;;  %v3181_v11 = vpop.permute.xlu1 %3180 }
 0x462   : > { %3255 = vst.msk [vmem:[#allocation3 + $0x118] sm:$0x3f] %vm719_vm5, %v3183_v63  ;;  %vm7870_vm5 = vmmov %vm7867_vm2 }
 0x463   : > { %3254 = vst.msk [vmem:[#allocation3 + $0x110] sm:$0xff] %vm683_vm4, %v3181_v11  ;;  %3768 = vrot.lane.b32.xlu0 %v3906_v52, %s5454_s25  ;;  %3554 = vrot.lane.b32.xlu1 %v3477_v0, %s5453_s24  ;;  %v3484_v0 = vld [vmem:[#allocation2 + $0x73] sm:$0xff]  ;;  %vm7869_vm4 = vmmov %vm7867_vm2 }
 0x465   : > { %v3331_v1 = vpop.permute.xlu0 %3330  ;;  %v3329_v45 = vpop.permute.xlu1 %3328 }
 0x466   : > { %3437 = vst.msk [vmem:[#allocation3 + $0x8] sm:$0xff] %vm901_vm6, %v3331_v1  ;;  %3436 = vst.msk [vmem:[#allocation3] sm:$0xff] %vm901_vm6, %v3329_v45  ;;  %v4130_v1 = vld [vmem:[#allocation2 + $0x75] sm:$0xff] }
 0x467   : > { %3770 = vrot.lane.b32.xlu0 %v3907_v51, %s5454_s25  ;;  %4414 = vrot.lane.b32.xlu1 %v4339_v46, %s5457_s12 }
 0x469   : > { %v3335_v49 = vpop.permute.xlu0 %3334  ;;  %v3333_v50 = vpop.permute.xlu1 %3332 }
 0x46a   : > { %3439 = vst.msk [vmem:[#allocation3 + $0x18] sm:$0xff] %vm901_vm6, %v3335_v49  ;;  %3438 = vst.msk [vmem:[#allocation3 + $0x10] sm:$0xff] %vm901_vm6, %v3333_v50  ;;  %v4346_v49 = vld [vmem:[#allocation2 + $0x76] sm:$0xff] }
 0x46b   : > { %3986 = vrot.lane.b32.xlu0 %v3909_v14, %s5455_s26  ;;  %3984 = vrot.lane.b32.xlu1 %v3908_v25, %s5455_s26  ;;  %v4131_v50 = vld [vmem:[#allocation2 + $0x7d] sm:$0xff] }
 0x46d   : > { %v3339_v26 = vpop.permute.xlu0 %3338  ;;  %v3337_v13 = vpop.permute.xlu1 %3336 }
 0x46e   : > { %3441 = vst.msk [vmem:[#allocation3 + $0x28] sm:$0xff] %vm901_vm6, %v3339_v26  ;;  %3440 = vst.msk [vmem:[#allocation3 + $0x20] sm:$0xff] %vm901_vm6, %v3337_v13  ;;  %v3485_v26 = vld [vmem:[#allocation2 + $0x7b] sm:$0xff] }
 0x46f   : > { %3556 = vrot.lane.b32.xlu0 %v3478_v4, %s5453_s24  ;;  %4200 = vrot.lane.b32.xlu1 %v4124_v27, %s5456_s27  ;;  %v4347_v27 = vld [vmem:[#allocation2 + $0x7e] sm:$0xff] }
 0x471   : > { %v3343_v28 = vpop.permute.xlu0 %3342  ;;  %v3341_v3 = vpop.permute.xlu1 %3340 }
 0x472   : > { %3443 = vst.msk [vmem:[#allocation3 + $0x38] sm:$0xff] %vm901_vm6, %v3343_v28  ;;  %3442 = vst.msk [vmem:[#allocation3 + $0x30] sm:$0xff] %vm901_vm6, %v3341_v3 }
 0x473   : > { %4416 = vrot.lane.b32.xlu0 %v4340_v54, %s5457_s12  ;;  %4202 = vrot.lane.b32.xlu1 %v4125_v29, %s5456_s27  ;;  %v3917_v54 = vld [vmem:[#allocation2 + $0x8c] sm:$0xff]  ;;  %v3916_v29 = vld [vmem:[#allocation2 + $0x84] sm:$0xff] }
 0x475   : > { %v3347_v16 = vpop.permute.xlu0 %3346  ;;  %v3345_v30 = vpop.permute.xlu1 %3344 }
 0x476   : > { %3445 = vst.msk [vmem:[#allocation3 + $0x48] sm:$0xff] %vm901_vm6, %v3347_v16  ;;  %3444 = vst.msk [vmem:[#allocation3 + $0x40] sm:$0xff] %vm901_vm6, %v3345_v30 }
 0x477   : > { %3772 = vrot.lane.b32.xlu0 %v3908_v25, %s5454_s25  ;;  %3558 = vrot.lane.b32.xlu1 %v3479_v53, %s5453_s24  ;;  %v3486_v53 = vld [vmem:[#allocation2 + $0x83] sm:$0xff] }
 0x479   : > { %v3351_v15 = vpop.permute.xlu0 %3350  ;;  %v3349_v31 = vpop.permute.xlu1 %3348 }
 0x47a   : > { %3447 = vst.msk [vmem:[#allocation3 + $0x58] sm:$0xff] %vm901_vm6, %v3351_v15  ;;  %3446 = vst.msk [vmem:[#allocation3 + $0x50] sm:$0xff] %vm901_vm6, %v3349_v31  ;;  %v4132_v15 = vld [vmem:[#allocation2 + $0x85] sm:$0xff] }
 0x47b   : > { %3774 = vrot.lane.b32.xlu0 %v3909_v14, %s5454_s25  ;;  %4418 = vrot.lane.b32.xlu1 %v4341_v32, %s5457_s12 }
 0x47d   : > { %v3355_v6 = vpop.permute.xlu0 %3354  ;;  %v3353_v33 = vpop.permute.xlu1 %3352 }
 0x47e   : > { %3449 = vst.msk [vmem:[#allocation3 + $0x68] sm:$0xff] %vm901_vm6, %v3355_v6  ;;  %3448 = vst.msk [vmem:[#allocation3 + $0x60] sm:$0xff] %vm901_vm6, %v3353_v33  ;;  %v4348_v6 = vld [vmem:[#allocation2 + $0x86] sm:$0xff] }
 0x47f   : > { %3990 = vrot.lane.b32.xlu0 %v3911_v34, %s5455_s26  ;;  %3988 = vrot.lane.b32.xlu1 %v3910_v5, %s5455_s26  ;;  %v4133_v33 = vld [vmem:[#allocation2 + $0x8d] sm:$0xff] }
 0x481   : > { %v3359_v18 = vpop.permute.xlu0 %3358  ;;  %v3357_v35 = vpop.permute.xlu1 %3356 }
 0x482   : > { %3451 = vst.msk [vmem:[#allocation3 + $0x78] sm:$0xff] %vm901_vm6, %v3359_v18  ;;  %3450 = vst.msk [vmem:[#allocation3 + $0x70] sm:$0xff] %vm901_vm6, %v3357_v35  ;;  %v3487_v35 = vld [vmem:[#allocation2 + $0x8b] sm:$0xff] }
 0x483   : > { %3560 = vrot.lane.b32.xlu0 %v3480_v36, %s5453_s24  ;;  %4204 = vrot.lane.b32.xlu1 %v4126_v17, %s5456_s27 }
 0x485   : > { %v3363_v58 = vpop.permute.xlu0 %3362  ;;  %v3361_v37 = vpop.permute.xlu1 %3360 }
 0x486   : > { %3453 = vst.msk [vmem:[#allocation3 + $0x88] sm:$0xff] %vm901_vm6, %v3363_v58  ;;  %3452 = vst.msk [vmem:[#allocation3 + $0x80] sm:$0xff] %vm901_vm6, %v3361_v37  ;;  %v4349_v58 = vld [vmem:[#allocation2 + $0x8e] sm:$0xff] }
 0x487   : > { %4420 = vrot.lane.b32.xlu0 %v4342_v38, %s5457_s12  ;;  %4206 = vrot.lane.b32.xlu1 %v4127_v57, %s5456_s27 }
 0x489   : > { %v3367_v8 = vpop.permute.xlu0 %3366  ;;  %v3365_v39 = vpop.permute.xlu1 %3364 }
 0x48a   : > { %3455 = vst.msk [vmem:[#allocation3 + $0x98] sm:$0xff] %vm901_vm6, %v3367_v8  ;;  %3454 = vst.msk [vmem:[#allocation3 + $0x90] sm:$0xff] %vm901_vm6, %v3365_v39  ;;  %v3919_v8 = vld [vmem:[#allocation2 + $0x9c] sm:$0xff]  ;;  %v3918_v39 = vld [vmem:[#allocation2 + $0x94] sm:$0xff] }
 0x48b   : > { %3776 = vrot.lane.b32.xlu0 %v3910_v5, %s5454_s25  ;;  %3562 = vrot.lane.b32.xlu1 %v3481_v20, %s5453_s24 }
 0x48d   : > { %v3371_v40 = vpop.permute.xlu0 %3370  ;;  %v3369_v7 = vpop.permute.xlu1 %3368 }
 0x48e   : > { %3457 = vst.msk [vmem:[#allocation3 + $0xa8] sm:$0xff] %vm901_vm6, %v3371_v40  ;;  %3456 = vst.msk [vmem:[#allocation3 + $0xa0] sm:$0xff] %vm901_vm6, %v3369_v7  ;;  %v3488_v7 = vld [vmem:[#allocation2 + $0x93] sm:$0xff] }
 0x48f   : > { %3778 = vrot.lane.b32.xlu0 %v3911_v34, %s5454_s25  ;;  %4422 = vrot.lane.b32.xlu1 %v4343_v19, %s5457_s12  ;;  %v4134_v19 = vld [vmem:[#allocation2 + $0x95] sm:$0xff] }
 0x491   : > { %v3375_v41 = vpop.permute.xlu0 %3374  ;;  %v3373_v42 = vpop.permute.xlu1 %3372 }
 0x492   : > { %3459 = vst.msk [vmem:[#allocation3 + $0xb8] sm:$0xff] %vm901_vm6, %v3375_v41  ;;  %3458 = vst.msk [vmem:[#allocation3 + $0xb0] sm:$0xff] %vm901_vm6, %v3373_v42 }
 0x493   : > { %3994 = vrot.lane.b32.xlu0 %v3913_v43, %s5455_s26  ;;  %3992 = vrot.lane.b32.xlu1 %v3912_v44, %s5455_s26 }
 0x495   : > { %v3379_v62 = vpop.permute.xlu0 %3378  ;;  %v3377_v47 = vpop.permute.xlu1 %3376 }
 0x496   : > { %3461 = vst.msk [vmem:[#allocation3 + $0xc8] sm:$0xff] %vm901_vm6, %v3379_v62  ;;  %3460 = vst.msk [vmem:[#allocation3 + $0xc0] sm:$0xff] %vm901_vm6, %v3377_v47 }
 0x497   : > { %3564 = vrot.lane.b32.xlu0 %v3482_v22, %s5453_s24  ;;  %4208 = vrot.lane.b32.xlu1 %v4128_v10, %s5456_s27  ;;  %v3489_v10 = vld [vmem:[#allocation2 + $0x9b] sm:$0xff] }
 0x499   : > { %v3383_v48 = vpop.permute.xlu0 %3382  ;;  %v3381_v21 = vpop.permute.xlu1 %3380 }
 0x49a   : > { %3463 = vst.msk [vmem:[#allocation3 + $0xd8] sm:$0xff] %vm901_vm6, %v3383_v48  ;;  %3462 = vst.msk [vmem:[#allocation3 + $0xd0] sm:$0xff] %vm901_vm6, %v3381_v21 }
 0x49b   : > { %4424 = vrot.lane.b32.xlu0 %v4344_v61, %s5457_s12  ;;  %4210 = vrot.lane.b32.xlu1 %v4129_v9, %s5456_s27  ;;  %v4351_v61 = vld [vmem:[#allocation2 + $0x9e] sm:$0xff] }
 0x49d   : > { %v3387_v51 = vpop.permute.xlu0 %3386  ;;  %v3385_v52 = vpop.permute.xlu1 %3384 }
 0x49e   : > { %3465 = vst.msk [vmem:[#allocation3 + $0xe8] sm:$0xff] %vm901_vm6, %v3387_v51  ;;  %3464 = vst.msk [vmem:[#allocation3 + $0xe0] sm:$0xff] %vm901_vm6, %v3385_v52 }
 0x49f   : > { %3780 = vrot.lane.b32.xlu0 %v3912_v44, %s5454_s25  ;;  %3566 = vrot.lane.b32.xlu1 %v3483_v24, %s5453_s24  ;;  %v4135_v44 = vld [vmem:[#allocation2 + $0x9d] sm:$0xff]  ;;  %v3921_v24 = vld [vmem:[#allocation2 + $0xac] sm:$0xff] }
 0x4a1   : > { %v3391_v55 = vpop.permute.xlu0 %3390  ;;  %v3389_v23 = vpop.permute.xlu1 %3388 }
 0x4a2   : > { %3467 = vst.msk [vmem:[#allocation3 + $0xf8] sm:$0xff] %vm901_vm6, %v3391_v55  ;;  %3466 = vst.msk [vmem:[#allocation3 + $0xf0] sm:$0xff] %vm901_vm6, %v3389_v23  ;;  %v3920_v55 = vld [vmem:[#allocation2 + $0xa4] sm:$0xff] }
 0x4a3   : > { %3782 = vrot.lane.b32.xlu0 %v3913_v43, %s5454_s25  ;;  %4426 = vrot.lane.b32.xlu1 %v4345_v56, %s5457_s12  ;;  %v4350_v43 = vld [vmem:[#allocation2 + $0x96] sm:$0xff] }
 0x4a5   : > { %v3395_v59 = vpop.permute.xlu0 %3394  ;;  %v3393_v60 = vpop.permute.xlu1 %3392 }
 0x4a6   : > { %3469 = vst.msk [vmem:[#allocation3 + $0x108] sm:$0xff] %vm901_vm6, %v3395_v59  ;;  %3468 = vst.msk [vmem:[#allocation3 + $0x100] sm:$0xff] %vm901_vm6, %v3393_v60  ;;  %v3490_v59 = vld [vmem:[#allocation2 + $0xa3] sm:$0xff] }
 0x4a7   : > { %3998 = vrot.lane.b32.xlu0 %v3915_v12, %s5455_s26  ;;  %3996 = vrot.lane.b32.xlu1 %v3914_v2, %s5455_s26  ;;  %v4136_v60 = vld [vmem:[#allocation2 + $0xa5] sm:$0xff] }
 0x4a9   : > { %v3399_v63 = vpop.permute.xlu0 %3398  ;;  %v3397_v11 = vpop.permute.xlu1 %3396 }
 0x4aa   : > { %3471 = vst.msk [vmem:[#allocation3 + $0x118] sm:$0x3f] %vm937_vm7, %v3399_v63  ;;  %v4352_v63 = vld [vmem:[#allocation2 + $0xa6] sm:$0xff]  ;;  %vm7872_vm7 = vmmov %vm7867_vm2 }
 0x4ab   : > { %3470 = vst.msk [vmem:[#allocation3 + $0x110] sm:$0xff] %vm901_vm6, %v3397_v11  ;;  %3568 = vrot.lane.b32.xlu0 %v3484_v0, %s5453_s24  ;;  %4212 = vrot.lane.b32.xlu1 %v4130_v1, %s5456_s27  ;;  %vm7871_vm6 = vmmov %vm7867_vm2  ;;  %v4137_v11 = vld [vmem:[#allocation2 + $0xad] sm:$0xff] }
 0x4ad   : > { %v3547_v45 = vpop.permute.xlu0 %3546  ;;  %v3545_v46 = vpop.permute.xlu1 %3544 }
 0x4ae   : > { %3653 = vst.msk [vmem:[#allocation3 + $0x8] sm:$0xff] %vm1119_vm8, %v3547_v45  ;;  %3652 = vst.msk [vmem:[#allocation3] sm:$0xff] %vm1119_vm8, %v3545_v46  ;;  %v3491_v46 = vld [vmem:[#allocation2 + $0xab] sm:$0xff] }
 0x4af   : > { %4428 = vrot.lane.b32.xlu0 %v4346_v49, %s5457_s12  ;;  %4214 = vrot.lane.b32.xlu1 %v4131_v50, %s5456_s27 }
 0x4b1   : > { %v3761_v14 = vpop.permute.xlu0 %3760  ;;  %v3549_v25 = vpop.permute.xlu1 %3548 }
 0x4b2   : > { %3868 = vst.msk [vmem:[#allocation3] sm:$0xff] %vm1337_vm10, %v3761_v14  ;;  %v4353_v14 = vld [vmem:[#allocation2 + $0xae] sm:$0xff] }
 0x4b3   : > { %3654 = vst.msk [vmem:[#allocation3 + $0x10] sm:$0xff] %vm1119_vm8, %v3549_v25  ;;  %3784 = vrot.lane.b32.xlu0 %v3914_v2, %s5454_s25  ;;  %3570 = vrot.lane.b32.xlu1 %v3485_v26, %s5453_s24 }
 0x4b5   : > { %v3977_v13 = vpop.permute.xlu0 %3976  ;;  %v3763_v4 = vpop.permute.xlu1 %3762 }
 0x4b6   : > { %4084 = vst.msk [vmem:[#allocation3] sm:$0xff] %vm1555_vm12, %v3977_v13 }
 0x4b7   : > { %3869 = vst.msk [vmem:[#allocation3 + $0x8] sm:$0xff] %vm1337_vm10, %v3763_v4  ;;  %3786 = vrot.lane.b32.xlu0 %v3915_v12, %s5454_s25  ;;  %4430 = vrot.lane.b32.xlu1 %v4347_v27, %s5457_s12  ;;  %v3923_v4 = vld [vmem:[#allocation2 + $0xbc] sm:$0xff]  ;;  %v3922_v27 = vld [vmem:[#allocation2 + $0xb4] sm:$0xff] }
 0x4b9   : > { %v4193_v28 = vpop.permute.xlu0 %4192  ;;  %v3979_v3 = vpop.permute.xlu1 %3978 }
 0x4ba   : > { %4300 = vst.msk [vmem:[#allocation3] sm:$0xff] %vm1773_vm15, %v4193_v28 }
 0x4bb   : > { %4085 = vst.msk [vmem:[#allocation3 + $0x8] sm:$0xff] %vm1555_vm12, %v3979_v3  ;;  %4002 = vrot.lane.b32.xlu0 %v3917_v54, %s5455_s26  ;;  %4000 = vrot.lane.b32.xlu1 %v3916_v29, %s5455_s26 }
 0x4bd   : > { %v4409_v16 = vpop.permute.xlu0 %4408  ;;  %v4195_v30 = vpop.permute.xlu1 %4194 }
 0x4be   : > { %4516 = vst.msk [vmem:[#allocation3] sm:$0xff] %vm7867_vm2, %v4409_v16 }
 0x4bf   : > { %4301 = vst.msk [vmem:[#allocation3 + $0x8] sm:$0xff] %vm1773_vm15, %v4195_v30  ;;  %3572 = vrot.lane.b32.xlu0 %v3486_v53, %s5453_s24  ;;  %4216 = vrot.lane.b32.xlu1 %v4132_v15, %s5456_s27  ;;  %v4354_v53 = vld [vmem:[#allocation2 + $0xb6] sm:$0xff] }
 0x4c0   : > { %v4139_v15 = vld [vmem:[#allocation2 + $0xbd] sm:$0xff] }
 0x4c1   : > { %v3765_v31 = vpop.permute.xlu0 %3764  ;;  %v3551_v32 = vpop.permute.xlu1 %3550 }
 0x4c2   : > { %3870 = vst.msk [vmem:[#allocation3 + $0x10] sm:$0xff] %vm1337_vm10, %v3765_v31 }
 0x4c3   : > { %3655 = vst.msk [vmem:[#allocation3 + $0x18] sm:$0xff] %vm1119_vm8, %v3551_v32  ;;  %4432 = vrot.lane.b32.xlu0 %v4348_v6, %s5457_s12  ;;  %4218 = vrot.lane.b32.xlu1 %v4133_v33, %s5456_s27  ;;  %v3493_v33 = vld [vmem:[#allocation2 + $0xbb] sm:$0xff] }
 0x4c5   : > { %v3767_v34 = vpop.permute.xlu0 %3766  ;;  %v4411_v5 = vpop.permute.xlu1 %4410  ;;  %v4552_v18 = vld [vmem:[#allocation3] sm:$0xff] }
 0x4c6   : > { %3871 = vst.msk [vmem:[#allocation3 + $0x18] sm:$0xff] %vm1337_vm10, %v3767_v34  ;;  %5351 = vmatprep.mubr.msk.f32.mxu1 %vm2070_vm14, %v4552_v18  ;;  %v4355_v18 = vld [vmem:[#allocation2 + $0xbe] sm:$0xff] }
 0x4c7   : > { %4517 = vst.msk [vmem:[#allocation3 + $0x8] sm:$0xff] %vm7868_vm3, %v4411_v5  ;;  %3788 = vrot.lane.b32.xlu0 %v3916_v29, %s5454_s25  ;;  %3574 = vrot.lane.b32.xlu1 %v3487_v35, %s5453_s24  ;;  %v4138_v29 = vld [vmem:[#allocation2 + $0xb5] sm:$0xff]  ;;  %vm7875_vm3 = vmmov %vm7867_vm2 }
 0x4c9   : > { %v3983_v36 = vpop.permute.xlu0 %3982  ;;  %v3981_v17 = vpop.permute.xlu1 %3980 }
 0x4ca   : > { %4087 = vst.msk [vmem:[#allocation3 + $0x18] sm:$0xff] %vm1555_vm12, %v3983_v36  ;;  %4086 = vst.msk [vmem:[#allocation3 + $0x10] sm:$0xff] %vm1555_vm12, %v3981_v17 }
 0x4cb   : > { %3790 = vrot.lane.b32.xlu0 %v3917_v54, %s5454_s25  ;;  %4434 = vrot.lane.b32.xlu1 %v4349_v58, %s5457_s12  ;;  %v3492_v54 = vld [vmem:[#allocation2 + $0xb3] sm:$0xff] }
 0x4cc   : > { %v3925_v58 = vld [vmem:[#allocation2 + $0xcc] sm:$0xff] }
 0x4cd   : > { %v3553_v37 = vpop.permute.xlu0 %3552  ;;  %v4197_v38 = vpop.permute.xlu1 %4196 }
 0x4ce   : > { %v4553_v57 = vld [vmem:[#allocation3 + $0x8] sm:$0xff]  ;;  %3656 = vst.msk [vmem:[#allocation3 + $0x20] sm:$0xff] %vm1119_vm8, %v3553_v37  ;;  %v3924_v37 = vld [vmem:[#allocation2 + $0xc4] sm:$0xff] }
 0x4cf   : > { %4302 = vst.msk [vmem:[#allocation3 + $0x10] sm:$0xff] %vm1773_vm15, %v4197_v38  ;;  %5352 = vmatmul.mubr.msk.f32.vlgmr.msra.gmra.mrb[0].mxu1 %vm2070_vm14, %v4553_v57  ;;  %4006 = vrot.lane.b32.xlu0 %v3919_v8, %s5455_s26 }
 0x4d0   : > { %4004 = vrot.lane.b32.xlu1 %v3918_v39, %s5455_s26 }
 0x4d1   : > { %v4413_v20 = vpop.permute.xlu0 %4412  ;;  %v4199_v40 = vpop.permute.xlu1 %4198 }
 0x4d2   : > { %4518 = vst.msk [vmem:[#allocation3 + $0x10] sm:$0xff] %vm7869_vm4, %v4413_v20  ;;  %vm7876_vm4 = vmmov %vm7867_vm2 }
 0x4d3   : > { %4303 = vst.msk [vmem:[#allocation3 + $0x18] sm:$0xff] %vm1773_vm15, %v4199_v40  ;;  %3576 = vrot.lane.b32.xlu0 %v3488_v7, %s5453_s24  ;;  %v4356_v7 = vld [vmem:[#allocation2 + $0xc6] sm:$0xff] }
 0x4d4   : > { %4220 = vrot.lane.b32.xlu1 %v4134_v19, %s5456_s27  ;;  %v4141_v19 = vld [vmem:[#allocation2 + $0xcd] sm:$0xff] }
 0x4d5   : > { %v3769_v41 = vpop.permute.xlu0 %3768  ;;  %v3555_v42 = vpop.permute.xlu1 %3554 }
 0x4d6   : > { %3872 = vst.msk [vmem:[#allocation3 + $0x20] sm:$0xff] %vm1337_vm10, %v3769_v41 }
 0x4d7   : > { %3657 = vst.msk [vmem:[#allocation3 + $0x28] sm:$0xff] %vm1119_vm8, %v3555_v42  ;;  %4436 = vrot.lane.b32.xlu0 %v4350_v43, %s5457_s12 }
 0x4d8   : > { %4222 = vrot.lane.b32.xlu1 %v4135_v44, %s5456_s27  ;;  %v3495_v44 = vld [vmem:[#allocation2 + $0xcb] sm:$0xff] }
 0x4d9   : > { %v3771_v62 = vpop.permute.xlu0 %3770  ;;  %v4415_v47 = vpop.permute.xlu1 %4414  ;;  %v4554_v22 = vld [vmem:[#allocation3 + $0x10] sm:$0xff] }
 0x4da   : > { %3873 = vst.msk [vmem:[#allocation3 + $0x28] sm:$0xff] %vm1337_vm10, %v3771_v62  ;;  %5354 = vmatprep.mubr.msk.f32.mxu1 %vm2070_vm14, %v4554_v22  ;;  %v4357_v22 = vld [vmem:[#allocation2 + $0xce] sm:$0xff] }
 0x4db   : > { %4519 = vst.msk [vmem:[#allocation3 + $0x18] sm:$0xff] %vm7870_vm5, %v4415_v47  ;;  %3792 = vrot.lane.b32.xlu0 %v3918_v39, %s5454_s25  ;;  %v4140_v39 = vld [vmem:[#allocation2 + $0xc5] sm:$0xff]  ;;  %vm7877_vm5 = vmmov %vm7867_vm2 }
 0x4dc   : > { %3578 = vrot.lane.b32.xlu1 %v3489_v10, %s5453_s24 }
 0x4dd   : > { %v3987_v48 = vpop.permute.xlu0 %3986  ;;  %v3985_v21 = vpop.permute.xlu1 %3984 }
 0x4de   : > { %4089 = vst.msk [vmem:[#allocation3 + $0x28] sm:$0xff] %vm1555_vm12, %v3987_v48  ;;  %4088 = vst.msk [vmem:[#allocation3 + $0x20] sm:$0xff] %vm1555_vm12, %v3985_v21 }
 0x4df   : > { %3794 = vrot.lane.b32.xlu0 %v3919_v8, %s5454_s25  ;;  %v3494_v8 = vld [vmem:[#allocation2 + $0xc3] sm:$0xff] }
 0x4e0   : > { %4438 = vrot.lane.b32.xlu1 %v4351_v61, %s5457_s12  ;;  %v3927_v61 = vld [vmem:[#allocation2 + $0xdc] sm:$0xff] }
 0x4e1   : > { %v3557_v9 = vpop.permute.xlu0 %3556  ;;  %v4201_v51 = vpop.permute.xlu1 %4200 }
 0x4e2   : > { %v4555_v52 = vld [vmem:[#allocation3 + $0x18] sm:$0xff]  ;;  %3658 = vst.msk [vmem:[#allocation3 + $0x30] sm:$0xff] %vm1119_vm8, %v3557_v9  ;;  %v3926_v9 = vld [vmem:[#allocation2 + $0xd4] sm:$0xff] }
 0x4e3   : > { %4304 = vst.msk [vmem:[#allocation3 + $0x20] sm:$0xff] %vm1773_vm15, %v4201_v51  ;;  %5355 = vmatmul.mubr.msk.f32.gmra.mrb[2].mxu1 %vm2070_vm14, %v4555_v52  ;;  %4010 = vrot.lane.b32.xlu0 %v3921_v24, %s5455_s26 }
 0x4e4   : > { %4008 = vrot.lane.b32.xlu1 %v3920_v55, %s5455_s26 }
 0x4e5   : > { %v4417_v23 = vpop.permute.xlu0 %4416  ;;  %v4203_v56 = vpop.permute.xlu1 %4202 }
 0x4e6   : > { %4520 = vst.msk [vmem:[#allocation3 + $0x20] sm:$0xff] %vm7871_vm6, %v4417_v23  ;;  %vm7878_vm6 = vmmov %vm7867_vm2 }
 0x4e7   : > { %4305 = vst.msk [vmem:[#allocation3 + $0x28] sm:$0xff] %vm1773_vm15, %v4203_v56  ;;  %3580 = vrot.lane.b32.xlu0 %v3490_v59, %s5453_s24  ;;  %v4358_v59 = vld [vmem:[#allocation2 + $0xd6] sm:$0xff] }
 0x4e8   : > { %4224 = vrot.lane.b32.xlu1 %v4136_v60, %s5456_s27  ;;  %v4143_v60 = vld [vmem:[#allocation2 + $0xdd] sm:$0xff] }
 0x4e9   : > { %v3773_v12 = vpop.permute.xlu0 %3772  ;;  %v3559_v2 = vpop.permute.xlu1 %3558 }
 0x4ea   : > { %3874 = vst.msk [vmem:[#allocation3 + $0x30] sm:$0xff] %vm1337_vm10, %v3773_v12 }
 0x4eb   : > { %3659 = vst.msk [vmem:[#allocation3 + $0x38] sm:$0xff] %vm1119_vm8, %v3559_v2  ;;  %4440 = vrot.lane.b32.xlu0 %v4352_v63, %s5457_s12 }
 0x4ec   : > { %4226 = vrot.lane.b32.xlu1 %v4137_v11, %s5456_s27  ;;  %v3497_v11 = vld [vmem:[#allocation2 + $0xdb] sm:$0xff] }
 0x4ed   : > { %v3775_v0 = vpop.permute.xlu0 %3774  ;;  %v4419_v1 = vpop.permute.xlu1 %4418  ;;  %v4556_v45 = vld [vmem:[#allocation3 + $0x20] sm:$0xff] }
 0x4ee   : > { %3875 = vst.msk [vmem:[#allocation3 + $0x38] sm:$0xff] %vm1337_vm10, %v3775_v0  ;;  %5357 = vmatprep.mubr.msk.f32.mxu1 %vm2070_vm14, %v4556_v45  ;;  %v4359_v45 = vld [vmem:[#allocation2 + $0xde] sm:$0xff] }
 0x4ef   : > { %4521 = vst.msk [vmem:[#allocation3 + $0x28] sm:$0xff] %vm7872_vm7, %v4419_v1  ;;  %3796 = vrot.lane.b32.xlu0 %v3920_v55, %s5454_s25  ;;  %v4142_v55 = vld [vmem:[#allocation2 + $0xd5] sm:$0xff]  ;;  %vm7879_vm7 = vmmov %vm7867_vm2 }
 0x4f0   : > { %3582 = vrot.lane.b32.xlu1 %v3491_v46, %s5453_s24 }
 0x4f1   : > { %v3991_v49 = vpop.permute.xlu0 %3990  ;;  %v3989_v50 = vpop.permute.xlu1 %3988 }
 0x4f2   : > { %4091 = vst.msk [vmem:[#allocation3 + $0x38] sm:$0xff] %vm1555_vm12, %v3991_v49  ;;  %4090 = vst.msk [vmem:[#allocation3 + $0x30] sm:$0xff] %vm1555_vm12, %v3989_v50 }
 0x4f3   : > { %3798 = vrot.lane.b32.xlu0 %v3921_v24, %s5454_s25  ;;  %v3496_v24 = vld [vmem:[#allocation2 + $0xd3] sm:$0xff] }
 0x4f4   : > { %4442 = vrot.lane.b32.xlu1 %v4353_v14, %s5457_s12  ;;  %v3929_v14 = vld [vmem:[#allocation2 + $0xec] sm:$0xff] }
 0x4f5   : > { %v3561_v25 = vpop.permute.xlu0 %3560  ;;  %v4205_v26 = vpop.permute.xlu1 %4204 }
 0x4f6   : > { %v4557_v13 = vld [vmem:[#allocation3 + $0x28] sm:$0xff]  ;;  %3660 = vst.msk [vmem:[#allocation3 + $0x40] sm:$0xff] %vm1119_vm8, %v3561_v25  ;;  %v3928_v25 = vld [vmem:[#allocation2 + $0xe4] sm:$0xff] }
 0x4f7   : > { %4306 = vst.msk [vmem:[#allocation3 + $0x30] sm:$0xff] %vm1773_vm15, %v4205_v26  ;;  %5358 = vmatmul.mubr.msk.f32.gmra.mrb[4].mxu1 %vm2070_vm14, %v4557_v13  ;;  %4014 = vrot.lane.b32.xlu0 %v3923_v4, %s5455_s26 }
 0x4f8   : > { %4012 = vrot.lane.b32.xlu1 %v3922_v27, %s5455_s26 }
 0x4f9   : > { %v4421_v28 = vpop.permute.xlu0 %4420  ;;  %v4207_v3 = vpop.permute.xlu1 %4206 }
 0x4fa   : > { %4522 = vst.msk [vmem:[#allocation3 + $0x30] sm:$0xff] %vm7873_vm11, %v4421_v28  ;;  %vm7880_vm11 = vmmov %vm7867_vm2 }
 0x4fb   : > { %4307 = vst.msk [vmem:[#allocation3 + $0x38] sm:$0xff] %vm1773_vm15, %v4207_v3  ;;  %3584 = vrot.lane.b32.xlu0 %v3492_v54, %s5453_s24  ;;  %v4360_v54 = vld [vmem:[#allocation2 + $0xe6] sm:$0xff] }
 0x4fc   : > { %4228 = vrot.lane.b32.xlu1 %v4138_v29, %s5456_s27  ;;  %v4145_v29 = vld [vmem:[#allocation2 + $0xed] sm:$0xff] }
 0x4fd   : > { %v3777_v16 = vpop.permute.xlu0 %3776  ;;  %v3563_v30 = vpop.permute.xlu1 %3562 }
 0x4fe   : > { %3876 = vst.msk [vmem:[#allocation3 + $0x40] sm:$0xff] %vm1337_vm10, %v3777_v16 }
 0x4ff   : > { %3661 = vst.msk [vmem:[#allocation3 + $0x48] sm:$0xff] %vm1119_vm8, %v3563_v30  ;;  %4444 = vrot.lane.b32.xlu0 %v4354_v53, %s5457_s12 }
 0x500   : > { %4230 = vrot.lane.b32.xlu1 %v4139_v15, %s5456_s27  ;;  %v3499_v15 = vld [vmem:[#allocation2 + $0xeb] sm:$0xff] }
 0x501   : > { %v3779_v31 = vpop.permute.xlu0 %3778  ;;  %v4423_v32 = vpop.permute.xlu1 %4422  ;;  %v4558_v6 = vld [vmem:[#allocation3 + $0x30] sm:$0xff] }
 0x502   : > { %3877 = vst.msk [vmem:[#allocation3 + $0x48] sm:$0xff] %vm1337_vm10, %v3779_v31  ;;  %5360 = vmatprep.mubr.msk.f32.mxu1 %vm2070_vm14, %v4558_v6  ;;  %v4361_v6 = vld [vmem:[#allocation2 + $0xee] sm:$0xff] }
 0x503   : > { %4523 = vst.msk [vmem:[#allocation3 + $0x38] sm:$0xff] %vm7874_vm13, %v4423_v32  ;;  %3800 = vrot.lane.b32.xlu0 %v3922_v27, %s5454_s25  ;;  %v4144_v27 = vld [vmem:[#allocation2 + $0xe5] sm:$0xff]  ;;  %vm7881_vm13 = vmmov %vm7867_vm2 }
 0x504   : > { %3586 = vrot.lane.b32.xlu1 %v3493_v33, %s5453_s24 }
 0x505   : > { %v3995_v34 = vpop.permute.xlu0 %3994  ;;  %v3993_v5 = vpop.permute.xlu1 %3992 }
 0x506   : > { %4093 = vst.msk [vmem:[#allocation3 + $0x48] sm:$0xff] %vm1555_vm12, %v3995_v34  ;;  %4092 = vst.msk [vmem:[#allocation3 + $0x40] sm:$0xff] %vm1555_vm12, %v3993_v5 }
 0x507   : > { %3802 = vrot.lane.b32.xlu0 %v3923_v4, %s5454_s25  ;;  %v3498_v4 = vld [vmem:[#allocation2 + $0xe3] sm:$0xff] }
 0x508   : > { %4446 = vrot.lane.b32.xlu1 %v4355_v18, %s5457_s12  ;;  %v3931_v18 = vld [vmem:[#allocation2 + $0xfc] sm:$0xff] }
 0x509   : > { %v3565_v35 = vpop.permute.xlu0 %3564  ;;  %v4209_v36 = vpop.permute.xlu1 %4208 }
 0x50a   : > { %v4559_v17 = vld [vmem:[#allocation3 + $0x38] sm:$0xff]  ;;  %3662 = vst.msk [vmem:[#allocation3 + $0x50] sm:$0xff] %vm1119_vm8, %v3565_v35  ;;  %v3930_v35 = vld [vmem:[#allocation2 + $0xf4] sm:$0xff] }
 0x50b   : > { %4308 = vst.msk [vmem:[#allocation3 + $0x40] sm:$0xff] %vm1773_vm15, %v4209_v36  ;;  %5361 = vmatmul.mubr.msk.f32.gmra.mrb[6].mxu1 %vm2070_vm14, %v4559_v17  ;;  %4018 = vrot.lane.b32.xlu0 %v3925_v58, %s5455_s26 }
 0x50c   : > { %4016 = vrot.lane.b32.xlu1 %v3924_v37, %s5455_s26 }
 0x50d   : > { %v4425_v38 = vpop.permute.xlu0 %4424  ;;  %v4211_v57 = vpop.permute.xlu1 %4210 }
 0x50e   : > { %4524 = vst.msk [vmem:[#allocation3 + $0x40] sm:$0xff] %vm7867_vm2, %v4425_v38 }
 0x50f   : > { %4309 = vst.msk [vmem:[#allocation3 + $0x48] sm:$0xff] %vm1773_vm15, %v4211_v57  ;;  %3588 = vrot.lane.b32.xlu0 %v3494_v8, %s5453_s24  ;;  %v4362_v8 = vld [vmem:[#allocation2 + $0xf6] sm:$0xff] }
 0x510   : > { %4232 = vrot.lane.b32.xlu1 %v4140_v39, %s5456_s27  ;;  %v4147_v39 = vld [vmem:[#allocation2 + $0xfd] sm:$0xff] }
 0x511   : > { %v3781_v20 = vpop.permute.xlu0 %3780  ;;  %v3567_v40 = vpop.permute.xlu1 %3566 }
 0x512   : > { %3878 = vst.msk [vmem:[#allocation3 + $0x50] sm:$0xff] %vm1337_vm10, %v3781_v20 }
 0x513   : > { %3663 = vst.msk [vmem:[#allocation3 + $0x58] sm:$0xff] %vm1119_vm8, %v3567_v40  ;;  %4448 = vrot.lane.b32.xlu0 %v4356_v7, %s5457_s12 }
 0x514   : > { %4234 = vrot.lane.b32.xlu1 %v4141_v19, %s5456_s27  ;;  %v3501_v19 = vld [vmem:[#allocation2 + $0xfb] sm:$0xff] }
 0x515   : > { %v3783_v41 = vpop.permute.xlu0 %3782  ;;  %v4427_v42 = vpop.permute.xlu1 %4426  ;;  %v4560_v43 = vld [vmem:[#allocation3 + $0x40] sm:$0xff] }
 0x516   : > { %3879 = vst.msk [vmem:[#allocation3 + $0x58] sm:$0xff] %vm1337_vm10, %v3783_v41  ;;  %5363 = vmatprep.mubr.msk.f32.mxu1 %vm2070_vm14, %v4560_v43  ;;  %v4363_v43 = vld [vmem:[#allocation2 + $0xfe] sm:$0xff] }
 0x517   : > { %4525 = vst.msk [vmem:[#allocation3 + $0x48] sm:$0xff] %vm7875_vm3, %v4427_v42  ;;  %3804 = vrot.lane.b32.xlu0 %v3924_v37, %s5454_s25  ;;  %v4146_v37 = vld [vmem:[#allocation2 + $0xf5] sm:$0xff]  ;;  %vm7882_vm3 = vmmov %vm7867_vm2 }
 0x518   : > { %3590 = vrot.lane.b32.xlu1 %v3495_v44, %s5453_s24 }
 0x519   : > { %v3999_v62 = vpop.permute.xlu0 %3998  ;;  %v3997_v47 = vpop.permute.xlu1 %3996 }
 0x51a   : > { %4095 = vst.msk [vmem:[#allocation3 + $0x58] sm:$0xff] %vm1555_vm12, %v3999_v62  ;;  %4094 = vst.msk [vmem:[#allocation3 + $0x50] sm:$0xff] %vm1555_vm12, %v3997_v47 }
 0x51b   : > { %3806 = vrot.lane.b32.xlu0 %v3925_v58, %s5454_s25  ;;  %v3500_v58 = vld [vmem:[#allocation2 + $0xf3] sm:$0xff] }
 0x51c   : > { %4450 = vrot.lane.b32.xlu1 %v4357_v22, %s5457_s12  ;;  %v3933_v22 = vld [vmem:[#allocation2 + $0x10c] sm:$0xff] }
 0x51d   : > { %v3569_v10 = vpop.permute.xlu0 %3568  ;;  %v4213_v48 = vpop.permute.xlu1 %4212 }
 0x51e   : > { %v4561_v21 = vld [vmem:[#allocation3 + $0x48] sm:$0xff]  ;;  %3664 = vst.msk [vmem:[#allocation3 + $0x60] sm:$0xff] %vm1119_vm8, %v3569_v10  ;;  %v3932_v10 = vld [vmem:[#allocation2 + $0x104] sm:$0xff] }
 0x51f   : > { %4310 = vst.msk [vmem:[#allocation3 + $0x50] sm:$0xff] %vm1773_vm15, %v4213_v48  ;;  %5364 = vmatmul.mubr.msk.f32.gmra.mrb[8].mxu1 %vm2070_vm14, %v4561_v21  ;;  %4022 = vrot.lane.b32.xlu0 %v3927_v61, %s5455_s26 }
 0x520   : > { %4020 = vrot.lane.b32.xlu1 %v3926_v9, %s5455_s26 }
 0x521   : > { %v4429_v51 = vpop.permute.xlu0 %4428  ;;  %v4215_v52 = vpop.permute.xlu1 %4214 }
 0x522   : > { %4526 = vst.msk [vmem:[#allocation3 + $0x50] sm:$0xff] %vm7876_vm4, %v4429_v51  ;;  %vm7883_vm4 = vmmov %vm7867_vm2 }
 0x523   : > { %4311 = vst.msk [vmem:[#allocation3 + $0x58] sm:$0xff] %vm1773_vm15, %v4215_v52  ;;  %3592 = vrot.lane.b32.xlu0 %v3496_v24, %s5453_s24  ;;  %v4364_v24 = vld [vmem:[#allocation2 + $0x106] sm:$0xff] }
 0x524   : > { %4236 = vrot.lane.b32.xlu1 %v4142_v55, %s5456_s27  ;;  %v4149_v55 = vld [vmem:[#allocation2 + $0x10d] sm:$0xff] }
 0x525   : > { %v3785_v23 = vpop.permute.xlu0 %3784  ;;  %v3571_v56 = vpop.permute.xlu1 %3570 }
 0x526   : > { %3880 = vst.msk [vmem:[#allocation3 + $0x60] sm:$0xff] %vm1337_vm10, %v3785_v23 }
 0x527   : > { %3665 = vst.msk [vmem:[#allocation3 + $0x68] sm:$0xff] %vm1119_vm8, %v3571_v56  ;;  %4452 = vrot.lane.b32.xlu0 %v4358_v59, %s5457_s12 }
 0x528   : > { %4238 = vrot.lane.b32.xlu1 %v4143_v60, %s5456_s27  ;;  %v3503_v60 = vld [vmem:[#allocation2 + $0x10b] sm:$0xff] }
 0x529   : > { %v3787_v12 = vpop.permute.xlu0 %3786  ;;  %v4431_v2 = vpop.permute.xlu1 %4430  ;;  %v4562_v63 = vld [vmem:[#allocation3 + $0x50] sm:$0xff] }
 0x52a   : > { %3881 = vst.msk [vmem:[#allocation3 + $0x68] sm:$0xff] %vm1337_vm10, %v3787_v12  ;;  %5366 = vmatprep.mubr.msk.f32.mxu1 %vm2070_vm14, %v4562_v63  ;;  %v4365_v63 = vld [vmem:[#allocation2 + $0x10e] sm:$0xff] }
 0x52b   : > { %4527 = vst.msk [vmem:[#allocation3 + $0x58] sm:$0xff] %vm7877_vm5, %v4431_v2  ;;  %3808 = vrot.lane.b32.xlu0 %v3926_v9, %s5454_s25  ;;  %v4148_v9 = vld [vmem:[#allocation2 + $0x105] sm:$0xff]  ;;  %vm7884_vm5 = vmmov %vm7867_vm2 }
 0x52c   : > { %3594 = vrot.lane.b32.xlu1 %v3497_v11, %s5453_s24 }
 0x52d   : > { %v4003_v0 = vpop.permute.xlu0 %4002  ;;  %v4001_v1 = vpop.permute.xlu1 %4000 }
 0x52e   : > { %4097 = vst.msk [vmem:[#allocation3 + $0x68] sm:$0xff] %vm1555_vm12, %v4003_v0  ;;  %4096 = vst.msk [vmem:[#allocation3 + $0x60] sm:$0xff] %vm1555_vm12, %v4001_v1 }
 0x52f   : > { %3810 = vrot.lane.b32.xlu0 %v3927_v61, %s5454_s25  ;;  %v3502_v61 = vld [vmem:[#allocation2 + $0x103] sm:$0xff] }
 0x530   : > { %4454 = vrot.lane.b32.xlu1 %v4359_v45, %s5457_s12  ;;  %v3935_v45 = vld [vmem:[#allocation2 + $0x11c] sm:$0xff] }
 0x531   : > { %v3573_v46 = vpop.permute.xlu0 %3572  ;;  %v4217_v49 = vpop.permute.xlu1 %4216 }
 0x532   : > { %v4563_v50 = vld [vmem:[#allocation3 + $0x58] sm:$0xff]  ;;  %3666 = vst.msk [vmem:[#allocation3 + $0x70] sm:$0xff] %vm1119_vm8, %v3573_v46  ;;  %v3934_v46 = vld [vmem:[#allocation2 + $0x114] sm:$0xff] }
 0x533   : > { %4312 = vst.msk [vmem:[#allocation3 + $0x60] sm:$0xff] %vm1773_vm15, %v4217_v49  ;;  %5367 = vmatmul.mubr.msk.f32.gmra.mrb[10].mxu1 %vm2070_vm14, %v4563_v50  ;;  %4026 = vrot.lane.b32.xlu0 %v3929_v14, %s5455_s26 }
 0x534   : > { %4024 = vrot.lane.b32.xlu1 %v3928_v25, %s5455_s26 }
 0x535   : > { %v4433_v26 = vpop.permute.xlu0 %4432  ;;  %v4219_v13 = vpop.permute.xlu1 %4218 }
 0x536   : > { %4528 = vst.msk [vmem:[#allocation3 + $0x60] sm:$0xff] %vm7878_vm6, %v4433_v26  ;;  %vm7885_vm6 = vmmov %vm7867_vm2 }
 0x537   : > { %4313 = vst.msk [vmem:[#allocation3 + $0x68] sm:$0xff] %vm1773_vm15, %v4219_v13  ;;  %3596 = vrot.lane.b32.xlu0 %v3498_v4, %s5453_s24  ;;  %v4366_v4 = vld [vmem:[#allocation2 + $0x116] sm:$0xff] }
 0x538   : > { %4240 = vrot.lane.b32.xlu1 %v4144_v27, %s5456_s27  ;;  %v4151_v27 = vld [vmem:[#allocation2 + $0x11d] sm:$0xff] }
 0x539   : > { %v3789_v28 = vpop.permute.xlu0 %3788  ;;  %v3575_v3 = vpop.permute.xlu1 %3574 }
 0x53a   : > { %3882 = vst.msk [vmem:[#allocation3 + $0x70] sm:$0xff] %vm1337_vm10, %v3789_v28 }
 0x53b   : > { %3667 = vst.msk [vmem:[#allocation3 + $0x78] sm:$0xff] %vm1119_vm8, %v3575_v3  ;;  %4456 = vrot.lane.b32.xlu0 %v4360_v54, %s5457_s12 }
 0x53c   : > { %4242 = vrot.lane.b32.xlu1 %v4145_v29, %s5456_s27  ;;  %v3505_v29 = vld [vmem:[#allocation2 + $0x11b] sm:$0xff] }
 0x53d   : > { %v3791_v16 = vpop.permute.xlu0 %3790  ;;  %v4435_v30 = vpop.permute.xlu1 %4434  ;;  %v4564_v53 = vld [vmem:[#allocation3 + $0x60] sm:$0xff] }
 0x53e   : > { %3883 = vst.msk [vmem:[#allocation3 + $0x78] sm:$0xff] %vm1337_vm10, %v3791_v16  ;;  %5369 = vmatprep.mubr.msk.f32.mxu1 %vm2070_vm14, %v4564_v53  ;;  %v4367_v53 = vld [vmem:[#allocation2 + $0x11e] sm:$0xff] }
 0x53f   : > { %4529 = vst.msk [vmem:[#allocation3 + $0x68] sm:$0xff] %vm7879_vm7, %v4435_v30  ;;  %3812 = vrot.lane.b32.xlu0 %v3928_v25, %s5454_s25  ;;  %v4150_v25 = vld [vmem:[#allocation2 + $0x115] sm:$0xff]  ;;  %vm7886_vm7 = vmmov %vm7867_vm2 }
 0x540   : > { %3598 = vrot.lane.b32.xlu1 %v3499_v15, %s5453_s24 }
 0x541   : > { %v4007_v31 = vpop.permute.xlu0 %4006 }
 0x542   : > { %v4005_v32 = vpop.permute.xlu1 %4004  ;;  %4099 = vst.msk [vmem:[#allocation3 + $0x78] sm:$0xff] %vm1555_vm12, %v4007_v31 }
 0x543   : > { %4098 = vst.msk [vmem:[#allocation3 + $0x70] sm:$0xff] %vm1555_vm12, %v4005_v32  ;;  %3814 = vrot.lane.b32.xlu0 %v3929_v14, %s5454_s25  ;;  %v3504_v14 = vld [vmem:[#allocation2 + $0x113] sm:$0xff] }
 0x544   : > { %4458 = vrot.lane.b32.xlu1 %v4361_v6, %s5457_s12  ;;  %v3937_v6 = vld [vmem:[#allocation2 + $0x12c] sm:$0xff] }
 0x545   : > { %v3577_v33 = vpop.permute.xlu0 %3576 }
 0x546   : > { %v4221_v34 = vpop.permute.xlu1 %4220  ;;  %v4565_v5 = vld [vmem:[#allocation3 + $0x68] sm:$0xff]  ;;  %3668 = vst.msk [vmem:[#allocation3 + $0x80] sm:$0xff] %vm1119_vm8, %v3577_v33  ;;  %v3936_v33 = vld [vmem:[#allocation2 + $0x124] sm:$0xff] }
 0x547   : > { %4314 = vst.msk [vmem:[#allocation3 + $0x70] sm:$0xff] %vm1773_vm15, %v4221_v34  ;;  %5370 = vmatmul.mubr.msk.f32.gmra.mrb[12].mxu1 %vm2070_vm14, %v4565_v5  ;;  %4030 = vrot.lane.b32.xlu0 %v3931_v18, %s5455_s26 }
 0x548   : > { %4028 = vrot.lane.b32.xlu1 %v3930_v35, %s5455_s26 }
 0x549   : > { %v4437_v36 = vpop.permute.xlu0 %4436 }
 0x54a   : > { %v4223_v17 = vpop.permute.xlu1 %4222  ;;  %4530 = vst.msk [vmem:[#allocation3 + $0x70] sm:$0xff] %vm7880_vm11, %v4437_v36  ;;  %vm7887_vm11 = vmmov %vm7867_vm2 }
 0x54b   : > { %4315 = vst.msk [vmem:[#allocation3 + $0x78] sm:$0xff] %vm1773_vm15, %v4223_v17  ;;  %3600 = vrot.lane.b32.xlu0 %v3500_v58, %s5453_s24  ;;  %v4368_v58 = vld [vmem:[#allocation2 + $0x126] sm:$0xff] }
 0x54c   : > { %4244 = vrot.lane.b32.xlu1 %v4146_v37, %s5456_s27  ;;  %v4153_v37 = vld [vmem:[#allocation2 + $0x12d] sm:$0xff] }
 0x54d   : > { %v3793_v38 = vpop.permute.xlu0 %3792 }
 0x54e   : > { %v3579_v57 = vpop.permute.xlu1 %3578  ;;  %3884 = vst.msk [vmem:[#allocation3 + $0x80] sm:$0xff] %vm1337_vm10, %v3793_v38 }
 0x54f   : > { %3669 = vst.msk [vmem:[#allocation3 + $0x88] sm:$0xff] %vm1119_vm8, %v3579_v57  ;;  %4460 = vrot.lane.b32.xlu0 %v4362_v8, %s5457_s12 }
 0x550   : > { %4246 = vrot.lane.b32.xlu1 %v4147_v39, %s5456_s27  ;;  %v3507_v39 = vld [vmem:[#allocation2 + $0x12b] sm:$0x3f] }
 0x551   : > { %v3795_v20 = vpop.permute.xlu0 %3794  ;;  %v4566_v7 = vld [vmem:[#allocation3 + $0x70] sm:$0xff] }
 0x552   : > { %v4439_v40 = vpop.permute.xlu1 %4438  ;;  %3885 = vst.msk [vmem:[#allocation3 + $0x88] sm:$0xff] %vm1337_vm10, %v3795_v20  ;;  %5372 = vmatprep.mubr.msk.f32.mxu1 %vm2070_vm14, %v4566_v7  ;;  %v3723_v7 = vld [vmem:[#allocation2 + $0x12c] sm:$0x3f] }
 0x553   : > { %4531 = vst.msk [vmem:[#allocation3 + $0x78] sm:$0xff] %vm7881_vm13, %v4439_v40  ;;  %3816 = vrot.lane.b32.xlu0 %v3930_v35, %s5454_s25  ;;  %v4152_v35 = vld [vmem:[#allocation2 + $0x125] sm:$0xff]  ;;  %vm7888_vm13 = vmmov %vm7867_vm2 }
 0x554   : > { %3602 = vrot.lane.b32.xlu1 %v3501_v19, %s5453_s24  ;;  %v4369_v19 = vld [vmem:[#allocation2 + $0x12e] sm:$0xff] }
 0x555   : > { %v4011_v41 = vpop.permute.xlu0 %4010 }
 0x556   : > { %v4009_v42 = vpop.permute.xlu1 %4008  ;;  %4101 = vst.msk [vmem:[#allocation3 + $0x88] sm:$0xff] %vm1555_vm12, %v4011_v41  ;;  %v3938_v41 = vld [vmem:[#allocation2 + $0x134] sm:$0xff] }
 0x557   : > { %4100 = vst.msk [vmem:[#allocation3 + $0x80] sm:$0xff] %vm1555_vm12, %v4009_v42  ;;  %3818 = vrot.lane.b32.xlu0 %v3931_v18, %s5454_s25  ;;  %v3506_v18 = vld [vmem:[#allocation2 + $0x123] sm:$0xff]  ;;  %v3939_v42 = vld [vmem:[#allocation2 + $0x13c] sm:$0x3f] }
 0x558   : > { %4462 = vrot.lane.b32.xlu1 %v4363_v43, %s5457_s12 }
 0x559   : > { %v3581_v44 = vpop.permute.xlu0 %3580 }
 0x55a   : > { %v4225_v62 = vpop.permute.xlu1 %4224  ;;  %v4567_v47 = vld [vmem:[#allocation3 + $0x78] sm:$0xff]  ;;  %3670 = vst.msk [vmem:[#allocation3 + $0x90] sm:$0xff] %vm1119_vm8, %v3581_v44 }
 0x55b   : > { %4316 = vst.msk [vmem:[#allocation3 + $0x80] sm:$0xff] %vm1773_vm15, %v4225_v62  ;;  %5373 = vmatmul.mubr.msk.f32.gmra.mrb[14].mxu1 %vm2070_vm14, %v4567_v47  ;;  %4034 = vrot.lane.b32.xlu0 %v3933_v22, %s5455_s26  ;;  %v4154_v47 = vld [vmem:[#allocation2 + $0x135] sm:$0xff] }
 0x55c   : > { %4032 = vrot.lane.b32.xlu1 %v3932_v10, %s5455_s26 }
 0x55d   : > { %v4441_v48 = vpop.permute.xlu0 %4440 }
 0x55e   : > { %v4227_v21 = vpop.permute.xlu1 %4226  ;;  %4532 = vst.msk [vmem:[#allocation3 + $0x80] sm:$0xff] %vm7867_vm2, %v4441_v48 }
 0x55f   : > { %4317 = vst.msk [vmem:[#allocation3 + $0x88] sm:$0xff] %vm1773_vm15, %v4227_v21  ;;  %3604 = vrot.lane.b32.xlu0 %v3502_v61, %s5453_s24  ;;  %v4370_v21 = vld [vmem:[#allocation2 + $0x136] sm:$0xff]  ;;  %v4371_v61 = vld [vmem:[#allocation2 + $0x13e] sm:$0x3f] }
 0x560   : > { %4248 = vrot.lane.b32.xlu1 %v4148_v9, %s5456_s27 }
 0x561   : > { %v3797_v51 = vpop.permute.xlu0 %3796 }
 0x562   : > { %v3583_v52 = vpop.permute.xlu1 %3582  ;;  %3886 = vst.msk [vmem:[#allocation3 + $0x90] sm:$0xff] %vm1337_vm10, %v3797_v51 }
 0x563   : > { %3671 = vst.msk [vmem:[#allocation3 + $0x98] sm:$0xff] %vm1119_vm8, %v3583_v52  ;;  %4464 = vrot.lane.b32.xlu0 %v4364_v24, %s5457_s12  ;;  %v4594_v52 = vld [vmem:[%s5501_s20 + $0x1b] sm:$0xff]  ;;  %v4593_v24 = vld [vmem:[%s5501_s20 + $0x13] sm:$0xff] }
 0x564   : > { %4250 = vrot.lane.b32.xlu1 %v4149_v55, %s5456_s27 }
 0x565   : > { %v3799_v23 = vpop.permute.xlu0 %3798  ;;  %v4568_v59 = vld [vmem:[#allocation3 + $0x80] sm:$0xff] }
 0x566   : > { %v4443_v56 = vpop.permute.xlu1 %4442  ;;  %3887 = vst.msk [vmem:[#allocation3 + $0x98] sm:$0xff] %vm1337_vm10, %v3799_v23  ;;  %5375 = vmatprep.mubr.msk.f32.mxu1 %vm2070_vm14, %v4568_v59 }
 0x567   : > { %4533 = vst.msk [vmem:[#allocation3 + $0x88] sm:$0xff] %vm7882_vm3, %v4443_v56  ;;  %3820 = vrot.lane.b32.xlu0 %v3932_v10, %s5454_s25  ;;  %vm7889_vm3 = vmmov %vm7867_vm2 }
 0x568   : > { %3606 = vrot.lane.b32.xlu1 %v3503_v60, %s5453_s24 }
 0x569   : > { %v4015_v12 = vpop.permute.xlu0 %4014 }
 0x56a   : > { %v4013_v2 = vpop.permute.xlu1 %4012  ;;  %4103 = vst.msk [vmem:[#allocation3 + $0x98] sm:$0xff] %vm1555_vm12, %v4015_v12 }
 0x56b   : > { %4102 = vst.msk [vmem:[#allocation3 + $0x90] sm:$0xff] %vm1555_vm12, %v4013_v2  ;;  %3822 = vrot.lane.b32.xlu0 %v3933_v22, %s5454_s25  ;;  %v4155_v22 = vld [vmem:[#allocation2 + $0x13d] sm:$0x3f] }
 0x56c   : > { %4466 = vrot.lane.b32.xlu1 %v4365_v63, %s5457_s12 }
 0x56d   : > { %v3585_v11 = vpop.permute.xlu0 %3584 }
 0x56e   : > { %v4229_v0 = vpop.permute.xlu1 %4228  ;;  %v4569_v1 = vld [vmem:[#allocation3 + $0x88] sm:$0xff]  ;;  %3672 = vst.msk [vmem:[#allocation3 + $0xa0] sm:$0xff] %vm1119_vm8, %v3585_v11 }
 0x56f   : > { %4318 = vst.msk [vmem:[#allocation3 + $0x90] sm:$0xff] %vm1773_vm15, %v4229_v0  ;;  %5376 = vmatmul.mubr.msk.f32.gmra.mrb[16].mxu1 %vm2070_vm14, %v4569_v1  ;;  %4038 = vrot.lane.b32.xlu0 %v3935_v45, %s5455_s26 }
 0x570   : > { %4036 = vrot.lane.b32.xlu1 %v3934_v46, %s5455_s26 }
 0x571   : > { %v4445_v49 = vpop.permute.xlu0 %4444 }
 0x572   : > { %v4231_v50 = vpop.permute.xlu1 %4230  ;;  %4534 = vst.msk [vmem:[#allocation3 + $0x90] sm:$0xff] %vm7883_vm4, %v4445_v49  ;;  %vm7890_vm4 = vmmov %vm7867_vm2 }
 0x573   : > { %4319 = vst.msk [vmem:[#allocation3 + $0x98] sm:$0xff] %vm1773_vm15, %v4231_v50  ;;  %3608 = vrot.lane.b32.xlu0 %v3504_v14, %s5453_s24 }
 0x574   : > { %4252 = vrot.lane.b32.xlu1 %v4150_v25, %s5456_s27 }
 0x575   : > { %v3801_v26 = vpop.permute.xlu0 %3800 }
 0x576   : > { %v3587_v13 = vpop.permute.xlu1 %3586  ;;  %3888 = vst.msk [vmem:[#allocation3 + $0xa0] sm:$0xff] %vm1337_vm10, %v3801_v26 }
 0x577   : > { %3673 = vst.msk [vmem:[#allocation3 + $0xa8] sm:$0xff] %vm1119_vm8, %v3587_v13  ;;  %4468 = vrot.lane.b32.xlu0 %v4366_v4, %s5457_s12  ;;  %v4596_v13 = vld [vmem:[%s5501_s20 + $0x2b] sm:$0xff]  ;;  %v4595_v4 = vld [vmem:[%s5501_s20 + $0x23] sm:$0xff] }
 0x578   : > { %4254 = vrot.lane.b32.xlu1 %v4151_v27, %s5456_s27 }
 0x579   : > { %v3803_v28 = vpop.permute.xlu0 %3802  ;;  %v4570_v54 = vld [vmem:[#allocation3 + $0x90] sm:$0xff] }
 0x57a   : > { %v4447_v3 = vpop.permute.xlu1 %4446  ;;  %3889 = vst.msk [vmem:[#allocation3 + $0xa8] sm:$0xff] %vm1337_vm10, %v3803_v28  ;;  %5378 = vmatprep.mubr.msk.f32.mxu1 %vm2070_vm14, %v4570_v54 }
 0x57b   : > { %4535 = vst.msk [vmem:[#allocation3 + $0x98] sm:$0xff] %vm7884_vm5, %v4447_v3  ;;  %3824 = vrot.lane.b32.xlu0 %v3934_v46, %s5454_s25  ;;  %vm7891_vm5 = vmmov %vm7867_vm2 }
 0x57c   : > { %3610 = vrot.lane.b32.xlu1 %v3505_v29, %s5453_s24 }
 0x57d   : > { %v4019_v16 = vpop.permute.xlu0 %4018 }
 0x57e   : > { %v4017_v30 = vpop.permute.xlu1 %4016  ;;  %4105 = vst.msk [vmem:[#allocation3 + $0xa8] sm:$0xff] %vm1555_vm12, %v4019_v16 }
 0x57f   : > { %4104 = vst.msk [vmem:[#allocation3 + $0xa0] sm:$0xff] %vm1555_vm12, %v4017_v30  ;;  %3826 = vrot.lane.b32.xlu0 %v3935_v45, %s5454_s25 }
 0x580   : > { %4470 = vrot.lane.b32.xlu1 %v4367_v53, %s5457_s12 }
 0x581   : > { %v3589_v15 = vpop.permute.xlu0 %3588 }
 0x582   : > { %v4233_v31 = vpop.permute.xlu1 %4232  ;;  %v4571_v32 = vld [vmem:[#allocation3 + $0x98] sm:$0xff]  ;;  %3674 = vst.msk [vmem:[#allocation3 + $0xb0] sm:$0xff] %vm1119_vm8, %v3589_v15 }
 0x583   : > { %4320 = vst.msk [vmem:[#allocation3 + $0xa0] sm:$0xff] %vm1773_vm15, %v4233_v31  ;;  %5379 = vmatmul.mubr.msk.f32.gmra.mrb[18].mxu1 %vm2070_vm14, %v4571_v32  ;;  %4042 = vrot.lane.b32.xlu0 %v3937_v6, %s5455_s26 }
 0x584   : > { %4040 = vrot.lane.b32.xlu1 %v3936_v33, %s5455_s26 }
 0x585   : > { %v4449_v34 = vpop.permute.xlu0 %4448 }
 0x586   : > { %v4235_v5 = vpop.permute.xlu1 %4234  ;;  %4536 = vst.msk [vmem:[#allocation3 + $0xa0] sm:$0xff] %vm7885_vm6, %v4449_v34  ;;  %vm7892_vm6 = vmmov %vm7867_vm2 }
 0x587   : > { %4321 = vst.msk [vmem:[#allocation3 + $0xa8] sm:$0xff] %vm1773_vm15, %v4235_v5  ;;  %3612 = vrot.lane.b32.xlu0 %v3506_v18, %s5453_s24 }
 0x588   : > { %4256 = vrot.lane.b32.xlu1 %v4152_v35, %s5456_s27 }
 0x589   : > { %v3805_v36 = vpop.permute.xlu0 %3804 }
 0x58a   : > { %v3591_v17 = vpop.permute.xlu1 %3590  ;;  %3890 = vst.msk [vmem:[#allocation3 + $0xb0] sm:$0xff] %vm1337_vm10, %v3805_v36 }
 0x58b   : > { %3675 = vst.msk [vmem:[#allocation3 + $0xb8] sm:$0xff] %vm1119_vm8, %v3591_v17  ;;  %4472 = vrot.lane.b32.xlu0 %v4368_v58, %s5457_s12  ;;  %v4598_v17 = vld [vmem:[%s5501_s20 + $0x3b] sm:$0xff]  ;;  %v4597_v58 = vld [vmem:[%s5501_s20 + $0x33] sm:$0xff] }
 0x58c   : > { %4258 = vrot.lane.b32.xlu1 %v4153_v37, %s5456_s27 }
 0x58d   : > { %v3807_v38 = vpop.permute.xlu0 %3806  ;;  %v4572_v8 = vld [vmem:[#allocation3 + $0xa0] sm:$0xff] }
 0x58e   : > { %v4451_v57 = vpop.permute.xlu1 %4450  ;;  %3891 = vst.msk [vmem:[#allocation3 + $0xb8] sm:$0xff] %vm1337_vm10, %v3807_v38  ;;  %5381 = vmatprep.mubr.msk.f32.mxu1 %vm2070_vm14, %v4572_v8 }
 0x58f   : > { %4537 = vst.msk [vmem:[#allocation3 + $0xa8] sm:$0xff] %vm7886_vm7, %v4451_v57  ;;  %3828 = vrot.lane.b32.xlu0 %v3936_v33, %s5454_s25  ;;  %vm7893_vm7 = vmmov %vm7867_vm2 }
 0x590   : > { %3614 = vrot.lane.b32.xlu1 %v3507_v39, %s5453_s24 }
 0x591   : > { %v4023_v20 = vpop.permute.xlu0 %4022 }
 0x592   : > { %v4021_v40 = vpop.permute.xlu1 %4020  ;;  %4107 = vst.msk [vmem:[#allocation3 + $0xb8] sm:$0xff] %vm1555_vm12, %v4023_v20 }
 0x593   : > { %4106 = vst.msk [vmem:[#allocation3 + $0xb0] sm:$0xff] %vm1555_vm12, %v4021_v40  ;;  %3830 = vrot.lane.b32.xlu0 %v3723_v7, %s5454_s25 }
 0x594   : > { %4474 = vrot.lane.b32.xlu1 %v4369_v19, %s5457_s12 }
 0x595   : > { %v3593_v43 = vpop.permute.xlu0 %3592 }
 0x596   : > { %v4237_v44 = vpop.permute.xlu1 %4236  ;;  %v4573_v62 = vld [vmem:[#allocation3 + $0xa8] sm:$0xff]  ;;  %3676 = vst.msk [vmem:[#allocation3 + $0xc0] sm:$0xff] %vm1119_vm8, %v3593_v43 }
 0x597   : > { %4322 = vst.msk [vmem:[#allocation3 + $0xb0] sm:$0xff] %vm1773_vm15, %v4237_v44  ;;  %5382 = vmatmul.mubr.msk.f32.gmra.mrb[20].mxu1 %vm2070_vm14, %v4573_v62  ;;  %4046 = vrot.lane.b32.xlu0 %v3939_v42, %s5455_s26 }
 0x598   : > { %4044 = vrot.lane.b32.xlu1 %v3938_v41, %s5455_s26 }
 0x599   : > { %v4453_v10 = vpop.permute.xlu0 %4452 }
 0x59a   : > { %v4239_v48 = vpop.permute.xlu1 %4238  ;;  %4538 = vst.msk [vmem:[#allocation3 + $0xb0] sm:$0xff] %vm7887_vm11, %v4453_v10  ;;  %vm7894_vm11 = vmmov %vm7867_vm2 }
 0x59b   : > { %4323 = vst.msk [vmem:[#allocation3 + $0xb8] sm:$0xff] %vm1773_vm15, %v4239_v48  ;;  %4262 = vrot.lane.b32.xlu0 %v4155_v22, %s5456_s27 }
 0x59c   : > { %4260 = vrot.lane.b32.xlu1 %v4154_v47, %s5456_s27 }
 0x59d   : > { %v3809_v9 = vpop.permute.xlu0 %3808 }
 0x59e   : > { %v3595_v51 = vpop.permute.xlu1 %3594  ;;  %3892 = vst.msk [vmem:[#allocation3 + $0xc0] sm:$0xff] %vm1337_vm10, %v3809_v9 }
 0x59f   : > { %3677 = vst.msk [vmem:[#allocation3 + $0xc8] sm:$0xff] %vm1119_vm8, %v3595_v51  ;;  %4478 = vrot.lane.b32.xlu0 %v4371_v61, %s5457_s12  ;;  %v4599_v61 = vld [vmem:[%s5501_s20 + $0x43] sm:$0xff] }
 0x5a0   : > { %4476 = vrot.lane.b32.xlu1 %v4370_v21, %s5457_s12  ;;  %v4600_v21 = vld [vmem:[%s5501_s20 + $0x4b] sm:$0xff] }
 0x5a1   : > { %v3811_v55 = vpop.permute.xlu0 %3810  ;;  %v4574_v56 = vld [vmem:[#allocation3 + $0xb0] sm:$0xff] }
 0x5a2   : > { %v5353_v23 = vpop.f32.mrb[0].mxu1  ;;  %3893 = vst.msk [vmem:[#allocation3 + $0xc8] sm:$0xff] %vm1337_vm10, %v3811_v55  ;;  %v4455_v60 = vpop.permute.xlu1 %4454  ;;  %5384 = vmatprep.mubr.msk.f32.mxu1 %vm2070_vm14, %v4574_v56 }
 0x5a3   : > { %v4812_v59 = vadd.f32 %v5353_v23, %v4594_v52  ;;  %v4806_v12 = vpop.f32.mrb[1].mxu1  ;;  %4539 = vst.msk [vmem:[#allocation3 + $0xb8] sm:$0xff] %vm7888_vm13, %v4455_v60  ;;  %vm7895_vm13 = vmmov %vm7867_vm2 }
 0x5a4   : > { %v4807_v2 = vadd.f32 %v4806_v12, %v4593_v24 }
 0x5a5   : > { %v4986_v63 = vmax.f32 %v4812_v59, 0.0  ;;  %v4027_v0 = vpop.permute.xlu0 %4026 }
 0x5a6   : > { %v4985_v11 = vmax.f32 %v4807_v2, 0.0  ;;  %4109 = vst.msk [vmem:[#allocation3 + $0xc8] sm:$0xff] %vm1555_vm12, %v4027_v0  ;;  %v4025_v1 = vpop.permute.xlu1 %4024 }
 0x5a7   : > { %5022 = vst.msk [vmem:[%s6811_s28 + $0x1b] sm:$0xff] %vm198_vm0, %v4986_v63 }
 0x5a8   : > { %5021 = vst.msk [vmem:[%s6811_s28 + $0x13] sm:$0xff] %vm198_vm0, %v4985_v11 }
 0x5a9   : > { %4108 = vst.msk [vmem:[#allocation3 + $0xc0] sm:$0xff] %vm1555_vm12, %v4025_v1  ;;  %v3597_v45 = vpop.permute.xlu0 %3596 }
 0x5aa   : > { %3678 = vst.msk [vmem:[#allocation3 + $0xd0] sm:$0xff] %vm1119_vm8, %v3597_v45  ;;  %v4241_v46 = vpop.permute.xlu1 %4240  ;;  %v4575_v49 = vld [vmem:[#allocation3 + $0xb8] sm:$0xff] }
 0x5ab   : > { %4324 = vst.msk [vmem:[#allocation3 + $0xc0] sm:$0xff] %vm1773_vm15, %v4241_v46  ;;  %5385 = vmatmul.mubr.msk.f32.gmra.mrb[22].mxu1 %vm2070_vm14, %v4575_v49 }
 0x5ad   : > { %v4457_v50 = vpop.permute.xlu0 %4456 }
 0x5ae   : > { %4540 = vst.msk [vmem:[#allocation3 + $0xc0] sm:$0xff] %vm7867_vm2, %v4457_v50  ;;  %v4243_v14 = vpop.permute.xlu1 %4242  ;;  %v4602_v50 = vld [vmem:[%s5501_s20 + $0x5b] sm:$0xff] }
 0x5af   : > { %4325 = vst.msk [vmem:[#allocation3 + $0xc8] sm:$0xff] %vm1773_vm15, %v4243_v14  ;;  %v4601_v14 = vld [vmem:[%s5501_s20 + $0x53] sm:$0xff] }
 0x5b1   : > { %v3813_v25 = vpop.permute.xlu0 %3812 }
 0x5b2   : > { %3894 = vst.msk [vmem:[#allocation3 + $0xd0] sm:$0xff] %vm1337_vm10, %v3813_v25  ;;  %v3599_v26 = vpop.permute.xlu1 %3598 }
 0x5b3   : > { %3679 = vst.msk [vmem:[#allocation3 + $0xd8] sm:$0xff] %vm1119_vm8, %v3599_v26 }
 0x5b5   : > { %v3815_v27 = vpop.permute.xlu0 %3814  ;;  %v4576_v3 = vld [vmem:[#allocation3 + $0xc0] sm:$0xff] }
 0x5b6   : > { %v5356_v28 = vpop.f32.mrb[2].mxu1  ;;  %3895 = vst.msk [vmem:[#allocation3 + $0xd8] sm:$0xff] %vm1337_vm10, %v3815_v27  ;;  %v4459_v29 = vpop.permute.xlu1 %4458  ;;  %5387 = vmatprep.mubr.msk.f32.mxu1 %vm2070_vm14, %v4576_v3 }
 0x5b7   : > { %v4822_v54 = vadd.f32 %v5356_v28, %v4596_v13  ;;  %v4816_v16 = vpop.f32.mrb[3].mxu1  ;;  %4541 = vst.msk [vmem:[#allocation3 + $0xc8] sm:$0xff] %vm7889_vm3, %v4459_v29  ;;  %vm7896_vm3 = vcmask 160896  }
 0x5b8   : > { %v4817_v30 = vadd.f32 %v4816_v16, %v4595_v4 }
 0x5b9   : > { %v4988_v53 = vmax.f32 %v4822_v54, 0.0  ;;  %v4031_v31 = vpop.permute.xlu0 %4030 }
 0x5ba   : > { %v4987_v15 = vmax.f32 %v4817_v30, 0.0  ;;  %4111 = vst.msk [vmem:[#allocation3 + $0xd8] sm:$0xff] %vm1555_vm12, %v4031_v31  ;;  %v4029_v32 = vpop.permute.xlu1 %4028 }
 0x5bb   : > { %5024 = vst.msk [vmem:[%s6811_s28 + $0x2b] sm:$0xff] %vm198_vm0, %v4988_v53 }
 0x5bc   : > { %5023 = vst.msk [vmem:[%s6811_s28 + $0x23] sm:$0xff] %vm198_vm0, %v4987_v15 }
 0x5bd   : > { %4110 = vst.msk [vmem:[#allocation3 + $0xd0] sm:$0xff] %vm1555_vm12, %v4029_v32  ;;  %v3601_v6 = vpop.permute.xlu0 %3600 }
 0x5be   : > { %3680 = vst.msk [vmem:[#allocation3 + $0xe0] sm:$0xff] %vm1119_vm8, %v3601_v6  ;;  %v4245_v33 = vpop.permute.xlu1 %4244  ;;  %v4577_v34 = vld [vmem:[#allocation3 + $0xc8] sm:$0xff] }
 0x5bf   : > { %4326 = vst.msk [vmem:[#allocation3 + $0xd0] sm:$0xff] %vm1773_vm15, %v4245_v33  ;;  %5388 = vmatmul.mubr.msk.f32.gmra.mrb[24].mxu1 %vm2070_vm14, %v4577_v34 }
 0x5c1   : > { %v4461_v5 = vpop.permute.xlu0 %4460 }
 0x5c2   : > { %4542 = vst.msk [vmem:[#allocation3 + $0xd0] sm:$0xff] %vm7890_vm4, %v4461_v5  ;;  %v4247_v18 = vpop.permute.xlu1 %4246  ;;  %v4604_v5 = vld [vmem:[%s5501_s20 + $0x6b] sm:$0xff]  ;;  %vm7898_vm4 = vmmov %vm7867_vm2 }
 0x5c3   : > { %4327 = vst.msk [vmem:[#allocation3 + $0xd8] sm:$0xff] %vm1773_vm15, %v4247_v18  ;;  %v4603_v18 = vld [vmem:[%s5501_s20 + $0x63] sm:$0xff] }
 0x5c5   : > { %v3817_v35 = vpop.permute.xlu0 %3816 }
 0x5c6   : > { %3896 = vst.msk [vmem:[#allocation3 + $0xe0] sm:$0xff] %vm1337_vm10, %v3817_v35  ;;  %v3603_v36 = vpop.permute.xlu1 %3602 }
 0x5c7   : > { %3681 = vst.msk [vmem:[#allocation3 + $0xe8] sm:$0xff] %vm1119_vm8, %v3603_v36 }
 0x5c9   : > { %v3819_v37 = vpop.permute.xlu0 %3818  ;;  %v4578_v57 = vld [vmem:[#allocation3 + $0xd0] sm:$0xff] }
 0x5ca   : > { %v5359_v38 = vpop.f32.mrb[4].mxu1  ;;  %3897 = vst.msk [vmem:[#allocation3 + $0xe8] sm:$0xff] %vm1337_vm10, %v3819_v37  ;;  %v4463_v39 = vpop.permute.xlu1 %4462  ;;  %5390 = vmatprep.mubr.msk.f32.mxu1 %vm2070_vm14, %v4578_v57 }
 0x5cb   : > { %v4832_v8 = vadd.f32 %v5359_v38, %v4598_v17  ;;  %v4826_v20 = vpop.f32.mrb[5].mxu1  ;;  %4543 = vst.msk [vmem:[#allocation3 + $0xd8] sm:$0xff] %vm7891_vm5, %v4463_v39  ;;  %vm7900_vm5 = vcmask 259296  }
 0x5cc   : > { %v4827_v40 = vadd.f32 %v4826_v20, %v4597_v58 }
 0x5cd   : > { %v4990_v7 = vmax.f32 %v4832_v8, 0.0  ;;  %v4035_v41 = vpop.permute.xlu0 %4034 }
 0x5ce   : > { %v4989_v19 = vmax.f32 %v4827_v40, 0.0  ;;  %4113 = vst.msk [vmem:[#allocation3 + $0xe8] sm:$0xff] %vm1555_vm12, %v4035_v41  ;;  %v4033_v42 = vpop.permute.xlu1 %4032 }
 0x5cf   : > { %5026 = vst.msk [vmem:[%s6811_s28 + $0x3b] sm:$0xff] %vm198_vm0, %v4990_v7 }
 0x5d0   : > { %5025 = vst.msk [vmem:[%s6811_s28 + $0x33] sm:$0xff] %vm198_vm0, %v4989_v19 }
 0x5d1   : > { %4112 = vst.msk [vmem:[#allocation3 + $0xe0] sm:$0xff] %vm1555_vm12, %v4033_v42  ;;  %v3605_v43 = vpop.permute.xlu0 %3604 }
 0x5d2   : > { %3682 = vst.msk [vmem:[#allocation3 + $0xf0] sm:$0xff] %vm1119_vm8, %v3605_v43  ;;  %v4249_v44 = vpop.permute.xlu1 %4248  ;;  %v4579_v62 = vld [vmem:[#allocation3 + $0xd8] sm:$0xff] }
 0x5d3   : > { %4328 = vst.msk [vmem:[#allocation3 + $0xe0] sm:$0xff] %vm1773_vm15, %v4249_v44  ;;  %5391 = vmatmul.mubr.msk.f32.gmra.mrb[26].mxu1 %vm2070_vm14, %v4579_v62  ;;  %v4606_v44 = vld [vmem:[%s5501_s20 + $0x7b] sm:$0xff]  ;;  %v4605_v62 = vld [vmem:[%s5501_s20 + $0x73] sm:$0xff] }
 0x5d5   : > { %v4465_v47 = vpop.permute.xlu0 %4464 }
 0x5d6   : > { %4544 = vst.msk [vmem:[#allocation3 + $0xe0] sm:$0xff] %vm7892_vm6, %v4465_v47  ;;  %v4251_v22 = vpop.permute.xlu1 %4250  ;;  %vm7901_vm6 = vmmov %vm7867_vm2 }
 0x5d7   : > { %4329 = vst.msk [vmem:[#allocation3 + $0xe8] sm:$0xff] %vm1773_vm15, %v4251_v22 }
 0x5d9   : > { %v3821_v10 = vpop.permute.xlu0 %3820 }
 0x5da   : > { %3898 = vst.msk [vmem:[#allocation3 + $0xf0] sm:$0xff] %vm1337_vm10, %v3821_v10  ;;  %v3607_v48 = vpop.permute.xlu1 %3606 }
 0x5db   : > { %3683 = vst.msk [vmem:[#allocation3 + $0xf8] sm:$0xff] %vm1119_vm8, %v3607_v48 }
 0x5dd   : > { %v3823_v9 = vpop.permute.xlu0 %3822  ;;  %v4580_v52 = vld [vmem:[#allocation3 + $0xe0] sm:$0xff] }
 0x5de   : > { %v5362_v51 = vpop.f32.mrb[6].mxu1  ;;  %3899 = vst.msk [vmem:[#allocation3 + $0xf8] sm:$0xff] %vm1337_vm10, %v3823_v9  ;;  %v4467_v55 = vpop.permute.xlu1 %4466  ;;  %5393 = vmatprep.mubr.msk.f32.mxu1 %vm2070_vm14, %v4580_v52  ;;  %v4608_v52 = vld [vmem:[%s5501_s20 + $0x8b] sm:$0xff] }
 0x5df   : > { %v4842_v24 = vadd.f32 %v5362_v51, %v4600_v21  ;;  %v4836_v23 = vpop.f32.mrb[7].mxu1  ;;  %4545 = vst.msk [vmem:[#allocation3 + $0xe8] sm:$0xff] %vm7893_vm7, %v4467_v55 }
 0x5e0   : > { %v4837_v56 = vadd.f32 %v4836_v23, %v4599_v61 }
 0x5e1   : > { %v4992_v59 = vmax.f32 %v4842_v24, 0.0  ;;  %v4039_v12 = vpop.permute.xlu0 %4038  ;;  %v4607_v24 = vld [vmem:[%s5501_s20 + $0x83] sm:$0xff] }
 0x5e2   : > { %v4991_v60 = vmax.f32 %v4837_v56, 0.0  ;;  %4115 = vst.msk [vmem:[#allocation3 + $0xf8] sm:$0xff] %vm1555_vm12, %v4039_v12  ;;  %v4037_v2 = vpop.permute.xlu1 %4036 }
 0x5e3   : > { %5028 = vst.msk [vmem:[%s6811_s28 + $0x4b] sm:$0xff] %vm198_vm0, %v4992_v59 }
 0x5e4   : > { %5027 = vst.msk [vmem:[%s6811_s28 + $0x43] sm:$0xff] %vm198_vm0, %v4991_v60 }
 0x5e5   : > { %4114 = vst.msk [vmem:[#allocation3 + $0xf0] sm:$0xff] %vm1555_vm12, %v4037_v2  ;;  %v3609_v63 = vpop.permute.xlu0 %3608  ;;  %v4610_v2 = vld [vmem:[%s5501_s20 + $0x9b] sm:$0xff] }
 0x5e6   : > { %3684 = vst.msk [vmem:[#allocation3 + $0x100] sm:$0xff] %vm1119_vm8, %v3609_v63  ;;  %v4253_v11 = vpop.permute.xlu1 %4252  ;;  %v4581_v0 = vld [vmem:[#allocation3 + $0xe8] sm:$0xff] }
 0x5e7   : > { %4330 = vst.msk [vmem:[#allocation3 + $0xf0] sm:$0xff] %vm1773_vm15, %v4253_v11  ;;  %5394 = vmatmul.mubr.msk.f32.gmra.mrb[28].mxu1 %vm2070_vm14, %v4581_v0  ;;  %v4609_v63 = vld [vmem:[%s5501_s20 + $0x93] sm:$0xff] }
 0x5e9   : > { %v4469_v1 = vpop.permute.xlu0 %4468 }
 0x5ea   : > { %4546 = vst.msk [vmem:[#allocation3 + $0xf0] sm:$0xff] %vm7894_vm11, %v4469_v1  ;;  %v4255_v45 = vpop.permute.xlu1 %4254 }
 0x5eb   : > { %4331 = vst.msk [vmem:[#allocation3 + $0xf8] sm:$0xff] %vm1773_vm15, %v4255_v45 }
 0x5ed   : > { %v3825_v46 = vpop.permute.xlu0 %3824 }
 0x5ee   : > { %3900 = vst.msk [vmem:[#allocation3 + $0x100] sm:$0xff] %vm1337_vm10, %v3825_v46  ;;  %v3611_v49 = vpop.permute.xlu1 %3610 }
 0x5ef   : > { %3685 = vst.msk [vmem:[#allocation3 + $0x108] sm:$0xff] %vm1119_vm8, %v3611_v49 }
 0x5f1   : > { %v3827_v25 = vpop.permute.xlu0 %3826  ;;  %v4582_v13 = vld [vmem:[#allocation3 + $0xf0] sm:$0xff] }
 0x5f2   : > { %v5365_v26 = vpop.f32.mrb[8].mxu1  ;;  %3901 = vst.msk [vmem:[#allocation3 + $0x108] sm:$0xff] %vm1337_vm10, %v3827_v25  ;;  %v4471_v27 = vpop.permute.xlu1 %4470  ;;  %5396 = vmatprep.mubr.msk.f32.mxu1 %vm2070_vm14, %v4582_v13 }
 0x5f3   : > { %v4852_v4 = vadd.f32 %v5365_v26, %v4602_v50  ;;  %v4846_v28 = vpop.f32.mrb[9].mxu1  ;;  %4547 = vst.msk [vmem:[#allocation3 + $0xf8] sm:$0xff] %vm7895_vm13, %v4471_v27  ;;  %v4612_v50 = vld [vmem:[%s5501_s20 + $0xab] sm:$0xff] }
 0x5f4   : > { %v4847_v3 = vadd.f32 %v4846_v28, %v4601_v14  ;;  %v4611_v14 = vld [vmem:[%s5501_s20 + $0xa3] sm:$0xff] }
 0x5f5   : > { %v4994_v54 = vmax.f32 %v4852_v4, 0.0  ;;  %v4043_v16 = vpop.permute.xlu0 %4042 }
 0x5f6   : > { %v4993_v29 = vmax.f32 %v4847_v3, 0.0  ;;  %4117 = vst.msk [vmem:[#allocation3 + $0x108] sm:$0xff] %vm1555_vm12, %v4043_v16  ;;  %v4041_v30 = vpop.permute.xlu1 %4040  ;;  %v4614_v3 = vld [vmem:[%s5501_s20 + $0xbb] sm:$0xff] }
 0x5f7   : > { %5030 = vst.msk [vmem:[%s6811_s28 + $0x5b] sm:$0xff] %vm198_vm0, %v4994_v54  ;;  %v4613_v54 = vld [vmem:[%s5501_s20 + $0xb3] sm:$0xff] }
 0x5f8   : > { %5029 = vst.msk [vmem:[%s6811_s28 + $0x53] sm:$0xff] %vm198_vm0, %v4993_v29 }
 0x5f9   : > { %4116 = vst.msk [vmem:[#allocation3 + $0x100] sm:$0xff] %vm1555_vm12, %v4041_v30  ;;  %v3613_v53 = vpop.permute.xlu0 %3612 }
 0x5fa   : > { %3686 = vst.msk [vmem:[#allocation3 + $0x110] sm:$0xff] %vm1119_vm8, %v3613_v53  ;;  %v4257_v15 = vpop.permute.xlu1 %4256  ;;  %v4583_v31 = vld [vmem:[#allocation3 + $0xf8] sm:$0xff]  ;;  %vm7897_vm8 = vcmask 193696  }
 0x5fb   : > { %4332 = vst.msk [vmem:[#allocation3 + $0x100] sm:$0xff] %vm1773_vm15, %v4257_v15  ;;  %5397 = vmatmul.mubr.msk.f32.gmra.mrb[30].mxu1 %vm2070_vm14, %v4583_v31 }
 0x5fd   : > { %v4473_v32 = vpop.permute.xlu0 %4472 }
 0x5fe   : > { %4548 = vst.msk [vmem:[#allocation3 + $0x100] sm:$0xff] %vm7867_vm2, %v4473_v32  ;;  %v4259_v6 = vpop.permute.xlu1 %4258  ;;  %v4616_v32 = vld [vmem:[%s5501_s20 + $0xcb] sm:$0xff] }
 0x5ff   : > { %4333 = vst.msk [vmem:[#allocation3 + $0x108] sm:$0xff] %vm1773_vm15, %v4259_v6  ;;  %v4615_v6 = vld [vmem:[%s5501_s20 + $0xc3] sm:$0xff] }
 0x601   : > { %v3829_v33 = vpop.permute.xlu0 %3828 }
 0x602   : > { %3902 = vst.msk [vmem:[#allocation3 + $0x110] sm:$0xff] %vm1337_vm10, %v3829_v33  ;;  %v3615_v34 = vpop.permute.xlu1 %3614  ;;  %vm7899_vm10 = vcmask 226496  }
 0x603   : > { %3687 = vst.msk [vmem:[#allocation3 + $0x118] sm:$0x3f] %vm7896_vm3, %v3615_v34 }
 0x605   : > { %v3831_v35 = vpop.permute.xlu0 %3830  ;;  %v4584_v17 = vld [vmem:[#allocation3 + $0x100] sm:$0xff] }
 0x606   : > { %v5368_v36 = vpop.f32.mrb[10].mxu1  ;;  %3903 = vst.msk [vmem:[#allocation3 + $0x118] sm:$0x3f] %vm7897_vm8, %v3831_v35  ;;  %v4475_v37 = vpop.permute.xlu1 %4474  ;;  %5399 = vmatprep.mubr.msk.f32.mxu1 %vm2070_vm14, %v4584_v17  ;;  %v4618_v17 = vld [vmem:[%s5501_s20 + $0xdb] sm:$0xff] }
 0x607   : > { %v4862_v58 = vadd.f32 %v5368_v36, %v4604_v5  ;;  %v4856_v38 = vpop.f32.mrb[11].mxu1  ;;  %4549 = vst.msk [vmem:[#allocation3 + $0x108] sm:$0xff] %vm7898_vm4, %v4475_v37 }
 0x608   : > { %v4857_v57 = vadd.f32 %v4856_v38, %v4603_v18 }
 0x609   : > { %v4996_v8 = vmax.f32 %v4862_v58, 0.0  ;;  %v4047_v20 = vpop.permute.xlu0 %4046  ;;  %v4617_v58 = vld [vmem:[%s5501_s20 + $0xd3] sm:$0xff] }
 0x60a   : > { %v4995_v39 = vmax.f32 %v4857_v57, 0.0  ;;  %v4045_v40 = vpop.permute.xlu1 %4044  ;;  %4119 = vst.msk [vmem:[#allocation3 + $0x118] sm:$0x3f] %vm7899_vm10, %v4047_v20 }
 0x60b   : > { %5032 = vst.msk [vmem:[%s6811_s28 + $0x6b] sm:$0xff] %vm198_vm0, %v4996_v8 }
 0x60c   : > { %5031 = vst.msk [vmem:[%s6811_s28 + $0x63] sm:$0xff] %vm198_vm0, %v4995_v39 }
 0x60d   : > { %4118 = vst.msk [vmem:[#allocation3 + $0x110] sm:$0xff] %vm1555_vm12, %v4045_v40  ;;  %v4263_v7 = vpop.permute.xlu0 %4262  ;;  %v4620_v40 = vld [vmem:[%s5501_s20 + $0xeb] sm:$0xff] }
 0x60e   : > { %v4261_v19 = vpop.permute.xlu1 %4260  ;;  %4335 = vst.msk [vmem:[#allocation3 + $0x118] sm:$0x3f] %vm7900_vm5, %v4263_v7  ;;  %v4585_v41 = vld [vmem:[#allocation3 + $0x108] sm:$0xff]  ;;  %v4619_v7 = vld [vmem:[%s5501_s20 + $0xe3] sm:$0xff] }
 0x60f   : > { %4334 = vst.msk [vmem:[#allocation3 + $0x110] sm:$0xff] %vm1773_vm15, %v4261_v19  ;;  %5400 = vmatmul.mubr.msk.f32.gmra.mrb[32].mxu1 %vm2070_vm14, %v4585_v41 }
 0x611   : > { %v4479_v42 = vpop.permute.xlu0 %4478 }
 0x612   : > { %v4477_v43 = vpop.permute.xlu1 %4476  ;;  %4551 = vst.msk [vmem:[#allocation3 + $0x118] sm:$0x3f] %vm2027_vm9, %v4479_v42 }
 0x613   : > { %4550 = vst.msk [vmem:[#allocation3 + $0x110] sm:$0xff] %vm7901_vm6, %v4477_v43 }
 0x619   : > { %v4587_v22 = vld [vmem:[#allocation3 + $0x118] sm:$0x3f] }
 0x61a   : > { %v5371_v47 = vpop.f32.mrb[12].mxu1  ;;  %v4586_v21 = vld [vmem:[#allocation3 + $0x110] sm:$0xff] }
 0x61b   : > { %v4872_v10 = vadd.f32 %v5371_v47, %v4606_v44  ;;  %v4866_v48 = vpop.f32.mrb[13].mxu1  ;;  %5402 = vmatprep.mubr.msk.f32.mxu1 %vm2070_vm14, %v4586_v21  ;;  %v4622_v47 = vld [vmem:[%s5501_s20 + $0xfb] sm:$0xff] }
 0x61c   : > { %v4867_v61 = vadd.f32 %v4866_v48, %v4605_v62  ;;  %5403 = vmatmul.mubr.msk.f32.gmra.mrb[34].mxu1 %vm2070_vm14, %v4587_v22  ;;  %v4621_v22 = vld [vmem:[%s5501_s20 + $0xf3] sm:$0xff] }
 0x61d   : > { %v4998_v9 = vmax.f32 %v4872_v10, 0.0 }
 0x61e   : > { %v4997_v51 = vmax.f32 %v4867_v61, 0.0 }
 0x61f   : > { %5034 = vst.msk [vmem:[%s6811_s28 + $0x7b] sm:$0xff] %vm198_vm0, %v4998_v9 }
 0x620   : > { %5033 = vst.msk [vmem:[%s6811_s28 + $0x73] sm:$0xff] %vm198_vm0, %v4997_v51 }
 0x62e   : > { %v5374_v55 = vpop.f32.mrb[14].mxu1 }
 0x62f   : > { %v4882_v23 = vadd.f32 %v5374_v55, %v4608_v52  ;;  %v4876_v56 = vpop.f32.mrb[15].mxu1  ;;  %v4624_v52 = vld [vmem:[%s5501_s20 + $0x10b] sm:$0xff] }
 0x630   : > { %v4877_v59 = vadd.f32 %v4876_v56, %v4607_v24  ;;  %v4623_v24 = vld [vmem:[%s5501_s20 + $0x103] sm:$0xff] }
 0x631   : > { %v5000_v60 = vmax.f32 %v4882_v23, 0.0 }
 0x632   : > { %v4999_v12 = vmax.f32 %v4877_v59, 0.0 }
 0x633   : > { %5036 = vst.msk [vmem:[%s6811_s28 + $0x8b] sm:$0xff] %vm198_vm0, %v5000_v60 }
 0x634   : > { %5035 = vst.msk [vmem:[%s6811_s28 + $0x83] sm:$0xff] %vm198_vm0, %v4999_v12 }
 0x642   : > { %v5377_v11 = vpop.f32.mrb[16].mxu1 }
 0x643   : > { %v4892_v0 = vadd.f32 %v5377_v11, %v4610_v2  ;;  %v4886_v1 = vpop.f32.mrb[17].mxu1  ;;  %v4626_v2 = vld [vmem:[%s5501_s20 + $0x11b] sm:$0xff] }
 0x644   : > { %v4887_v45 = vadd.f32 %v4886_v1, %v4609_v63  ;;  %v4625_v63 = vld [vmem:[%s5501_s20 + $0x113] sm:$0xff] }
 0x645   : > { %v5002_v46 = vmax.f32 %v4892_v0, 0.0 }
 0x646   : > { %v5001_v49 = vmax.f32 %v4887_v45, 0.0 }
 0x647   : > { %5038 = vst.msk [vmem:[%s6811_s28 + $0x9b] sm:$0xff] %vm198_vm0, %v5002_v46 }
 0x648   : > { %5037 = vst.msk [vmem:[%s6811_s28 + $0x93] sm:$0xff] %vm198_vm0, %v5001_v49 }
 0x656   : > { %v5380_v25 = vpop.f32.mrb[18].mxu1 }
 0x657   : > { %v4902_v26 = vadd.f32 %v5380_v25, %v4612_v50  ;;  %v4896_v13 = vpop.f32.mrb[19].mxu1  ;;  %v4628_v50 = vld [vmem:[%s5501_s20 + $0x12b] sm:$0x3f] }
 0x658   : > { %v4897_v4 = vadd.f32 %v4896_v13, %v4611_v14  ;;  %v4627_v14 = vld [vmem:[%s5501_s20 + $0x123] sm:$0xff] }
 0x659   : > { %v5004_v27 = vmax.f32 %v4902_v26, 0.0 }
 0x65a   : > { %v5003_v28 = vmax.f32 %v4897_v4, 0.0 }
 0x65b   : > { %5040 = vst.msk [vmem:[%s6811_s28 + $0xab] sm:$0xff] %vm198_vm0, %v5004_v27 }
 0x65c   : > { %5039 = vst.msk [vmem:[%s6811_s28 + $0xa3] sm:$0xff] %vm198_vm0, %v5003_v28 }
 0x66a   : > { %v5383_v29 = vpop.f32.mrb[20].mxu1 }
 0x66b   : > { %v4912_v16 = vadd.f32 %v5383_v29, %v4614_v3  ;;  %v4906_v30 = vpop.f32.mrb[21].mxu1 }
 0x66c   : > { %v4907_v53 = vadd.f32 %v4906_v30, %v4613_v54 }
 0x66d   : > { %v5006_v15 = vmax.f32 %v4912_v16, 0.0 }
 0x66e   : > { %v5005_v31 = vmax.f32 %v4907_v53, 0.0 }
 0x66f   : > { %5042 = vst.msk [vmem:[%s6811_s28 + $0xbb] sm:$0xff] %vm198_vm0, %v5006_v15 }
 0x670   : > { %5041 = vst.msk [vmem:[%s6811_s28 + $0xb3] sm:$0xff] %vm198_vm0, %v5005_v31 }
 0x67e   : > { %v5386_v33 = vpop.f32.mrb[22].mxu1 }
 0x67f   : > { %v4922_v34 = vadd.f32 %v5386_v33, %v4616_v32  ;;  %v4916_v5 = vpop.f32.mrb[23].mxu1 }
 0x680   : > { %v4917_v18 = vadd.f32 %v4916_v5, %v4615_v6 }
 0x681   : > { %v5008_v35 = vmax.f32 %v4922_v34, 0.0 }
 0x682   : > { %v5007_v36 = vmax.f32 %v4917_v18, 0.0 }
 0x683   : > { %5044 = vst.msk [vmem:[%s6811_s28 + $0xcb] sm:$0xff] %vm198_vm0, %v5008_v35 }
 0x684   : > { %5043 = vst.msk [vmem:[%s6811_s28 + $0xc3] sm:$0xff] %vm198_vm0, %v5007_v36 }
 0x692   : > { %v5389_v37 = vpop.f32.mrb[24].mxu1 }
 0x693   : > { %v4932_v38 = vadd.f32 %v5389_v37, %v4618_v17  ;;  %v4926_v57 = vpop.f32.mrb[25].mxu1 }
 0x694   : > { %v4927_v8 = vadd.f32 %v4926_v57, %v4617_v58 }
 0x695   : > { %v5010_v39 = vmax.f32 %v4932_v38, 0.0 }
 0x696   : > { %v5009_v20 = vmax.f32 %v4927_v8, 0.0 }
 0x697   : > { %5046 = vst.msk [vmem:[%s6811_s28 + $0xdb] sm:$0xff] %vm198_vm0, %v5010_v39 }
 0x698   : > { %5045 = vst.msk [vmem:[%s6811_s28 + $0xd3] sm:$0xff] %vm198_vm0, %v5009_v20 }
 0x6a6   : > { %v5392_v19 = vpop.f32.mrb[26].mxu1 }
 0x6a7   : > { %v4942_v41 = vadd.f32 %v5392_v19, %v4620_v40  ;;  %v4936_v42 = vpop.f32.mrb[27].mxu1 }
 0x6a8   : > { %v4937_v43 = vadd.f32 %v4936_v42, %v4619_v7 }
 0x6a9   : > { %v5012_v44 = vmax.f32 %v4942_v41, 0.0 }
 0x6aa   : > { %v5011_v62 = vmax.f32 %v4937_v43, 0.0 }
 0x6ab   : > { %5048 = vst.msk [vmem:[%s6811_s28 + $0xeb] sm:$0xff] %vm198_vm0, %v5012_v44 }
 0x6ac   : > { %5047 = vst.msk [vmem:[%s6811_s28 + $0xe3] sm:$0xff] %vm198_vm0, %v5011_v62 }
 0x6ba   : > { %v5395_v10 = vpop.f32.mrb[28].mxu1 }
 0x6bb   : > { %v4952_v48 = vadd.f32 %v5395_v10, %v4622_v47  ;;  %v4946_v21 = vpop.f32.mrb[29].mxu1 }
 0x6bc   : > { %v4947_v61 = vadd.f32 %v4946_v21, %v4621_v22 }
 0x6bd   : > { %v5014_v9 = vmax.f32 %v4952_v48, 0.0 }
 0x6be   : > { %v5013_v51 = vmax.f32 %v4947_v61, 0.0 }
 0x6bf   : > { %5050 = vst.msk [vmem:[%s6811_s28 + $0xfb] sm:$0xff] %vm198_vm0, %v5014_v9 }
 0x6c0   : > { %5049 = vst.msk [vmem:[%s6811_s28 + $0xf3] sm:$0xff] %vm198_vm0, %v5013_v51 }
 0x6ce   : > { %v5398_v55 = vpop.f32.mrb[30].mxu1 }
 0x6cf   : > { %v4962_v23 = vadd.f32 %v5398_v55, %v4624_v52  ;;  %v4956_v56 = vpop.f32.mrb[31].mxu1 }
 0x6d0   : > { %v4957_v59 = vadd.f32 %v4956_v56, %v4623_v24 }
 0x6d1   : > { %v5016_v60 = vmax.f32 %v4962_v23, 0.0 }
 0x6d2   : > { %v5015_v12 = vmax.f32 %v4957_v59, 0.0 }
 0x6d3   : > { %5052 = vst.msk [vmem:[%s6811_s28 + $0x10b] sm:$0xff] %vm198_vm0, %v5016_v60 }
 0x6d4   : > { %5051 = vst.msk [vmem:[%s6811_s28 + $0x103] sm:$0xff] %vm198_vm0, %v5015_v12 }
 0x6e2   : > { %v5401_v11 = vpop.f32.mrb[32].mxu1 }
 0x6e3   : > { %v4972_v0 = vadd.f32 %v5401_v11, %v4626_v2  ;;  %v4966_v1 = vpop.f32.mrb[33].mxu1 }
 0x6e4   : > { %v4967_v45 = vadd.f32 %v4966_v1, %v4625_v63 }
 0x6e5   : > { %v5018_v46 = vmax.f32 %v4972_v0, 0.0 }
 0x6e6   : > { %v5017_v49 = vmax.f32 %v4967_v45, 0.0 }
 0x6e7   : > { %5054 = vst.msk [vmem:[%s6811_s28 + $0x11b] sm:$0xff] %vm198_vm0, %v5018_v46 }
 0x6e8   : > { %5053 = vst.msk [vmem:[%s6811_s28 + $0x113] sm:$0xff] %vm198_vm0, %v5017_v49 }
 0x6ef   : > { %v5404_v25 = vpop.f32.mrb[34].mxu1 }
 0x6f0   : > { %v4982_v26 = vadd.f32 %v5404_v25, %v4628_v50  ;;  %v4976_v13 = vpop.f32.mrb[35].mxu1 }
 0x6f1   : > { %v4977_v4 = vadd.f32 %v4976_v13, %v4627_v14 }
 0x6f2   : > { %v5020_v27 = vmax.f32 %v4982_v26, 0.0 }
 0x6f3   : > { %v5019_v28 = vmax.f32 %v4977_v4, 0.0 }
 0x6f4   : > { %5056 = vst.msk [vmem:[%s6811_s28 + $0x12b] sm:$0x3f] %vm283_vm1, %v5020_v27 }
 0x6f5   : > { %5055 = vst.msk [vmem:[%s6811_s28 + $0x123] sm:$0xff] %vm198_vm0, %v5019_v28 }
 0x6f6 PF: > { %s14_s15 = sadd.s32 1, %s5448_s15  }
 0x6f7   : > { %p11_p4 = scmp.ge.s32.totalorder %s14_s15, 4  }
 0x6f9   :  { %13 = sbr.rel (!%p11_p4) target bundleno = 1 (0x1), region = 66 }

</bundles_post_ra>
